<compile_context>
chip_gen: v7x
topology: tpu7x:2x2x1
jax: 0.10.0
libtpu: 0.0.40
codegen_flags: <defaults>
</compile_context>

<pallas_src>
import jax
import jax.numpy as jnp
from jax.experimental import pallas as pl
from jax.experimental.pallas import tpu as pltpu

IN_DIM = 784       # 28*28 MNIST-style flat input (kept at 784 for kernel I/O)
HID = 400          # logical hidden size (matches the PyTorch module)
HID_PAD = 512      # zero-padded hidden size (multiple of 128)
LATENT = 20
TILE_B = 128       # batch tile per grid step (256 also fits VMEM on v6e/v7x)


def _round_up(x, m):
    return (x + m - 1) // m * m


def vae_kernel(x_ref, eps_ref,
               w1_ref, b1_ref, w2m_ref, b2m_ref, w2v_ref, b2v_ref,
               w3_ref, b3_ref, w4_ref, b4_ref,
               recon_ref, mu_ref, logvar_ref):
    bf16 = jnp.bfloat16

    # ---- encoder: Linear(784, 512pad) -> ReLU -> two Linear(512pad, 20) heads ----
    x = x_ref[...].astype(bf16)
    h = jnp.dot(x, w1_ref[...], preferred_element_type=jnp.float32) + b1_ref[...]
    h = jnp.maximum(h, 0.0)
    hb = h.astype(bf16)
    mu = jnp.dot(hb, w2m_ref[...], preferred_element_type=jnp.float32) + b2m_ref[...]
    logvar = jnp.dot(hb, w2v_ref[...], preferred_element_type=jnp.float32) + b2v_ref[...]

    # ---- reparameterize: z = mu + eps * exp(0.5 * logvar)  (f32, EUP exp) ----
    z = mu + eps_ref[...] * jnp.exp(0.5 * logvar)

    # ---- decoder: Linear(20, 512pad) -> ReLU -> Linear(512pad, 784) -> Sigmoid ----
    d = jnp.dot(z.astype(bf16), w3_ref[...], preferred_element_type=jnp.float32) + b3_ref[...]
    d = jnp.maximum(d, 0.0)
    logits = jnp.dot(d.astype(bf16), w4_ref[...], preferred_element_type=jnp.float32) + b4_ref[...]

    recon_ref[...] = jax.nn.sigmoid(logits)
    mu_ref[...] = mu
    logvar_ref[...] = logvar


def vae_forward(x, params, eps, *, tile_b=TILE_B):
    """x: [B, 784] f32, eps: [B, 20] f32 (the randn_like noise).
    Returns (recon_x, mu, logvar) matching VAE.forward (modulo bf16 matmuls)."""
    B = x.shape[0]
    w1, b1, w2m, b2m, w2v, b2v, w3, b3, w4, b4 = params

    # Clamp the tile for small batches (sublane-aligned, multiple of 8) so a
    # batch of e.g. 8 doesn't run a full 128-row MXU tile of wasted work.
    tile_b = min(tile_b, _round_up(B, 8))
    Bp = _round_up(B, tile_b)
    pad = Bp - B
    if pad:
        x = jnp.pad(x, ((0, pad), (0, 0)))
        eps = jnp.pad(eps, ((0, pad), (0, 0)))
    n_tiles = Bp // tile_b

    tiled = lambda cols: pl.BlockSpec((tile_b, cols), lambda i: (i, 0))
    resident = lambda rows, cols: pl.BlockSpec((rows, cols), lambda i: (0, 0))

    grid_spec = pltpu.PrefetchScalarGridSpec(
        num_scalar_prefetch=0,
        grid=(n_tiles,),
        in_specs=[
            tiled(IN_DIM),                     # x
            tiled(LATENT),                     # eps
            resident(IN_DIM, HID_PAD),         # w1
            resident(1, HID_PAD),              # b1
            resident(HID_PAD, LATENT),         # w2_mu
            resident(1, LATENT),               # b2_mu
            resident(HID_PAD, LATENT),         # w2_logvar
            resident(1, LATENT),               # b2_logvar
            resident(LATENT, HID_PAD),         # w3
            resident(1, HID_PAD),              # b3
            resident(HID_PAD, IN_DIM),         # w4
            resident(1, IN_DIM),               # b4
        ],
        out_specs=(
            tiled(IN_DIM),                     # recon_x
            tiled(LATENT),                     # mu
            tiled(LATENT),                     # logvar
        ),
    )

    recon, mu, logvar = pl.pallas_call(
        vae_kernel,
        out_shape=(
            jax.ShapeDtypeStruct((Bp, IN_DIM), jnp.float32),
            jax.ShapeDtypeStruct((Bp, LATENT), jnp.float32),
            jax.ShapeDtypeStruct((Bp, LATENT), jnp.float32),
        ),
        grid_spec=grid_spec,
        compiler_params=pltpu.CompilerParams(
            dimension_semantics=("parallel",),
        ),
    )(x, eps, w1, b1, w2m, b2m, w2v, b2v, w3, b3, w4, b4)

    if pad:
        recon, mu, logvar = recon[:B], mu[:B], logvar[:B]
    return recon, mu, logvar


def init_params(key):
    """nn.Linear-style init. Encoder: Linear(784,400), Linear(400,40) split into
    mu/logvar heads. Decoder: Linear(20,400), Linear(400,784). Hidden dim
    zero-padded to 512; weights stored [in, out] in bf16, biases f32."""
    ks = jax.random.split(key, 10)

    def lin(kw, kb, fan_in, fan_out):
        bound = 1.0 / jnp.sqrt(fan_in)
        w = jax.random.uniform(kw, (fan_in, fan_out), jnp.float32, -bound, bound)
        b = jax.random.uniform(kb, (1, fan_out), jnp.float32, -bound, bound)
        return w, b

    w1, b1 = lin(ks[0], ks[1], IN_DIM, HID)          # encoder[0]
    w2m, b2m = lin(ks[2], ks[3], HID, LATENT)        # encoder[2] (mu head)
    w2v, b2v = lin(ks[4], ks[5], HID, LATENT)        # encoder[2] (logvar head)
    w3, b3 = lin(ks[6], ks[7], LATENT, HID)          # decoder[0]
    w4, b4 = lin(ks[8], ks[9], HID, IN_DIM)          # decoder[2]

    hp = HID_PAD - HID
    # Zero-pad the hidden dimension (exact: pads contribute relu(0)=0 / zero rows).
    w1 = jnp.pad(w1, ((0, 0), (0, hp)))
    b1 = jnp.pad(b1, ((0, 0), (0, hp)))
    w2m = jnp.pad(w2m, ((0, hp), (0, 0)))
    w2v = jnp.pad(w2v, ((0, hp), (0, 0)))
    w3 = jnp.pad(w3, ((0, 0), (0, hp)))
    b3 = jnp.pad(b3, ((0, 0), (0, hp)))
    w4 = jnp.pad(w4, ((0, hp), (0, 0)))

    bf16 = jnp.bfloat16
    return (w1.astype(bf16), b1,
            w2m.astype(bf16), b2m,
            w2v.astype(bf16), b2v,
            w3.astype(bf16), b3,
            w4.astype(bf16), b4)


def vae_forward_ref(x, params, eps):
    """Pure-JAX reference mirroring the kernel's bf16 matmul / f32 elementwise math."""
    w1, b1, w2m, b2m, w2v, b2v, w3, b3, w4, b4 = params
    bf16 = jnp.bfloat16
    h = jnp.maximum(jnp.dot(x.astype(bf16), w1, preferred_element_type=jnp.float32) + b1, 0.0)
    hb = h.astype(bf16)
    mu = jnp.dot(hb, w2m, preferred_element_type=jnp.float32) + b2m
    logvar = jnp.dot(hb, w2v, preferred_element_type=jnp.float32) + b2v
    z = mu + eps * jnp.exp(0.5 * logvar)
    d = jnp.maximum(jnp.dot(z.astype(bf16), w3, preferred_element_type=jnp.float32) + b3, 0.0)
    recon = jax.nn.sigmoid(jnp.dot(d.astype(bf16), w4, preferred_element_type=jnp.float32) + b4)
    return recon, mu, logvar


if __name__ == "__main__":
    key = jax.random.PRNGKey(0)
    k_param, k_x, k_eps = jax.random.split(key, 3)

    B = 256  # 2 grid steps of TILE_B=128
    x = jax.random.uniform(k_x, (B, IN_DIM), jnp.float32)        # MNIST-like flat input
    eps = jax.random.normal(k_eps, (B, LATENT), jnp.float32)     # reparameterization noise
    params = init_params(k_param)

    # NOTE: the PyTorch forward prints logvar.shape as a side effect; here logvar is [B, 20].
    recon, mu, logvar = jax.block_until_ready(vae_forward(x, params, eps))

    # Exercise the clamped-tile / batch-padding path with a tiny batch too.
    r_s, m_s, lv_s = jax.block_until_ready(vae_forward(x[:5], params, eps[:5]))

    r_ref, m_ref, lv_ref = vae_forward_ref(x, params, eps)
    assert recon.shape == (B, IN_DIM) and mu.shape == (B, LATENT) and logvar.shape == (B, LATENT)
    assert r_s.shape == (5, IN_DIM) and m_s.shape == (5, LATENT) and lv_s.shape == (5, LATENT)
    # bf16 matmuls with f32 accumulation: allow small accumulation-order slack.
    assert jnp.allclose(recon, r_ref, atol=1e-2, rtol=1e-2)
    assert jnp.allclose(mu, m_ref, atol=1e-2, rtol=1e-2)
    assert jnp.allclose(logvar, lv_ref, atol=1e-2, rtol=1e-2)
    assert jnp.allclose(r_s, r_ref[:5], atol=1e-2, rtol=1e-2)
    assert jnp.allclose(m_s, m_ref[:5], atol=1e-2, rtol=1e-2)
    assert jnp.allclose(lv_s, lv_ref[:5], atol=1e-2, rtol=1e-2)

    print("KERNEL_OK")
</pallas_src>

<mosaic_0001>
module attributes {stable_mosaic.version = 11 : i64} {
  func.func @vae_kernel(%arg0: i32, %arg1: memref<128x784xf32, #tpu.memory_space<vmem>>, %arg2: memref<128x20xf32, #tpu.memory_space<vmem>>, %arg3: memref<784x512xbf16, #tpu.memory_space<vmem>>, %arg4: memref<1x512xf32, #tpu.memory_space<vmem>>, %arg5: memref<512x20xbf16, #tpu.memory_space<vmem>>, %arg6: memref<1x20xf32, #tpu.memory_space<vmem>>, %arg7: memref<512x20xbf16, #tpu.memory_space<vmem>>, %arg8: memref<1x20xf32, #tpu.memory_space<vmem>>, %arg9: memref<20x512xbf16, #tpu.memory_space<vmem>>, %arg10: memref<1x512xf32, #tpu.memory_space<vmem>>, %arg11: memref<512x784xbf16, #tpu.memory_space<vmem>>, %arg12: memref<1x784xf32, #tpu.memory_space<vmem>>, %arg13: memref<128x784xf32, #tpu.memory_space<vmem>>, %arg14: memref<128x20xf32, #tpu.memory_space<vmem>>, %arg15: memref<128x20xf32, #tpu.memory_space<vmem>>) attributes {dimension_semantics = [#tpu.dimension_semantics<parallel>], iteration_bounds = array<i64: 2>, scalar_prefetch = 0 : i64, scratch_operands = 0 : i64, tpu.core_type = #tpu.core_type<tc>, window_params = [{transform_indices = @transform_0, window_bounds = array<i64: 128, 784>}, {transform_indices = @transform_1, window_bounds = array<i64: 128, 20>}, {pipeline_mode = #tpu.pipeline_mode<synchronous>, transform_indices = @transform_2, window_bounds = array<i64: 784, 512>}, {pipeline_mode = #tpu.pipeline_mode<synchronous>, transform_indices = @transform_3, window_bounds = array<i64: 1, 512>}, {pipeline_mode = #tpu.pipeline_mode<synchronous>, transform_indices = @transform_4, window_bounds = array<i64: 512, 20>}, {pipeline_mode = #tpu.pipeline_mode<synchronous>, transform_indices = @transform_5, window_bounds = array<i64: 1, 20>}, {pipeline_mode = #tpu.pipeline_mode<synchronous>, transform_indices = @transform_6, window_bounds = array<i64: 512, 20>}, {pipeline_mode = #tpu.pipeline_mode<synchronous>, transform_indices = @transform_7, window_bounds = array<i64: 1, 20>}, {pipeline_mode = #tpu.pipeline_mode<synchronous>, transform_indices = @transform_8, window_bounds = array<i64: 20, 512>}, {pipeline_mode = #tpu.pipeline_mode<synchronous>, transform_indices = @transform_9, window_bounds = array<i64: 1, 512>}, {pipeline_mode = #tpu.pipeline_mode<synchronous>, transform_indices = @transform_10, window_bounds = array<i64: 512, 784>}, {pipeline_mode = #tpu.pipeline_mode<synchronous>, transform_indices = @transform_11, window_bounds = array<i64: 1, 784>}, {transform_indices = @transform_12, window_bounds = array<i64: 128, 784>}, {transform_indices = @transform_13, window_bounds = array<i64: 128, 20>}, {transform_indices = @transform_14, window_bounds = array<i64: 128, 20>}]} {
    %c0 = arith.constant 0 : index
    %c0_0 = arith.constant 0 : index
    %0 = vector.load %arg1[%c0, %c0_0] : memref<128x784xf32, #tpu.memory_space<vmem>>, vector<128x784xf32>
    %1 = arith.truncf %0 : vector<128x784xf32> to vector<128x784xbf16>
    %c0_1 = arith.constant 0 : index
    %c0_2 = arith.constant 0 : index
    %2 = vector.load %arg3[%c0_1, %c0_2] : memref<784x512xbf16, #tpu.memory_space<vmem>>, vector<784x512xbf16>
    %cst = arith.constant dense<0.000000e+00> : vector<128x512xf32>
    %3 = tpu.matmul %1, %2, %cst {dimension_numbers = #tpu.dot_dimension_numbers<[1], [0], [0], [1], [0, 0, 1, 1], [], []>} : vector<128x784xbf16>, vector<784x512xbf16>, vector<128x512xf32> -> vector<128x512xf32>
    %c0_3 = arith.constant 0 : index
    %c0_4 = arith.constant 0 : index
    %4 = vector.load %arg4[%c0_3, %c0_4] : memref<1x512xf32, #tpu.memory_space<vmem>>, vector<1x512xf32>
    %5 = vector.broadcast %4 : vector<1x512xf32> to vector<128x512xf32>
    %6 = arith.addf %3, %5 : vector<128x512xf32>
    %cst_5 = arith.constant 0.000000e+00 : f32
    %7 = vector.broadcast %cst_5 : f32 to vector<128x512xf32>
    %8 = arith.maximumf %6, %7 : vector<128x512xf32>
    %9 = arith.truncf %8 : vector<128x512xf32> to vector<128x512xbf16>
    %c0_6 = arith.constant 0 : index
    %c0_7 = arith.constant 0 : index
    %10 = vector.load %arg5[%c0_6, %c0_7] : memref<512x20xbf16, #tpu.memory_space<vmem>>, vector<512x20xbf16>
    %cst_8 = arith.constant dense<0.000000e+00> : vector<128x20xf32>
    %11 = tpu.matmul %9, %10, %cst_8 {dimension_numbers = #tpu.dot_dimension_numbers<[1], [0], [0], [1], [0, 0, 1, 1], [], []>} : vector<128x512xbf16>, vector<512x20xbf16>, vector<128x20xf32> -> vector<128x20xf32>
    %c0_9 = arith.constant 0 : index
    %c0_10 = arith.constant 0 : index
    %12 = vector.load %arg6[%c0_9, %c0_10] : memref<1x20xf32, #tpu.memory_space<vmem>>, vector<1x20xf32>
    %13 = vector.broadcast %12 : vector<1x20xf32> to vector<128x20xf32>
    %14 = arith.addf %11, %13 : vector<128x20xf32>
    %c0_11 = arith.constant 0 : index
    %c0_12 = arith.constant 0 : index
    %15 = vector.load %arg7[%c0_11, %c0_12] : memref<512x20xbf16, #tpu.memory_space<vmem>>, vector<512x20xbf16>
    %cst_13 = arith.constant dense<0.000000e+00> : vector<128x20xf32>
    %16 = tpu.matmul %9, %15, %cst_13 {dimension_numbers = #tpu.dot_dimension_numbers<[1], [0], [0], [1], [0, 0, 1, 1], [], []>} : vector<128x512xbf16>, vector<512x20xbf16>, vector<128x20xf32> -> vector<128x20xf32>
    %c0_14 = arith.constant 0 : index
    %c0_15 = arith.constant 0 : index
    %17 = vector.load %arg8[%c0_14, %c0_15] : memref<1x20xf32, #tpu.memory_space<vmem>>, vector<1x20xf32>
    %18 = vector.broadcast %17 : vector<1x20xf32> to vector<128x20xf32>
    %19 = arith.addf %16, %18 : vector<128x20xf32>
    %c0_16 = arith.constant 0 : index
    %c0_17 = arith.constant 0 : index
    %20 = vector.load %arg2[%c0_16, %c0_17] : memref<128x20xf32, #tpu.memory_space<vmem>>, vector<128x20xf32>
    %cst_18 = arith.constant 5.000000e-01 : f32
    %21 = vector.broadcast %cst_18 : f32 to vector<128x20xf32>
    %22 = arith.mulf %21, %19 : vector<128x20xf32>
    %23 = math.exp %22 : vector<128x20xf32>
    %24 = arith.mulf %20, %23 : vector<128x20xf32>
    %25 = arith.addf %14, %24 : vector<128x20xf32>
    %26 = arith.truncf %25 : vector<128x20xf32> to vector<128x20xbf16>
    %c0_19 = arith.constant 0 : index
    %c0_20 = arith.constant 0 : index
    %27 = vector.load %arg9[%c0_19, %c0_20] : memref<20x512xbf16, #tpu.memory_space<vmem>>, vector<20x512xbf16>
    %cst_21 = arith.constant dense<0.000000e+00> : vector<128x512xf32>
    %28 = tpu.matmul %26, %27, %cst_21 {dimension_numbers = #tpu.dot_dimension_numbers<[1], [0], [0], [1], [0, 0, 1, 1], [], []>} : vector<128x20xbf16>, vector<20x512xbf16>, vector<128x512xf32> -> vector<128x512xf32>
    %c0_22 = arith.constant 0 : index
    %c0_23 = arith.constant 0 : index
    %29 = vector.load %arg10[%c0_22, %c0_23] : memref<1x512xf32, #tpu.memory_space<vmem>>, vector<1x512xf32>
    %30 = vector.broadcast %29 : vector<1x512xf32> to vector<128x512xf32>
    %31 = arith.addf %28, %30 : vector<128x512xf32>
    %cst_24 = arith.constant 0.000000e+00 : f32
    %32 = vector.broadcast %cst_24 : f32 to vector<128x512xf32>
    %33 = arith.maximumf %31, %32 : vector<128x512xf32>
    %34 = arith.truncf %33 : vector<128x512xf32> to vector<128x512xbf16>
    %c0_25 = arith.constant 0 : index
    %c0_26 = arith.constant 0 : index
    %35 = vector.load %arg11[%c0_25, %c0_26] : memref<512x784xbf16, #tpu.memory_space<vmem>>, vector<512x784xbf16>
    %cst_27 = arith.constant dense<0.000000e+00> : vector<128x784xf32>
    %36 = tpu.matmul %34, %35, %cst_27 {dimension_numbers = #tpu.dot_dimension_numbers<[1], [0], [0], [1], [0, 0, 1, 1], [], []>} : vector<128x512xbf16>, vector<512x784xbf16>, vector<128x784xf32> -> vector<128x784xf32>
    %c0_28 = arith.constant 0 : index
    %c0_29 = arith.constant 0 : index
    %37 = vector.load %arg12[%c0_28, %c0_29] : memref<1x784xf32, #tpu.memory_space<vmem>>, vector<1x784xf32>
    %38 = vector.broadcast %37 : vector<1x784xf32> to vector<128x784xf32>
    %39 = arith.addf %36, %38 : vector<128x784xf32>
    %40 = arith.negf %39 : vector<128x784xf32>
    %41 = math.exp %40 : vector<128x784xf32>
    %cst_30 = arith.constant 1.000000e+00 : f32
    %42 = vector.broadcast %cst_30 : f32 to vector<128x784xf32>
    %43 = arith.addf %42, %41 : vector<128x784xf32>
    %44 = arith.divf %42, %43 : vector<128x784xf32>
    %c0_31 = arith.constant 0 : index
    %c0_32 = arith.constant 0 : index
    %45 = vector.load %arg13[%c0_31, %c0_32] : memref<128x784xf32, #tpu.memory_space<vmem>>, vector<128x784xf32>
    tpu.vector_store %arg13[%c0_31, %c0_32], %44 {strides = array<i32>} : memref<128x784xf32, #tpu.memory_space<vmem>>, vector<128x784xf32>,
    %c0_33 = arith.constant 0 : index
    %c0_34 = arith.constant 0 : index
    %46 = vector.load %arg14[%c0_33, %c0_34] : memref<128x20xf32, #tpu.memory_space<vmem>>, vector<128x20xf32>
    tpu.vector_store %arg14[%c0_33, %c0_34], %14 {strides = array<i32>} : memref<128x20xf32, #tpu.memory_space<vmem>>, vector<128x20xf32>,
    %c0_35 = arith.constant 0 : index
    %c0_36 = arith.constant 0 : index
    %47 = vector.load %arg15[%c0_35, %c0_36] : memref<128x20xf32, #tpu.memory_space<vmem>>, vector<128x20xf32>
    tpu.vector_store %arg15[%c0_35, %c0_36], %19 {strides = array<i32>} : memref<128x20xf32, #tpu.memory_space<vmem>>, vector<128x20xf32>,
    return
  }
  func.func @transform_0(%arg0: i32) -> (i32, i32) {
    %c0_i32 = arith.constant 0 : i32
    %c0_i32_0 = arith.constant 0 : i32
    return %arg0, %c0_i32 : i32, i32
  }
  func.func @transform_1(%arg0: i32) -> (i32, i32) {
    %c0_i32 = arith.constant 0 : i32
    %c0_i32_0 = arith.constant 0 : i32
    return %arg0, %c0_i32 : i32, i32
  }
  func.func @transform_2(%arg0: i32) -> (i32, i32) {
    %c0_i32 = arith.constant 0 : i32
    %c0_i32_0 = arith.constant 0 : i32
    %c0_i32_1 = arith.constant 0 : i32
    return %c0_i32, %c0_i32_0 : i32, i32
  }
  func.func @transform_3(%arg0: i32) -> (i32, i32) {
    %c0_i32 = arith.constant 0 : i32
    %c0_i32_0 = arith.constant 0 : i32
    %c0_i32_1 = arith.constant 0 : i32
    return %c0_i32, %c0_i32_0 : i32, i32
  }
  func.func @transform_4(%arg0: i32) -> (i32, i32) {
    %c0_i32 = arith.constant 0 : i32
    %c0_i32_0 = arith.constant 0 : i32
    %c0_i32_1 = arith.constant 0 : i32
    return %c0_i32, %c0_i32_0 : i32, i32
  }
  func.func @transform_5(%arg0: i32) -> (i32, i32) {
    %c0_i32 = arith.constant 0 : i32
    %c0_i32_0 = arith.constant 0 : i32
    %c0_i32_1 = arith.constant 0 : i32
    return %c0_i32, %c0_i32_0 : i32, i32
  }
  func.func @transform_6(%arg0: i32) -> (i32, i32) {
    %c0_i32 = arith.constant 0 : i32
    %c0_i32_0 = arith.constant 0 : i32
    %c0_i32_1 = arith.constant 0 : i32
    return %c0_i32, %c0_i32_0 : i32, i32
  }
  func.func @transform_7(%arg0: i32) -> (i32, i32) {
    %c0_i32 = arith.constant 0 : i32
    %c0_i32_0 = arith.constant 0 : i32
    %c0_i32_1 = arith.constant 0 : i32
    return %c0_i32, %c0_i32_0 : i32, i32
  }
  func.func @transform_8(%arg0: i32) -> (i32, i32) {
    %c0_i32 = arith.constant 0 : i32
    %c0_i32_0 = arith.constant 0 : i32
    %c0_i32_1 = arith.constant 0 : i32
    return %c0_i32, %c0_i32_0 : i32, i32
  }
  func.func @transform_9(%arg0: i32) -> (i32, i32) {
    %c0_i32 = arith.constant 0 : i32
    %c0_i32_0 = arith.constant 0 : i32
    %c0_i32_1 = arith.constant 0 : i32
    return %c0_i32, %c0_i32_0 : i32, i32
  }
  func.func @transform_10(%arg0: i32) -> (i32, i32) {
    %c0_i32 = arith.constant 0 : i32
    %c0_i32_0 = arith.constant 0 : i32
    %c0_i32_1 = arith.constant 0 : i32
    return %c0_i32, %c0_i32_0 : i32, i32
  }
  func.func @transform_11(%arg0: i32) -> (i32, i32) {
    %c0_i32 = arith.constant 0 : i32
    %c0_i32_0 = arith.constant 0 : i32
    %c0_i32_1 = arith.constant 0 : i32
    return %c0_i32, %c0_i32_0 : i32, i32
  }
  func.func @transform_12(%arg0: i32) -> (i32, i32) {
    %c0_i32 = arith.constant 0 : i32
    %c0_i32_0 = arith.constant 0 : i32
    return %arg0, %c0_i32 : i32, i32
  }
  func.func @transform_13(%arg0: i32) -> (i32, i32) {
    %c0_i32 = arith.constant 0 : i32
    %c0_i32_0 = arith.constant 0 : i32
    return %arg0, %c0_i32 : i32, i32
  }
  func.func @transform_14(%arg0: i32) -> (i32, i32) {
    %c0_i32 = arith.constant 0 : i32
    %c0_i32_0 = arith.constant 0 : i32
    return %arg0, %c0_i32 : i32, i32
  }
}

</mosaic_0001>

<bundles_post_ra>
// kernel: tpu_custom_call.1
= control target key start
LH: loop header
LB: loop body
LE: loop exit
PB: predicated region body
PF: predicated region fallthrough
CT: control target
= control target key end

     0   :  { %s10376_s29 = smov 0   ;;  %s13228_s0 = inlined_call_operand.vmem [shape: f32[256,784], index: 0, kind: input, shape index: {}]   ;;  %s13229_s1 = inlined_call_operand.vmem [shape: f32[256,20], index: 1, kind: input, shape index: {}]   ;;  %s13230_s2 = inlined_call_operand.vmem [shape: bf16[784,512], index: 2, kind: input, shape index: {}]   ;;  %s13231_s3 = inlined_call_operand.vmem [shape: f32[1,512], index: 3, kind: input, shape index: {}]   ;;  %s13232_s4 = inlined_call_operand.vmem [shape: bf16[512,20], index: 4, kind: input, shape index: {}]   ;;  %s13233_s5 = inlined_call_operand.vmem [shape: f32[1,20], index: 5, kind: input, shape index: {}]   ;;  %s13234_s6 = inlined_call_operand.vmem [shape: bf16[512,20], index: 6, kind: input, shape index: {}]   ;;  %s13235_s7 = inlined_call_operand.vmem [shape: f32[1,20], index: 7, kind: input, shape index: {}]   ;;  %s13236_s8 = inlined_call_operand.vmem [shape: bf16[20,512], index: 8, kind: input, shape index: {}]   ;;  %s13237_s9 = inlined_call_operand.vmem [shape: f32[1,512], index: 9, kind: input, shape index: {}]   ;;  %s13238_s10 = inlined_call_operand.vmem [shape: bf16[512,784], index: 10, kind: input, shape index: {}]   ;;  %s13239_s11 = inlined_call_operand.vmem [shape: f32[1,784], index: 11, kind: input, shape index: {}]   ;;  %s13240_s12 = inlined_call_operand.vmem [shape: f32[256,784], index: 12, kind: output, shape index: {0}]   ;;  %s13241_s13 = inlined_call_operand.vmem [shape: f32[256,20], index: 13, kind: output, shape index: {1}]   ;;  %s13242_s14 = inlined_call_operand.vmem [shape: f32[256,20], index: 14, kind: output, shape index: {2}]  }
   0x1 LB: > { %s7624_s30 = sadd.s32 4294967295, %s10298_s29   ;;  %p7628_p0 = scmp.ge.s32.totalorder %s10298_s29, 1  ;;  %s10298_s29 = sphi %s10376_s29, %s25_s29  }
   0x2   : > { %p430_p1 = scmp.lt.s32.totalorder %s10298_s29, 3 }
   0x4   : > { %p431_p2 = pnand %p7628_p0, %p430_p1 }
   0x5   : > { %v9123_v0 = vld [vmem:[%s13230_s2 + $0x4] ss:$16 sps:$4 sm:$0xff] (!%p431_p2)   ;;  %v9125_v1 = vld [vmem:[%s13230_s2 + $0xc] ss:$16 sps:$4 sm:$0xff] (!%p431_p2)   ;;  %v9127_v2 = vld [vmem:[%s13230_s2] ss:$16 sps:$4 sm:$0xff] (!%p431_p2)  }
   0x6   : > { %434 = sbr.rel (%p431_p2) target bundleno = 1537 (0x601), region = 68  ;;  %1917 = vmatprep.subr.bf16.mxu0 (!%p431_p2), %v9123_v0  ;;  %v9128_v3 = vld [vmem:[%s13230_s2 + $0x8] ss:$16 sps:$4 sm:$0xff] (!%p431_p2)   ;;  %2369 = vmatprep.subr.bf16.mxu1 (!%p431_p2), %v9125_v1  ;;  %v9129_v4 = vld [vmem:[%s13230_s2 + $0x24] ss:$16 sps:$4 sm:$0xff] (!%p431_p2)   ;;  %s7629_s17 = sshll.u32 (!%p431_p2), %s7624_s30, 4 }
   0x7   : > { %1918 = vmatpush1.bf16.msra.mxu0 (!%p431_p2), %v9127_v2  ;;  %2370 = vmatpush1.bf16.msra.mxu1 (!%p431_p2), %v9128_v3  ;;  %v9131_v5 = vld [vmem:[%s13230_s2 + $0x2c] ss:$16 sps:$4 sm:$0xff] (!%p431_p2)   ;;  %v9133_v6 = vld [vmem:[%s13230_s2 + $0x20] ss:$16 sps:$4 sm:$0xff] (!%p431_p2)   ;;  %v9134_v7 = vld [vmem:[%s13230_s2 + $0x28] ss:$16 sps:$4 sm:$0xff] (!%p431_p2)  }
   0x8   : > { %1919 = vmatprep.subr.bf16.mxu0 (!%p431_p2), %v9129_v4  ;;  %2371 = vmatprep.subr.bf16.mxu1 (!%p431_p2), %v9131_v5  ;;  %v9135_v8 = vld [vmem:[%s13230_s2 + $0x44] ss:$16 sps:$4 sm:$0xff] (!%p431_p2)   ;;  %v9137_v9 = vld [vmem:[%s13230_s2 + $0x4c] ss:$16 sps:$4 sm:$0xff] (!%p431_p2)   ;;  %v9139_v10 = vld [vmem:[%s13230_s2 + $0x40] ss:$16 sps:$4 sm:$0xff] (!%p431_p2)  }
   0x9   : > { %v9140_v11 = vld [vmem:[%s13230_s2 + $0x48] ss:$16 sps:$4 sm:$0xff] (!%p431_p2)   ;;  %v9141_v12 = vld [vmem:[%s13230_s2 + $0x64] ss:$16 sps:$4 sm:$0xff] (!%p431_p2)   ;;  %v9143_v13 = vld [vmem:[%s13230_s2 + $0x6c] ss:$16 sps:$4 sm:$0xff] (!%p431_p2)  }
   0xa   : > { %v9145_v14 = vld [vmem:[%s13230_s2 + $0x60] ss:$16 sps:$4 sm:$0xff] (!%p431_p2)   ;;  %v9146_v15 = vld [vmem:[%s13230_s2 + $0x68] ss:$16 sps:$4 sm:$0xff] (!%p431_p2)   ;;  %v9147_v16 = vld [vmem:[%s13230_s2 + $0x84] ss:$16 sps:$4 sm:$0xff] (!%p431_p2)  }
   0xb   : > { %1920 = vmatpush1.bf16.msra.mxu0 (!%p431_p2), %v9133_v6  ;;  %2372 = vmatpush1.bf16.msra.mxu1 (!%p431_p2), %v9134_v7  ;;  %v9149_v17 = vld [vmem:[%s13230_s2 + $0x8c] ss:$16 sps:$4 sm:$0xff] (!%p431_p2)   ;;  %v9151_v18 = vld [vmem:[%s13230_s2 + $0x80] ss:$16 sps:$4 sm:$0xff] (!%p431_p2)   ;;  %v9152_v19 = vld [vmem:[%s13230_s2 + $0x88] ss:$16 sps:$4 sm:$0xff] (!%p431_p2)  }
   0xc   : > { %1921 = vmatprep.subr.bf16.mxu0 (!%p431_p2), %v9135_v8  ;;  %2373 = vmatprep.subr.bf16.mxu1 (!%p431_p2), %v9137_v9  ;;  %v9153_v20 = vld [vmem:[%s13230_s2 + $0xa4] ss:$16 sps:$4 sm:$0xff] (!%p431_p2)   ;;  %v9155_v21 = vld [vmem:[%s13230_s2 + $0xac] ss:$16 sps:$4 sm:$0xff] (!%p431_p2)   ;;  %v9157_v22 = vld [vmem:[%s13230_s2 + $0xa0] ss:$16 sps:$4 sm:$0xff] (!%p431_p2)  }
   0xd   : > { %v9158_v23 = vld [vmem:[%s13230_s2 + $0xa8] ss:$16 sps:$4 sm:$0xff]   ;;  %v9159_v24 = vld [vmem:[%s13230_s2 + $0xc4] ss:$16 sps:$4 sm:$0xff]   ;;  %v9161_v25 = vld [vmem:[%s13230_s2 + $0xcc] ss:$16 sps:$4 sm:$0xff]  }
   0xe   : > { %v9163_v26 = vld [vmem:[%s13230_s2 + $0xc0] ss:$16 sps:$4 sm:$0xff]   ;;  %v9164_v27 = vld [vmem:[%s13230_s2 + $0xc8] ss:$16 sps:$4 sm:$0xff]   ;;  %v9165_v28 = vld [vmem:[%s13230_s2 + $0xe4] ss:$16 sps:$4 sm:$0xff]  }
   0xf   : > { %1922 = vmatpush1.bf16.msra.mxu0 %v9139_v10  ;;  %2374 = vmatpush1.bf16.msra.mxu1 %v9140_v11  ;;  %v9167_v29 = vld [vmem:[%s13230_s2 + $0xec] ss:$16 sps:$4 sm:$0xff]   ;;  %v9169_v30 = vld [vmem:[%s13230_s2 + $0xe0] ss:$16 sps:$4 sm:$0xff]   ;;  %p494_p3 = scmp.lt.s32.totalorder %s7629_s17, 31  ;;  %vm1892_vm0 = vcmask 130048  }
  0x10   : > { %1923 = vmatprep.subr.bf16.mxu0 %v9141_v12  ;;  %2375 = vmatprep.subr.bf16.mxu1 %v9143_v13  ;;  %v9170_v31 = vld [vmem:[%s13230_s2 + $0xe8] ss:$16 sps:$4 sm:$0xff]   ;;  %v9171_v32 = vld [vmem:[%s13230_s2 + $0x104] ss:$16 sps:$4 sm:$0xff]   ;;  %v9173_v33 = vld [vmem:[%s13230_s2 + $0x10c] ss:$16 sps:$4 sm:$0xff]  }
  0x11   : > { %v9175_v34 = vld [vmem:[%s13230_s2 + $0x100] ss:$16 sps:$4 sm:$0xff]   ;;  %v9176_v35 = vld [vmem:[%s13230_s2 + $0x108] ss:$16 sps:$4 sm:$0xff]   ;;  %s13244_s17 = smov (!%p494_p3, %s7629_s17), 31  ;;  %vm4018_vm1 = vcmask 1041408  }
  0x12   : > { %v9177_v36 = vld [vmem:[%s13230_s2 + $0x124] ss:$16 sps:$4 sm:$0xff]   ;;  %v9179_v37 = vld [vmem:[%s13230_s2 + $0x12c] ss:$16 sps:$4 sm:$0xff]   ;;  %v9181_v38 = vld [vmem:[%s13230_s2 + $0x120] ss:$16 sps:$4 sm:$0xff]  }
  0x13   : > { %1924 = vmatpush1.bf16.msra.mxu0 %v9145_v14  ;;  %2376 = vmatpush1.bf16.msra.mxu1 %v9146_v15  ;;  %s9113_s24 = smul.u32 56, %s13244_s17  ;;  %v9182_v39 = vld [vmem:[%s13230_s2 + $0x128] ss:$16 sps:$4 sm:$0xff]   ;;  %v9183_v40 = vld [vmem:[%s13230_s2 + $0x144] ss:$16 sps:$4 sm:$0xff]   ;;  %s11543_s20 = sshll.u32 %s13244_s17, 3 }
  0x14   : > { %1925 = vmatprep.subr.bf16.mxu0 %v9147_v16  ;;  %2377 = vmatprep.subr.bf16.mxu1 %v9149_v17  ;;  %v9185_v41 = vld [vmem:[%s13230_s2 + $0x14c] ss:$16 sps:$4 sm:$0xff]   ;;  %v9187_v42 = vld [vmem:[%s13230_s2 + $0x140] ss:$16 sps:$4 sm:$0xff]   ;;  %v9188_v43 = vld [vmem:[%s13230_s2 + $0x148] ss:$16 sps:$4 sm:$0xff]   ;;  %s11550_s25 = scalar_lea.vmem %s13241_s13, %s11543_s20  ;;  %s11663_s19 = scalar_lea.vmem %s13242_s14, %s11543_s20 }
  0x15   : > { %s10526_s23 = scalar_lea.vmem %s13228_s0, %s9113_s24  ;;  %v9189_v44 = vld [vmem:[%s13230_s2 + $0x164] ss:$16 sps:$4 sm:$0xff]   ;;  %v9191_v45 = vld [vmem:[%s13230_s2 + $0x16c] ss:$16 sps:$4 sm:$0xff]   ;;  %v9193_v47 = vld [vmem:[%s13230_s2 + $0x160] ss:$16 sps:$4 sm:$0xff]   ;;  %s12759_s21 = scalar_lea.vmem %s13240_s12, %s9113_s24 }
  0x16   : > { %v527_v46 = vld [vmem:[%s10526_s23 + $0x8] sm:$0xff]  ;;  %v534_v49 = vld [vmem:[%s10526_s23 + $0x40] sm:$0xff]  ;;  %v533_v4 = vld [vmem:[%s10526_s23 + $0x38] sm:$0xff]  ;;  %vm3993_vm2 = vcmask 162816  }
  0x17   : > { %1926 = vmatpush1.bf16.msra.mxu0 %v9151_v18  ;;  %2378 = vmatpush1.bf16.msra.mxu1 %v9152_v19  ;;  %v9194_v48 = vld [vmem:[%s13230_s2 + $0x168] ss:$16 sps:$4 sm:$0xff]   ;;  %v9195_v50 = vld [vmem:[%s13230_s2 + $0x184] ss:$16 sps:$4 sm:$0xff]   ;;  %v639_v51 = vpack.c.bf16 %v534_v49, %v527_v46  ;;  %v9197_v52 = vld [vmem:[%s13230_s2 + $0x18c] ss:$16 sps:$4 sm:$0xff]  }
  0x18   : > { %1927 = vmatprep.subr.bf16.mxu0 %v9153_v20  ;;  %2379 = vmatprep.subr.bf16.mxu1 %v9155_v21  ;;  %v9199_v53 = vld [vmem:[%s13230_s2 + $0x180] ss:$16 sps:$4 sm:$0xff]   ;;  %v9200_v54 = vld [vmem:[%s13230_s2 + $0x188] ss:$16 sps:$4 sm:$0xff]   ;;  %v9201_v55 = vld [vmem:[%s13230_s2 + $0x1a4] ss:$16 sps:$4 sm:$0xff]  }
  0x19   : > { %1949 = vmatprep.mubr.bf16.mxu0 %v639_v51  ;;  %2401 = vmatprep.mubr.bf16.mxu1 %v639_v51  ;;  %v9203_v56 = vld [vmem:[%s13230_s2 + $0x1ac] ss:$16 sps:$4 sm:$0xff]   ;;  %v9205_v57 = vld [vmem:[%s13230_s2 + $0x1a0] ss:$16 sps:$4 sm:$0xff]   ;;  %v9206_v58 = vld [vmem:[%s13230_s2 + $0x1a8] ss:$16 sps:$4 sm:$0xff]  }
  0x1a   : > { %v9207_v59 = vld [vmem:[%s13230_s2 + $0x1c4] ss:$16 sps:$4 sm:$0xff]   ;;  %v9209_v60 = vld [vmem:[%s13230_s2 + $0x1cc] ss:$16 sps:$4 sm:$0xff]   ;;  %v9211_v61 = vld [vmem:[%s13230_s2 + $0x1c0] ss:$16 sps:$4 sm:$0xff]  }
  0x1b   : > { %1928 = vmatpush1.bf16.msra.mxu0 %v9157_v22  ;;  %2380 = vmatpush1.bf16.msra.mxu1 %v9158_v23  ;;  %v9212_v62 = vld [vmem:[%s13230_s2 + $0x1c8] ss:$16 sps:$4 sm:$0xff]   ;;  %v9213_v63 = vld [vmem:[%s13230_s2 + $0x1e4] ss:$16 sps:$4 sm:$0xff]   ;;  %v9215_v0 = vld [vmem:[%s13230_s2 + $0x1ec] ss:$16 sps:$4 sm:$0xff]  }
  0x1c   : > { %1929 = vmatprep.subr.bf16.mxu0 %v9159_v24  ;;  %2381 = vmatprep.subr.bf16.mxu1 %v9161_v25  ;;  %v9217_v1 = vld [vmem:[%s13230_s2 + $0x1e0] ss:$16 sps:$4 sm:$0xff]   ;;  %v9218_v2 = vld [vmem:[%s13230_s2 + $0x1e8] ss:$16 sps:$4 sm:$0xff]   ;;  %v9221_v5 = vld [vmem:[%s13230_s2 + $0x204] ss:$16 sps:$4 sm:$0xff]  }
  0x1d   : > { %v526_v3 = vld [vmem:[%s10526_s23] sm:$0xff]  ;;  %v9224_v6 = vld [vmem:[%s13230_s2 + $0x20c] ss:$16 sps:$4 sm:$0xff]   ;;  %v9222_v9 = vld [vmem:[%s13230_s2 + $0x208] ss:$16 sps:$4 sm:$0xff]  }
  0x1e   : > { %v9219_v7 = vld [vmem:[%s13230_s2 + $0x200] ss:$16 sps:$4 sm:$0xff]   ;;  %v638_v8 = vpack.c.bf16 %v533_v4, %v526_v3  ;;  %v541_v10 = vld [vmem:[%s10526_s23 + $0x78] sm:$0xff]  ;;  %v9227_v12 = vld [vmem:[%s13230_s2 + $0x224] ss:$16 sps:$4 sm:$0xff]  }
  0x1f   : > { %1930 = vmatpush1.bf16.msra.mxu0 %v9163_v26  ;;  %2382 = vmatpush1.bf16.msra.mxu1 %v9164_v27  ;;  %v548_v11 = vld [vmem:[%s10526_s23 + $0xb0] sm:$0xff]  ;;  %v9230_v13 = vld [vmem:[%s13230_s2 + $0x22c] ss:$16 sps:$4 sm:$0xff]   ;;  %v9228_v16 = vld [vmem:[%s13230_s2 + $0x228] ss:$16 sps:$4 sm:$0xff]  }
  0x20   : > { %1931 = vmatprep.subr.bf16.mxu0 %v9165_v28  ;;  %2383 = vmatprep.subr.bf16.mxu1 %v9167_v29  ;;  %v9225_v14 = vld [vmem:[%s13230_s2 + $0x220] ss:$16 sps:$4 sm:$0xff]   ;;  %v646_v15 = vpack.c.bf16 %v548_v11, %v541_v10  ;;  %v547_v18 = vld [vmem:[%s10526_s23 + $0xa8] sm:$0xff]  ;;  %v9233_v19 = vld [vmem:[%s13230_s2 + $0x244] ss:$16 sps:$4 sm:$0xff]  }
  0x21   : > { %v540_v17 = vld [vmem:[%s10526_s23 + $0x70] sm:$0xff]  ;;  %v9236_v20 = vld [vmem:[%s13230_s2 + $0x24c] ss:$16 sps:$4 sm:$0xff]   ;;  %v9234_v22 = vld [vmem:[%s13230_s2 + $0x248] ss:$16 sps:$4 sm:$0xff]  }
  0x22   : > { %v9231_v21 = vld [vmem:[%s13230_s2 + $0x240] ss:$16 sps:$4 sm:$0xff]   ;;  %v645_v23 = vpack.c.bf16 %v547_v18, %v540_v17  ;;  %v555_v24 = vld [vmem:[%s10526_s23 + $0xe8] sm:$0xff]  ;;  %v9239_v26 = vld [vmem:[%s13230_s2 + $0x264] ss:$16 sps:$4 sm:$0xff]  }
  0x23   : > { %1932 = vmatpush1.bf16.msra.mxu0 %v9169_v30  ;;  %2384 = vmatpush1.bf16.msra.mxu1 %v9170_v31  ;;  %v562_v25 = vld [vmem:[%s10526_s23 + $0x120] sm:$0xff]  ;;  %v9242_v27 = vld [vmem:[%s13230_s2 + $0x26c] ss:$16 sps:$4 sm:$0xff]   ;;  %v9240_v30 = vld [vmem:[%s13230_s2 + $0x268] ss:$16 sps:$4 sm:$0xff]  }
  0x24   : > { %1933 = vmatprep.subr.bf16.mxu0 %v9171_v32  ;;  %2385 = vmatprep.subr.bf16.mxu1 %v9173_v33  ;;  %v653_v28 = vpack.c.bf16 %v562_v25, %v555_v24  ;;  %v9237_v29 = vld [vmem:[%s13230_s2 + $0x260] ss:$16 sps:$4 sm:$0xff]   ;;  %v561_v32 = vld [vmem:[%s10526_s23 + $0x118] sm:$0xff]  ;;  %v9245_v33 = vld [vmem:[%s13230_s2 + $0x284] ss:$16 sps:$4 sm:$0xff]  }
  0x25   : > { %v554_v31 = vld [vmem:[%s10526_s23 + $0xe0] sm:$0xff]  ;;  %v575_v46 = vld [vmem:[%s10526_s23 + $0x188] sm:$0xff]  ;;  %v617_v24 = vld [vmem:[%s10526_s23 + $0x2d8] sm:$0xff] }
  0x26   : > { %v9255_v49 = vld [vmem:[%s13230_s2 + $0x2c0] ss:$16 sps:$4 sm:$0xff]   ;;  %v583_v51 = vld [vmem:[%s10526_s23 + $0x1c8] sm:$0xff]  ;;  %v9275_v4 = vld [vmem:[%s13230_s2 + $0x324] ss:$16 sps:$4 sm:$0xff]  }
  0x27   : > { %1934 = vmatpush1.bf16.msra.mxu0 %v9175_v34  ;;  %2386 = vmatpush1.bf16.msra.mxu1 %v9176_v35  ;;  %v9248_v34 = vld [vmem:[%s13230_s2 + $0x28c] ss:$16 sps:$4 sm:$0xff]   ;;  %v9243_v35 = vld [vmem:[%s13230_s2 + $0x280] ss:$16 sps:$4 sm:$0xff]   ;;  %v9270_v3 = vld [vmem:[%s13230_s2 + $0x308] ss:$16 sps:$4 sm:$0xff]  }
  0x28   : > { %1935 = vmatprep.subr.bf16.mxu0 %v9177_v36  ;;  %2387 = vmatprep.subr.bf16.mxu1 %v9179_v37  ;;  %v9246_v36 = vld [vmem:[%s13230_s2 + $0x288] ss:$16 sps:$4 sm:$0xff]   ;;  %v652_v37 = vpack.c.bf16 %v561_v32, %v554_v31  ;;  %v9281_v11 = vld [vmem:[%s13230_s2 + $0x344] ss:$16 sps:$4 sm:$0xff]  }
  0x29   : > { %v603_v10 = vld [vmem:[%s10526_s23 + $0x268] sm:$0xff]  ;;  %v618_v17 = vld [vmem:[%s10526_s23 + $0x2e0] sm:$0xff]  ;;  %v632_v31 = vld [vmem:[%s10526_s23 + $0x350] sm:$0xff] }
  0x2a   : > { %v9287_v18 = vld [vmem:[%s13230_s2 + $0x364] ss:$16 sps:$4 sm:$0xff]  }
  0x2b   : > { %1936 = vmatpush1.bf16.msra.mxu0 %v9181_v38  ;;  %2388 = vmatpush1.bf16.msra.mxu1 %v9182_v39  ;;  %v569_v38 = vld [vmem:[%s10526_s23 + $0x158] sm:$0xff]  ;;  %v576_v39 = vld [vmem:[%s10526_s23 + $0x190] sm:$0xff] }
  0x2c   : > { %1937 = vmatprep.subr.bf16.mxu0 %v9183_v40  ;;  %2389 = vmatprep.subr.bf16.mxu1 %v9185_v41  ;;  %v9251_v40 = vld [vmem:[%s13230_s2 + $0x2a4] ss:$16 sps:$4 sm:$0xff]   ;;  %v9254_v41 = vld [vmem:[%s13230_s2 + $0x2ac] ss:$16 sps:$4 sm:$0xff]  }
  0x2d   : > { %v9293_v25 = vld [vmem:[%s13230_s2 + $0x384] ss:$16 sps:$4 sm:$0xff]  }
  0x2e   : > { %v9299_v32 = vld [vmem:[%s13230_s2 + $0x3a4] ss:$16 sps:$4 sm:$0xff]  }
  0x2f   : > { %1938 = vmatpush1.bf16.msra.mxu0 %v9187_v42  ;;  %2390 = vmatpush1.bf16.msra.mxu1 %v9188_v43  ;;  %v9249_v42 = vld [vmem:[%s13230_s2 + $0x2a0] ss:$16 sps:$4 sm:$0xff]   ;;  %v660_v43 = vpack.c.bf16 %v576_v39, %v569_v38  ;;  %v631_v38 = vld [vmem:[%s10526_s23 + $0x348] sm:$0xff]  ;;  %v9305_v39 = vld [vmem:[%s13230_s2 + $0x3c4] ss:$16 sps:$4 sm:$0xff]  }
  0x30   : > { %1939 = vmatprep.subr.bf16.mxu0 %v9189_v44  ;;  %2391 = vmatprep.subr.bf16.mxu1 %v9191_v45  ;;  %v9252_v44 = vld [vmem:[%s13230_s2 + $0x2a8] ss:$16 sps:$4 sm:$0xff]   ;;  %v568_v45 = vld [vmem:[%s10526_s23 + $0x150] sm:$0xff] }
  0x33   : > { %1940 = vmatpush1.bf16.msra.mxu0 %v9193_v47  ;;  %2392 = vmatpush1.bf16.msra.mxu1 %v9194_v48  ;;  %v9257_v47 = vld [vmem:[%s13230_s2 + $0x2c4] ss:$16 sps:$4 sm:$0xff]   ;;  %v9260_v48 = vld [vmem:[%s13230_s2 + $0x2cc] ss:$16 sps:$4 sm:$0xff]  }
  0x34   : > { %1941 = vmatprep.subr.bf16.mxu0 %v9195_v50  ;;  %2393 = vmatprep.subr.bf16.mxu1 %v9197_v52  ;;  %v659_v50 = vpack.c.bf16 %v575_v46, %v568_v45  ;;  %v590_v52 = vld [vmem:[%s10526_s23 + $0x200] sm:$0xff]  ;;  %v536_v45 = vld [vmem:[%s10526_s23 + $0x50] sm:$0xff] }
  0x35   : > { %v9311_v46 = vld [vmem:[%s13230_s2 + $0x3e4] ss:$16 sps:$4 sm:$0xff]  }
  0x37   : > { %1942 = vmatpush1.bf16.msra.mxu0 %v9199_v53  ;;  %2394 = vmatpush1.bf16.msra.mxu1 %v9200_v54  ;;  %v9258_v53 = vld [vmem:[%s13230_s2 + $0x2c8] ss:$16 sps:$4 sm:$0xff]   ;;  %v9263_v54 = vld [vmem:[%s13230_s2 + $0x2e4] ss:$16 sps:$4 sm:$0xff]  }
  0x38   : > { %1943 = vmatprep.subr.bf16.mxu0 %v9201_v55  ;;  %2395 = vmatprep.subr.bf16.mxu1 %v9203_v56  ;;  %v9266_v55 = vld [vmem:[%s13230_s2 + $0x2ec] ss:$16 sps:$4 sm:$0xff]   ;;  %v9261_v56 = vld [vmem:[%s13230_s2 + $0x2e0] ss:$16 sps:$4 sm:$0xff]  }
  0x3b   : > { %1944 = vmatpush1.bf16.msra.mxu0 %v9205_v57  ;;  %2396 = vmatpush1.bf16.msra.mxu1 %v9206_v58  ;;  %v9264_v57 = vld [vmem:[%s13230_s2 + $0x2e8] ss:$16 sps:$4 sm:$0xff]   ;;  %v667_v58 = vpack.c.bf16 %v590_v52, %v583_v51  ;;  %v528_v51 = vld [vmem:[%s10526_s23 + $0x10] sm:$0xff] }
  0x3c   : > { %1945 = vmatprep.subr.bf16.mxu0 %v9207_v59  ;;  %2397 = vmatprep.subr.bf16.mxu1 %v9209_v60  ;;  %v582_v59 = vld [vmem:[%s10526_s23 + $0x1c0] sm:$0xff]  ;;  %v589_v60 = vld [vmem:[%s10526_s23 + $0x1f8] sm:$0xff]  ;;  %v535_v52 = vld [vmem:[%s10526_s23 + $0x48] sm:$0xff] }
  0x3f   : > { %1946 = vmatpush1.bf16.msra.mxu0 %v9211_v61  ;;  %2398 = vmatpush1.bf16.msra.mxu1 %v9212_v62  ;;  %v9269_v61 = vld [vmem:[%s13230_s2 + $0x304] ss:$16 sps:$4 sm:$0xff]   ;;  %v9272_v62 = vld [vmem:[%s13230_s2 + $0x30c] ss:$16 sps:$4 sm:$0xff]  }
  0x40   : > { %1947 = vmatprep.subr.bf16.mxu0 %v9213_v63  ;;  %2399 = vmatprep.subr.bf16.mxu1 %v9215_v0  ;;  %v666_v63 = vpack.c.bf16 %v589_v60, %v582_v59  ;;  %v597_v0 = vld [vmem:[%s10526_s23 + $0x238] sm:$0xff]  ;;  %v9323_v60 = vld [vmem:[%s13230_s2 + $0x424] ss:$16 sps:$4 sm:$0xff]  }
  0x41   : > { %v9318_v59 = vld [vmem:[%s13230_s2 + $0x408] ss:$16 sps:$4 sm:$0xff]  }
  0x43   : > { %1948 = vmatpush1.bf16.msra.mxu0 %v9217_v1  ;;  %2400 = vmatpush1.bf16.msra.mxu1 %v9218_v2  ;;  %v604_v1 = vld [vmem:[%s10526_s23 + $0x270] sm:$0xff] }
  0x44   : > { %2030 = vmatprep.subr.bf16.mxu0 %v9221_v5  ;;  %2482 = vmatprep.subr.bf16.mxu1 %v9224_v6  ;;  %v9267_v2 = vld [vmem:[%s13230_s2 + $0x300] ss:$16 sps:$4 sm:$0xff]   ;;  %v9278_v5 = vld [vmem:[%s13230_s2 + $0x32c] ss:$16 sps:$4 sm:$0xff]  }
  0x45   : > { %v9273_v6 = vld [vmem:[%s13230_s2 + $0x320] ss:$16 sps:$4 sm:$0xff]  }
  0x46   : > { %1950 = vmatmul.mubr.bf16.vlgmr.msra.gmra.mrb[0].mxu0 %v638_v8  ;;  %2402 = vmatmul.mubr.bf16.vlgmr.msra.gmra.mrb[0].mxu1 %v638_v8  ;;  %v674_v8 = vpack.c.bf16 %v604_v1, %v597_v0  ;;  %v542_v1 = vld [vmem:[%s10526_s23 + $0x80] sm:$0xff] }
  0x47   : > { %2031 = vmatpush1.bf16.msra.mxu0 %v9219_v7  ;;  %2483 = vmatpush1.bf16.msra.mxu1 %v9222_v9  ;;  %v9276_v7 = vld [vmem:[%s13230_s2 + $0x328] ss:$16 sps:$4 sm:$0xff]   ;;  %v596_v9 = vld [vmem:[%s10526_s23 + $0x230] sm:$0xff] }
  0x48   : > { %2032 = vmatprep.subr.bf16.mxu0 %v9227_v12  ;;  %2484 = vmatprep.subr.bf16.mxu1 %v9230_v13  ;;  %v9284_v12 = vld [vmem:[%s13230_s2 + $0x34c] ss:$16 sps:$4 sm:$0xff]   ;;  %v9279_v13 = vld [vmem:[%s13230_s2 + $0x340] ss:$16 sps:$4 sm:$0xff]  }
  0x49   : > { %1959 = vmatprep.mubr.bf16.mxu0 %v646_v15  ;;  %2411 = vmatprep.mubr.bf16.mxu1 %v646_v15  ;;  %v9282_v15 = vld [vmem:[%s13230_s2 + $0x348] ss:$16 sps:$4 sm:$0xff]  }
  0x4b   : > { %2033 = vmatpush1.bf16.msra.mxu0 %v9225_v14  ;;  %2485 = vmatpush1.bf16.msra.mxu1 %v9228_v16  ;;  %v673_v14 = vpack.c.bf16 %v603_v10, %v596_v9  ;;  %v611_v16 = vld [vmem:[%s10526_s23 + $0x2a8] sm:$0xff]  ;;  %v9335_v10 = vld [vmem:[%s13230_s2 + $0x464] ss:$16 sps:$4 sm:$0xff]  }
  0x4c   : > { %2034 = vmatprep.subr.bf16.mxu0 %v9233_v19  ;;  %2486 = vmatprep.subr.bf16.mxu1 %v9236_v20  ;;  %v9290_v19 = vld [vmem:[%s13230_s2 + $0x36c] ss:$16 sps:$4 sm:$0xff]   ;;  %v9285_v20 = vld [vmem:[%s13230_s2 + $0x360] ss:$16 sps:$4 sm:$0xff]   ;;  %v9330_v9 = vld [vmem:[%s13230_s2 + $0x448] ss:$16 sps:$4 sm:$0xff]  }
  0x4e   : > { %1960 = vmatmul.mubr.bf16.gmra.mrb[4].mxu0 %v645_v23  ;;  %2412 = vmatmul.mubr.bf16.gmra.mrb[4].mxu1 %v645_v23  ;;  %v610_v23 = vld [vmem:[%s10526_s23 + $0x2a0] sm:$0xff] }
  0x4f   : > { %2035 = vmatpush1.bf16.msra.mxu0 %v9231_v21  ;;  %2487 = vmatpush1.bf16.msra.mxu1 %v9234_v22  ;;  %v681_v21 = vpack.c.bf16 %v618_v17, %v611_v16  ;;  %v9288_v22 = vld [vmem:[%s13230_s2 + $0x368] ss:$16 sps:$4 sm:$0xff]   ;;  %v9341_v17 = vld [vmem:[%s13230_s2 + $0x484] ss:$16 sps:$4 sm:$0xff]  }
  0x50   : > { %2036 = vmatprep.subr.bf16.mxu0 %v9239_v26  ;;  %2488 = vmatprep.subr.bf16.mxu1 %v9242_v27  ;;  %v9296_v26 = vld [vmem:[%s13230_s2 + $0x38c] ss:$16 sps:$4 sm:$0xff]   ;;  %v9291_v27 = vld [vmem:[%s13230_s2 + $0x380] ss:$16 sps:$4 sm:$0xff]  }
  0x51   : > { %1969 = vmatprep.mubr.bf16.mxu0 %v653_v28  ;;  %2421 = vmatprep.mubr.bf16.mxu1 %v653_v28  ;;  %v9294_v28 = vld [vmem:[%s13230_s2 + $0x388] ss:$16 sps:$4 sm:$0xff]  }
  0x52   : > { %v563_v16 = vld [vmem:[%s10526_s23 + $0x128] sm:$0xff] }
  0x53   : > { %2037 = vmatpush1.bf16.msra.mxu0 %v9237_v29  ;;  %2489 = vmatpush1.bf16.msra.mxu1 %v9240_v30  ;;  %v680_v29 = vpack.c.bf16 %v617_v24, %v610_v23  ;;  %v625_v30 = vld [vmem:[%s10526_s23 + $0x318] sm:$0xff]  ;;  %v578_v23 = vld [vmem:[%s10526_s23 + $0x1a0] sm:$0xff] }
  0x54   : > { %2038 = vmatprep.subr.bf16.mxu0 %v9245_v33  ;;  %2490 = vmatprep.subr.bf16.mxu1 %v9248_v34  ;;  %v9302_v33 = vld [vmem:[%s13230_s2 + $0x3ac] ss:$16 sps:$4 sm:$0xff]   ;;  %v688_v34 = vpack.c.bf16 %v632_v31, %v625_v30  ;;  %v9347_v24 = vld [vmem:[%s13230_s2 + $0x4a4] ss:$16 sps:$4 sm:$0xff]  }
  0x55   : > { %v577_v30 = vld [vmem:[%s10526_s23 + $0x198] sm:$0xff]  ;;  %v9353_v31 = vld [vmem:[%s13230_s2 + $0x4c4] ss:$16 sps:$4 sm:$0xff]  }
  0x56   : > { %1970 = vmatmul.mubr.bf16.gmra.mrb[8].mxu0 %v652_v37  ;;  %2422 = vmatmul.mubr.bf16.gmra.mrb[8].mxu1 %v652_v37  ;;  %v624_v37 = vld [vmem:[%s10526_s23 + $0x310] sm:$0xff] }
  0x57   : > { %2039 = vmatpush1.bf16.msra.mxu0 %v9243_v35  ;;  %2491 = vmatpush1.bf16.msra.mxu1 %v9246_v36  ;;  %v9297_v35 = vld [vmem:[%s13230_s2 + $0x3a0] ss:$16 sps:$4 sm:$0xff]   ;;  %v9300_v36 = vld [vmem:[%s13230_s2 + $0x3a8] ss:$16 sps:$4 sm:$0xff]  }
  0x58   : > { %2040 = vmatprep.subr.bf16.mxu0 %v9251_v40  ;;  %2492 = vmatprep.subr.bf16.mxu1 %v9254_v41  ;;  %v9308_v40 = vld [vmem:[%s13230_s2 + $0x3cc] ss:$16 sps:$4 sm:$0xff]   ;;  %v9303_v41 = vld [vmem:[%s13230_s2 + $0x3c0] ss:$16 sps:$4 sm:$0xff]  }
  0x59   : > { %1979 = vmatprep.mubr.bf16.mxu0 %v660_v43  ;;  %2431 = vmatprep.mubr.bf16.mxu1 %v660_v43  ;;  %v687_v43 = vpack.c.bf16 %v631_v38, %v624_v37  ;;  %v9354_v37 = vld [vmem:[%s13230_s2 + $0x4c8] ss:$16 sps:$4 sm:$0xff]   ;;  %v9359_v38 = vld [vmem:[%s13230_s2 + $0x4e4] ss:$16 sps:$4 sm:$0xff]  }
  0x5b   : > { %2041 = vmatpush1.bf16.msra.mxu0 %v9249_v42  ;;  %2493 = vmatpush1.bf16.msra.mxu1 %v9252_v44  ;;  %v9306_v42 = vld [vmem:[%s13230_s2 + $0x3c8] ss:$16 sps:$4 sm:$0xff]  }
  0x5c   : > { %2042 = vmatprep.subr.bf16.mxu0 %v9257_v47  ;;  %2494 = vmatprep.subr.bf16.mxu1 %v9260_v48  ;;  %v529_v44 = vld [vmem:[%s10526_s23 + $0x18] sm:$0xff]  ;;  %v9309_v48 = vld [vmem:[%s13230_s2 + $0x3e0] ss:$16 sps:$4 sm:$0xff]  }
  0x5d   : > { %v9314_v47 = vld [vmem:[%s13230_s2 + $0x3ec] ss:$16 sps:$4 sm:$0xff]  }
  0x5e   : > { %1980 = vmatmul.mubr.bf16.gmra.mrb[12].mxu0 %v659_v50  ;;  %2432 = vmatmul.mubr.bf16.gmra.mrb[12].mxu1 %v659_v50  ;;  %v9312_v50 = vld [vmem:[%s13230_s2 + $0x3e8] ss:$16 sps:$4 sm:$0xff]  }
  0x5f   : > { %2043 = vmatpush1.bf16.msra.mxu0 %v9255_v49  ;;  %2495 = vmatpush1.bf16.msra.mxu1 %v9258_v53  ;;  %v641_v49 = vpack.c.bf16 %v536_v45, %v529_v44  ;;  %v9317_v53 = vld [vmem:[%s13230_s2 + $0x404] ss:$16 sps:$4 sm:$0xff]   ;;  %v591_v44 = vld [vmem:[%s10526_s23 + $0x208] sm:$0xff] }
  0x60   : > { %2044 = vmatprep.subr.bf16.mxu0 %v9263_v54  ;;  %2496 = vmatprep.subr.bf16.mxu1 %v9266_v55  ;;  %v9320_v54 = vld [vmem:[%s13230_s2 + $0x40c] ss:$16 sps:$4 sm:$0xff]   ;;  %v9315_v55 = vld [vmem:[%s13230_s2 + $0x400] ss:$16 sps:$4 sm:$0xff]   ;;  %v9365_v45 = vld [vmem:[%s13230_s2 + $0x504] ss:$16 sps:$4 sm:$0xff]  }
  0x61   : > { %1989 = vmatprep.mubr.bf16.mxu0 %v667_v58  ;;  %2441 = vmatprep.mubr.bf16.mxu1 %v667_v58  ;;  %v550_v58 = vld [vmem:[%s10526_s23 + $0xc0] sm:$0xff] }
  0x63   : > { %2045 = vmatpush1.bf16.msra.mxu0 %v9261_v56  ;;  %2497 = vmatpush1.bf16.msra.mxu1 %v9264_v57  ;;  %v640_v56 = vpack.c.bf16 %v535_v52, %v528_v51  ;;  %v543_v57 = vld [vmem:[%s10526_s23 + $0x88] sm:$0xff]  ;;  %v9371_v52 = vld [vmem:[%s13230_s2 + $0x524] ss:$16 sps:$4 sm:$0xff]  }
  0x64   : > { %2046 = vmatprep.subr.bf16.mxu0 %v9269_v61  ;;  %2498 = vmatprep.subr.bf16.mxu1 %v9272_v62  ;;  %v9326_v61 = vld [vmem:[%s13230_s2 + $0x42c] ss:$16 sps:$4 sm:$0xff]   ;;  %v9321_v62 = vld [vmem:[%s13230_s2 + $0x420] ss:$16 sps:$4 sm:$0xff]   ;;  %v648_v0 = vpack.c.bf16 %v550_v58, %v543_v57  ;;  %v9366_v51 = vld [vmem:[%s13230_s2 + $0x508] ss:$16 sps:$4 sm:$0xff]  }
  0x65   : > { %v598_v57 = vld [vmem:[%s10526_s23 + $0x240] sm:$0xff]  ;;  %v605_v58 = vld [vmem:[%s10526_s23 + $0x278] sm:$0xff] }
  0x66   : > { %1990 = vmatmul.mubr.bf16.gmra.mrb[16].mxu0 %v666_v63  ;;  %2442 = vmatmul.mubr.bf16.gmra.mrb[16].mxu1 %v666_v63  ;;  %v9324_v63 = vld [vmem:[%s13230_s2 + $0x428] ss:$16 sps:$4 sm:$0xff]  }
  0x67   : > { %2047 = vmatpush1.bf16.msra.mxu0 %v9267_v2  ;;  %2499 = vmatpush1.bf16.msra.mxu1 %v9270_v3  ;;  %v549_v2 = vld [vmem:[%s10526_s23 + $0xb8] sm:$0xff]  ;;  %v9329_v3 = vld [vmem:[%s13230_s2 + $0x444] ss:$16 sps:$4 sm:$0xff]  }
  0x68   : > { %2048 = vmatprep.subr.bf16.mxu0 %v9275_v4  ;;  %2500 = vmatprep.subr.bf16.mxu1 %v9278_v5  ;;  %v9332_v4 = vld [vmem:[%s13230_s2 + $0x44c] ss:$16 sps:$4 sm:$0xff]   ;;  %v647_v5 = vpack.c.bf16 %v549_v2, %v542_v1  ;;  %v675_v1 = vpack.c.bf16 %v605_v58, %v598_v57  ;;  %v9383_v2 = vld [vmem:[%s13230_s2 + $0x564] ss:$16 sps:$4 sm:$0xff]  }
  0x69   : > { %1999 = vmatprep.mubr.bf16.mxu0 %v674_v8  ;;  %2451 = vmatprep.mubr.bf16.mxu1 %v674_v8  ;;  %v9327_v8 = vld [vmem:[%s13230_s2 + $0x440] ss:$16 sps:$4 sm:$0xff]  }
  0x6b   : > { %2049 = vmatpush1.bf16.msra.mxu0 %v9273_v6  ;;  %2501 = vmatpush1.bf16.msra.mxu1 %v9276_v7  ;;  %v557_v6 = vld [vmem:[%s10526_s23 + $0xf8] sm:$0xff]  ;;  %v564_v7 = vld [vmem:[%s10526_s23 + $0x130] sm:$0xff] }
  0x6c   : > { %2050 = vmatprep.subr.bf16.mxu0 %v9281_v11  ;;  %2502 = vmatprep.subr.bf16.mxu1 %v9284_v12  ;;  %v9338_v11 = vld [vmem:[%s13230_s2 + $0x46c] ss:$16 sps:$4 sm:$0xff]   ;;  %v9333_v12 = vld [vmem:[%s13230_s2 + $0x460] ss:$16 sps:$4 sm:$0xff]  }
  0x6e   : > { %2000 = vmatmul.mubr.bf16.gmra.mrb[20].mxu0 %v673_v14  ;;  %2452 = vmatmul.mubr.bf16.gmra.mrb[20].mxu1 %v673_v14  ;;  %v655_v14 = vpack.c.bf16 %v564_v7, %v557_v6  ;;  %v612_v7 = vld [vmem:[%s10526_s23 + $0x2b0] sm:$0xff] }
  0x6f   : > { %2051 = vmatpush1.bf16.msra.mxu0 %v9279_v13  ;;  %2503 = vmatpush1.bf16.msra.mxu1 %v9282_v15  ;;  %v9336_v13 = vld [vmem:[%s13230_s2 + $0x468] ss:$16 sps:$4 sm:$0xff]   ;;  %v556_v15 = vld [vmem:[%s10526_s23 + $0xf0] sm:$0xff] }
  0x70   : > { %2052 = vmatprep.subr.bf16.mxu0 %v9287_v18  ;;  %2504 = vmatprep.subr.bf16.mxu1 %v9290_v19  ;;  %v9344_v18 = vld [vmem:[%s13230_s2 + $0x48c] ss:$16 sps:$4 sm:$0xff]   ;;  %v9339_v19 = vld [vmem:[%s13230_s2 + $0x480] ss:$16 sps:$4 sm:$0xff]  }
  0x71   : > { %2009 = vmatprep.mubr.bf16.mxu0 %v681_v21  ;;  %2461 = vmatprep.mubr.bf16.mxu1 %v681_v21  ;;  %v9342_v21 = vld [vmem:[%s13230_s2 + $0x488] ss:$16 sps:$4 sm:$0xff]  }
  0x73   : > { %2053 = vmatpush1.bf16.msra.mxu0 %v9285_v20  ;;  %2505 = vmatpush1.bf16.msra.mxu1 %v9288_v22  ;;  %v654_v20 = vpack.c.bf16 %v563_v16, %v556_v15  ;;  %v571_v22 = vld [vmem:[%s10526_s23 + $0x168] sm:$0xff]  ;;  %v9395_v16 = vld [vmem:[%s13230_s2 + $0x5a4] ss:$16 sps:$4 sm:$0xff]  }
  0x74   : > { %2054 = vmatprep.subr.bf16.mxu0 %v9293_v25  ;;  %2506 = vmatprep.subr.bf16.mxu1 %v9296_v26  ;;  %v9350_v25 = vld [vmem:[%s13230_s2 + $0x4ac] ss:$16 sps:$4 sm:$0xff]   ;;  %v9345_v26 = vld [vmem:[%s13230_s2 + $0x4a0] ss:$16 sps:$4 sm:$0xff]  }
  0x76   : > { %2010 = vmatmul.mubr.bf16.gmra.mrb[24].mxu0 %v680_v29  ;;  %2462 = vmatmul.mubr.bf16.gmra.mrb[24].mxu1 %v680_v29  ;;  %v570_v29 = vld [vmem:[%s10526_s23 + $0x160] sm:$0xff] }
  0x77   : > { %2055 = vmatpush1.bf16.msra.mxu0 %v9291_v27  ;;  %2507 = vmatpush1.bf16.msra.mxu1 %v9294_v28  ;;  %v662_v27 = vpack.c.bf16 %v578_v23, %v571_v22  ;;  %v9348_v28 = vld [vmem:[%s13230_s2 + $0x4a8] ss:$16 sps:$4 sm:$0xff]   ;;  %v9401_v23 = vld [vmem:[%s13230_s2 + $0x5c4] ss:$16 sps:$4 sm:$0xff]  }
  0x78   : > { %2056 = vmatprep.subr.bf16.mxu0 %v9299_v32  ;;  %2508 = vmatprep.subr.bf16.mxu1 %v9302_v33  ;;  %v9356_v32 = vld [vmem:[%s13230_s2 + $0x4cc] ss:$16 sps:$4 sm:$0xff]   ;;  %v9351_v33 = vld [vmem:[%s13230_s2 + $0x4c0] ss:$16 sps:$4 sm:$0xff]  }
  0x79   : > { %2019 = vmatprep.mubr.bf16.mxu0 %v688_v34  ;;  %2471 = vmatprep.mubr.bf16.mxu1 %v688_v34  ;;  %v661_v34 = vpack.c.bf16 %v577_v30, %v570_v29  ;;  %v633_v22 = vld [vmem:[%s10526_s23 + $0x358] sm:$0xff]  ;;  %v9407_v30 = vld [vmem:[%s13230_s2 + $0x5e4] ss:$16 sps:$4 sm:$0xff]  }
  0x7b   : > { %2057 = vmatpush1.bf16.msra.mxu0 %v9297_v35  ;;  %2509 = vmatpush1.bf16.msra.mxu1 %v9300_v36  ;;  %v585_v35 = vld [vmem:[%s10526_s23 + $0x1d8] sm:$0xff]  ;;  %v592_v36 = vld [vmem:[%s10526_s23 + $0x210] sm:$0xff] }
  0x7c   : > { %2058 = vmatprep.subr.bf16.mxu0 %v9305_v39  ;;  %2510 = vmatprep.subr.bf16.mxu1 %v9308_v40  ;;  %v9362_v39 = vld [vmem:[%s13230_s2 + $0x4ec] ss:$16 sps:$4 sm:$0xff]   ;;  %v669_v40 = vpack.c.bf16 %v592_v36, %v585_v35  ;;  %v530_v35 = vld [vmem:[%s10526_s23 + $0x20] sm:$0xff] }
  0x7d   : > { %v537_v36 = vld [vmem:[%s10526_s23 + $0x58] sm:$0xff] }
  0x7e   : > { %2020 = vmatmul.mubr.bf16.gmra.mrb[28].mxu0 %v687_v43  ;;  %2472 = vmatmul.mubr.bf16.gmra.mrb[28].mxu1 %v687_v43  ;;  %v584_v43 = vld [vmem:[%s10526_s23 + $0x1d0] sm:$0xff] }
  0x7f   : > { %2059 = vmatpush1.bf16.msra.mxu0 %v9303_v41  ;;  %2511 = vmatpush1.bf16.msra.mxu1 %v9306_v42  ;;  %v9357_v41 = vld [vmem:[%s13230_s2 + $0x4e0] ss:$16 sps:$4 sm:$0xff]   ;;  %v9360_v42 = vld [vmem:[%s13230_s2 + $0x4e8] ss:$16 sps:$4 sm:$0xff]  }
  0x80   : > { %2060 = vmatprep.subr.bf16.mxu0 %v9311_v46  ;;  %2512 = vmatprep.subr.bf16.mxu1 %v9314_v47  ;;  %v9368_v46 = vld [vmem:[%s13230_s2 + $0x50c] ss:$16 sps:$4 sm:$0xff]   ;;  %v668_v47 = vpack.c.bf16 %v591_v44, %v584_v43  ;;  %v9414_v43 = vld [vmem:[%s13230_s2 + $0x608] ss:$16 sps:$4 sm:$0xff]  }
  0x81   : > { %2062 = vmatprep.mubr.bf16.mxu0 %v641_v49  ;;  %2514 = vmatprep.mubr.bf16.mxu1 %v641_v49  ;;  %v606_v49 = vld [vmem:[%s10526_s23 + $0x280] sm:$0xff] }
  0x83   : > { %2061 = vmatpush1.bf16.msra.mxu0 %v9309_v48  ;;  %2513 = vmatpush1.bf16.msra.mxu1 %v9312_v50  ;;  %v599_v48 = vld [vmem:[%s10526_s23 + $0x248] sm:$0xff]  ;;  %v9363_v50 = vld [vmem:[%s13230_s2 + $0x500] ss:$16 sps:$4 sm:$0xff]  }
  0x84   : > { %2143 = vmatprep.subr.bf16.mxu0 %v9317_v53  ;;  %2595 = vmatprep.subr.bf16.mxu1 %v9320_v54  ;;  %v9374_v53 = vld [vmem:[%s13230_s2 + $0x52c] ss:$16 sps:$4 sm:$0xff]   ;;  %v676_v54 = vpack.c.bf16 %v606_v49, %v599_v48 }
  0x85   : > { %v551_v48 = vld [vmem:[%s10526_s23 + $0xc8] sm:$0xff] }
  0x86   : > { %2063 = vmatmul.mubr.bf16.vlgmr.msra.gmra.mrb[0].mxu0 %v640_v56  ;;  %2515 = vmatmul.mubr.bf16.vlgmr.msra.gmra.mrb[0].mxu1 %v640_v56  ;;  %v9372_v56 = vld [vmem:[%s13230_s2 + $0x528] ss:$16 sps:$4 sm:$0xff]  }
  0x87   : > { %2144 = vmatpush1.bf16.msra.mxu0 %v9315_v55  ;;  %2596 = vmatpush1.bf16.msra.mxu1 %v9318_v59  ;;  %v9369_v55 = vld [vmem:[%s13230_s2 + $0x520] ss:$16 sps:$4 sm:$0xff]   ;;  %v9377_v59 = vld [vmem:[%s13230_s2 + $0x544] ss:$16 sps:$4 sm:$0xff]   ;;  %v559_v49 = vld [vmem:[%s10526_s23 + $0x108] sm:$0xff] }
  0x88   : > { %2145 = vmatprep.subr.bf16.mxu0 %v9323_v60  ;;  %2597 = vmatprep.subr.bf16.mxu1 %v9326_v61  ;;  %v9380_v60 = vld [vmem:[%s13230_s2 + $0x54c] ss:$16 sps:$4 sm:$0xff]   ;;  %v9375_v61 = vld [vmem:[%s13230_s2 + $0x540] ss:$16 sps:$4 sm:$0xff]  }
  0x89   : > { %2072 = vmatprep.mubr.bf16.mxu0 %v648_v0  ;;  %2524 = vmatprep.mubr.bf16.mxu1 %v648_v0  ;;  %v620_v0 = vld [vmem:[%s10526_s23 + $0x2f0] sm:$0xff] }
  0x8b   : > { %2146 = vmatpush1.bf16.msra.mxu0 %v9321_v62  ;;  %2598 = vmatpush1.bf16.msra.mxu1 %v9324_v63  ;;  %v9378_v62 = vld [vmem:[%s13230_s2 + $0x548] ss:$16 sps:$4 sm:$0xff]  }
  0x8c   : > { %2147 = vmatprep.subr.bf16.mxu0 %v9329_v3  ;;  %2599 = vmatprep.subr.bf16.mxu1 %v9332_v4  ;;  %v613_v63 = vld [vmem:[%s10526_s23 + $0x2b8] sm:$0xff]  ;;  %v9381_v4 = vld [vmem:[%s13230_s2 + $0x560] ss:$16 sps:$4 sm:$0xff]  }
  0x8d   : > { %v9386_v3 = vld [vmem:[%s13230_s2 + $0x56c] ss:$16 sps:$4 sm:$0xff]   ;;  %v683_v6 = vpack.c.bf16 %v620_v0, %v613_v63 }
  0x8e   : > { %2073 = vmatmul.mubr.bf16.gmra.mrb[4].mxu0 %v647_v5  ;;  %2525 = vmatmul.mubr.bf16.gmra.mrb[4].mxu1 %v647_v5  ;;  %v9384_v5 = vld [vmem:[%s13230_s2 + $0x568] ss:$16 sps:$4 sm:$0xff]  }
  0x8f   : > { %2148 = vmatpush1.bf16.msra.mxu0 %v9327_v8  ;;  %2600 = vmatpush1.bf16.msra.mxu1 %v9330_v9  ;;  %v619_v8 = vld [vmem:[%s10526_s23 + $0x2e8] sm:$0xff]  ;;  %v9389_v9 = vld [vmem:[%s13230_s2 + $0x584] ss:$16 sps:$4 sm:$0xff]  }
  0x90   : > { %2149 = vmatprep.subr.bf16.mxu0 %v9335_v10  ;;  %2601 = vmatprep.subr.bf16.mxu1 %v9338_v11  ;;  %v9392_v10 = vld [vmem:[%s13230_s2 + $0x58c] ss:$16 sps:$4 sm:$0xff]   ;;  %v682_v15 = vpack.c.bf16 %v619_v8, %v612_v7  ;;  %v600_v7 = vld [vmem:[%s10526_s23 + $0x250] sm:$0xff] }
  0x91   : > { %2082 = vmatprep.mubr.bf16.mxu0 %v655_v14  ;;  %2534 = vmatprep.mubr.bf16.mxu1 %v655_v14  ;;  %v627_v11 = vld [vmem:[%s10526_s23 + $0x328] sm:$0xff] }
  0x92   : > { %v9390_v14 = vld [vmem:[%s13230_s2 + $0x588] ss:$16 sps:$4 sm:$0xff]  }
  0x93   : > { %2150 = vmatpush1.bf16.msra.mxu0 %v9333_v12  ;;  %2602 = vmatpush1.bf16.msra.mxu1 %v9336_v13  ;;  %v634_v12 = vld [vmem:[%s10526_s23 + $0x360] sm:$0xff]  ;;  %v607_v8 = vld [vmem:[%s10526_s23 + $0x288] sm:$0xff] }
  0x94   : > { %2151 = vmatprep.subr.bf16.mxu0 %v9341_v17  ;;  %2603 = vmatprep.subr.bf16.mxu1 %v9344_v18  ;;  %v9387_v13 = vld [vmem:[%s13230_s2 + $0x580] ss:$16 sps:$4 sm:$0xff]   ;;  %v9398_v17 = vld [vmem:[%s13230_s2 + $0x5ac] ss:$16 sps:$4 sm:$0xff]  }
  0x95   : > { %v9393_v18 = vld [vmem:[%s13230_s2 + $0x5a0] ss:$16 sps:$4 sm:$0xff]  }
  0x96   : > { %2083 = vmatmul.mubr.bf16.gmra.mrb[8].mxu0 %v654_v20  ;;  %2535 = vmatmul.mubr.bf16.gmra.mrb[8].mxu1 %v654_v20  ;;  %v690_v20 = vpack.c.bf16 %v634_v12, %v627_v11  ;;  %v677_v11 = vpack.c.bf16 %v607_v8, %v600_v7  ;;  %v637_v7 = vld [vmem:[%s10526_s23 + $0x378] sm:$0xff] }
  0x97   : > { %2152 = vmatpush1.bf16.msra.mxu0 %v9339_v19  ;;  %2604 = vmatpush1.bf16.msra.mxu1 %v9342_v21  ;;  %v9396_v19 = vld [vmem:[%s13230_s2 + $0x5a8] ss:$16 sps:$4 sm:$0xff]   ;;  %v626_v21 = vld [vmem:[%s10526_s23 + $0x320] sm:$0xff] }
  0x98   : > { %2153 = vmatprep.subr.bf16.mxu0 %v9347_v24  ;;  %2605 = vmatprep.subr.bf16.mxu1 %v9350_v25  ;;  %v9404_v24 = vld [vmem:[%s13230_s2 + $0x5cc] ss:$16 sps:$4 sm:$0xff]   ;;  %v689_v29 = vpack.c.bf16 %v633_v22, %v626_v21  ;;  %v532_v22 = vld [vmem:[%s10526_s23 + $0x30] sm:$0xff] }
  0x99   : > { %2092 = vmatprep.mubr.bf16.mxu0 %v662_v27  ;;  %2544 = vmatprep.mubr.bf16.mxu1 %v662_v27  ;;  %v531_v25 = vld [vmem:[%s10526_s23 + $0x28] sm:$0xff]  ;;  %v9399_v27 = vld [vmem:[%s13230_s2 + $0x5c0] ss:$16 sps:$4 sm:$0xff]  }
  0x9b   : > { %2154 = vmatpush1.bf16.msra.mxu0 %v9345_v26  ;;  %2606 = vmatpush1.bf16.msra.mxu1 %v9348_v28  ;;  %v538_v26 = vld [vmem:[%s10526_s23 + $0x60] sm:$0xff]  ;;  %v9402_v28 = vld [vmem:[%s13230_s2 + $0x5c8] ss:$16 sps:$4 sm:$0xff]  }
  0x9c   : > { %2155 = vmatprep.subr.bf16.mxu0 %v9353_v31  ;;  %2607 = vmatprep.subr.bf16.mxu1 %v9356_v32  ;;  %v9410_v31 = vld [vmem:[%s13230_s2 + $0x5ec] ss:$16 sps:$4 sm:$0xff]   ;;  %v643_v32 = vpack.c.bf16 %v538_v26, %v531_v25  ;;  %v9418_v26 = vld [vmem:[%s13232_s4] sm:$0xff]  }
  0x9e   : > { %2093 = vmatmul.mubr.bf16.gmra.mrb[12].mxu0 %v661_v34  ;;  %2545 = vmatmul.mubr.bf16.gmra.mrb[12].mxu1 %v661_v34  ;;  %v9408_v34 = vld [vmem:[%s13230_s2 + $0x5e8] ss:$16 sps:$4 sm:$0xff]  }
  0x9f   : > { %2156 = vmatpush1.bf16.msra.mxu0 %v9351_v33  ;;  %2608 = vmatpush1.bf16.msra.mxu1 %v9354_v37  ;;  %v9405_v33 = vld [vmem:[%s13230_s2 + $0x5e0] ss:$16 sps:$4 sm:$0xff]   ;;  %v9413_v37 = vld [vmem:[%s13230_s2 + $0x604] ss:$16 sps:$4 sm:$0xff]  }
  0xa0   : > { %2157 = vmatprep.subr.bf16.mxu0 %v9359_v38  ;;  %2609 = vmatprep.subr.bf16.mxu1 %v9362_v39  ;;  %v9416_v38 = vld [vmem:[%s13230_s2 + $0x60c] ss:$16 sps:$4 sm:$0xff]  }
  0xa1   : > { %2102 = vmatprep.mubr.bf16.mxu0 %v669_v40  ;;  %2554 = vmatprep.mubr.bf16.mxu1 %v669_v40  ;;  %v545_v39 = vld [vmem:[%s10526_s23 + $0x98] sm:$0xff]  ;;  %v552_v40 = vld [vmem:[%s10526_s23 + $0xd0] sm:$0xff] }
  0xa2   : > { %v650_v44 = vpack.c.bf16 %v552_v40, %v545_v39  ;;  %v9429_v39 = vld [vmem:[%s13232_s4 + $0x58] sm:$0xff]  }
  0xa3   : > { %2158 = vmatpush1.bf16.msra.mxu0 %v9357_v41  ;;  %2610 = vmatpush1.bf16.msra.mxu1 %v9360_v42  ;;  %v642_v41 = vpack.c.bf16 %v537_v36, %v530_v35  ;;  %v9411_v42 = vld [vmem:[%s13230_s2 + $0x600] ss:$16 sps:$4 sm:$0xff]   ;;  %v9431_v40 = vld [vmem:[%s13232_s4 + $0xd8] sm:$0xff]  }
  0xa4   : > { %2159 = vmatprep.subr.bf16.mxu0 %v9365_v45  ;;  %2611 = vmatprep.subr.bf16.mxu1 %v9368_v46  ;;  %v9417_v45 = vld [vmem:[%s13232_s4 + $0x40] sm:$0xff]   ;;  %v9427_v35 = vld [vmem:[%s13232_s4 + $0xd0] sm:$0xff]  }
  0xa5   : > { %v9419_v46 = vld [vmem:[%s13232_s4 + $0xc0] sm:$0xff]  }
  0xa6   : > { %2103 = vmatmul.mubr.bf16.gmra.mrb[16].mxu0 %v668_v47  ;;  %2555 = vmatmul.mubr.bf16.gmra.mrb[16].mxu1 %v668_v47  ;;  %v544_v47 = vld [vmem:[%s10526_s23 + $0x90] sm:$0xff] }
  0xa7   : > { %2160 = vmatpush1.bf16.msra.mxu0 %v9363_v50  ;;  %2612 = vmatpush1.bf16.msra.mxu1 %v9366_v51  ;;  %v566_v50 = vld [vmem:[%s10526_s23 + $0x140] sm:$0xff]  ;;  %v649_v51 = vpack.c.bf16 %v551_v48, %v544_v47 }
  0xa8   : > { %2161 = vmatprep.subr.bf16.mxu0 %v9371_v52  ;;  %2613 = vmatprep.subr.bf16.mxu1 %v9374_v53  ;;  %v657_v52 = vpack.c.bf16 %v566_v50, %v559_v49  ;;  %v558_v53 = vld [vmem:[%s10526_s23 + $0x100] sm:$0xff]  ;;  %v9437_v50 = vld [vmem:[%s13232_s4 + $0x68] sm:$0xff]  }
  0xa9   : > { %2112 = vmatprep.mubr.bf16.mxu0 %v676_v54  ;;  %2564 = vmatprep.mubr.bf16.mxu1 %v676_v54  ;;  %v565_v54 = vld [vmem:[%s10526_s23 + $0x138] sm:$0xff]  ;;  %v9434_v48 = vld [vmem:[%s13232_s4 + $0x20] sm:$0xff]  }
  0xaa   : > { %v656_v57 = vpack.c.bf16 %v565_v54, %v558_v53  ;;  %v9436_v49 = vld [vmem:[%s13232_s4 + $0xa0] sm:$0xff]   ;;  %v581_v53 = vld [vmem:[%s10526_s23 + $0x1b8] sm:$0xff]  ;;  %v9438_v54 = vld [vmem:[%s13232_s4 + $0x28] sm:$0xff]  }
  0xab   : > { %2162 = vmatpush1.bf16.msra.mxu0 %v9369_v55  ;;  %2614 = vmatpush1.bf16.msra.mxu1 %v9372_v56  ;;  %v573_v55 = vld [vmem:[%s10526_s23 + $0x178] sm:$0xff]  ;;  %v580_v56 = vld [vmem:[%s10526_s23 + $0x1b0] sm:$0xff] }
  0xac   : > { %2163 = vmatprep.subr.bf16.mxu0 %v9377_v59  ;;  %2615 = vmatprep.subr.bf16.mxu1 %v9380_v60  ;;  %v664_v58 = vpack.c.bf16 %v580_v56, %v573_v55  ;;  %v572_v59 = vld [vmem:[%s10526_s23 + $0x170] sm:$0xff]  ;;  %v579_v60 = vld [vmem:[%s10526_s23 + $0x1a8] sm:$0xff] }
  0xad   : > { %v663_v63 = vpack.c.bf16 %v579_v60, %v572_v59  ;;  %v9440_v55 = vld [vmem:[%s13232_s4 + $0xa8] sm:$0xff]   ;;  %v9441_v56 = vld [vmem:[%s13232_s4 + $0x70] sm:$0xff]  }
  0xae   : > { %2113 = vmatmul.mubr.bf16.gmra.mrb[20].mxu0 %v675_v1  ;;  %2565 = vmatmul.mubr.bf16.gmra.mrb[20].mxu1 %v675_v1  ;;  %v586_v1 = vld [vmem:[%s10526_s23 + $0x1e0] sm:$0xff]  ;;  %v9442_v59 = vld [vmem:[%s13232_s4 + $0x30] sm:$0xff]  }
  0xaf   : > { %2164 = vmatpush1.bf16.msra.mxu0 %v9375_v61  ;;  %2616 = vmatpush1.bf16.msra.mxu1 %v9378_v62  ;;  %v587_v61 = vld [vmem:[%s10526_s23 + $0x1e8] sm:$0xff]  ;;  %v594_v62 = vld [vmem:[%s10526_s23 + $0x220] sm:$0xff]  ;;  %v9444_v60 = vld [vmem:[%s13232_s4 + $0xb0] sm:$0xff]  }
  0xb0   : > { %2165 = vmatprep.subr.bf16.mxu0 %v9383_v2  ;;  %2617 = vmatprep.subr.bf16.mxu1 %v9386_v3  ;;  %v671_v0 = vpack.c.bf16 %v594_v62, %v587_v61  ;;  %v593_v2 = vld [vmem:[%s10526_s23 + $0x218] sm:$0xff]  ;;  %v588_v61 = vld [vmem:[%s10526_s23 + $0x1f0] sm:$0xff]  ;;  %v595_v62 = vld [vmem:[%s10526_s23 + $0x228] sm:$0xff] }
  0xb1   : > { %2122 = vmatprep.mubr.bf16.mxu0 %v683_v6  ;;  %2574 = vmatprep.mubr.bf16.mxu1 %v683_v6  ;;  %v601_v3 = vld [vmem:[%s10526_s23 + $0x258] sm:$0xff] }
  0xb3   : > { %2166 = vmatpush1.bf16.msra.mxu0 %v9381_v4  ;;  %2618 = vmatpush1.bf16.msra.mxu1 %v9384_v5  ;;  %v608_v4 = vld [vmem:[%s10526_s23 + $0x290] sm:$0xff]  ;;  %v670_v5 = vpack.c.bf16 %v593_v2, %v586_v1  ;;  %v609_v1 = vld [vmem:[%s10526_s23 + $0x298] sm:$0xff] }
  0xb4   : > { %2167 = vmatprep.subr.bf16.mxu0 %v9389_v9  ;;  %2619 = vmatprep.subr.bf16.mxu1 %v9392_v10  ;;  %v678_v6 = vpack.c.bf16 %v608_v4, %v601_v3  ;;  %v615_v9 = vld [vmem:[%s10526_s23 + $0x2c8] sm:$0xff]  ;;  %v622_v10 = vld [vmem:[%s10526_s23 + $0x300] sm:$0xff]  ;;  %v616_v3 = vld [vmem:[%s10526_s23 + $0x2d0] sm:$0xff] }
  0xb5   : > { %v685_v12 = vpack.c.bf16 %v622_v10, %v615_v9  ;;  %v623_v4 = vld [vmem:[%s10526_s23 + $0x308] sm:$0xff]  ;;  %v9445_v9 = vld [vmem:[%s13232_s4 + $0x78] sm:$0xff]  }
  0xb6   : > { %2123 = vmatmul.mubr.bf16.gmra.mrb[24].mxu0 %v682_v15  ;;  %2575 = vmatmul.mubr.bf16.gmra.mrb[24].mxu1 %v682_v15  ;;  %v629_v15 = vld [vmem:[%s10526_s23 + $0x338] sm:$0xff] }
  0xb7   : > { %2168 = vmatpush1.bf16.msra.mxu0 %v9387_v13  ;;  %2620 = vmatpush1.bf16.msra.mxu1 %v9390_v14  ;;  %v614_v13 = vld [vmem:[%s10526_s23 + $0x2c0] sm:$0xff]  ;;  %v621_v14 = vld [vmem:[%s10526_s23 + $0x2f8] sm:$0xff] }
  0xb8   : > { %2169 = vmatprep.subr.bf16.mxu0 %v9395_v16  ;;  %2621 = vmatprep.subr.bf16.mxu1 %v9398_v17  ;;  %v636_v16 = vld [vmem:[%s10526_s23 + $0x370] sm:$0xff]  ;;  %v684_v17 = vpack.c.bf16 %v621_v14, %v614_v13  ;;  %v9447_v10 = vld [vmem:[%s13232_s4 + $0xf8] sm:$0xff]   ;;  %v9449_v13 = vld [vmem:[%s13234_s6 + $0x40] sm:$0xff]  }
  0xb9   : > { %2132 = vmatprep.mubr.bf16.mxu0 %v690_v20  ;;  %2584 = vmatprep.mubr.bf16.mxu1 %v690_v20  ;;  %v635_v20 = vld [vmem:[%s10526_s23 + $0x368] sm:$0xff]  ;;  %v9451_v14 = vld [vmem:[%s13234_s6 + $0xc0] sm:$0xff]  }
  0xbb   : > { %2170 = vmatpush1.bf16.msra.mxu0 %v9393_v18  ;;  %2622 = vmatpush1.bf16.msra.mxu1 %v9396_v19  ;;  %v692_v18 = vpack.c.bf16 %v636_v16, %v629_v15  ;;  %v628_v19 = vld [vmem:[%s10526_s23 + $0x330] sm:$0xff]  ;;  %v892_v15 = vlaneseq }
  0xbc   : > { %2171 = vmatprep.subr.bf16.mxu0 %v9401_v23  ;;  %2623 = vmatprep.subr.bf16.mxu1 %v9404_v24  ;;  %v691_v21 = vpack.c.bf16 %v635_v20, %v628_v19  ;;  %v539_v23 = vld [vmem:[%s10526_s23 + $0x68] sm:$0xff]  ;;  %v10300_v24 = vmov 0   ;;  %v890_v19 = vld [vmem:[%s13231_s3] sm:$0xf] }
  0xbd   : > { %v644_v25 = vpack.c.bf16 %v539_v23, %v532_v22  ;;  %v11230_v16 = vshrl.u32 %v892_v15, 7 }
  0xbe   : > { %2133 = vmatmul.mubr.bf16.gmra.mrb[28].mxu0 %v689_v29  ;;  %2585 = vmatmul.mubr.bf16.gmra.mrb[28].mxu1 %v689_v29  ;;  %v9423_v29 = vld [vmem:[%s13232_s4 + $0xc8] sm:$0xff]  }
  0xbf   : > { %2172 = vmatpush1.bf16.msra.mxu0 %v9399_v27  ;;  %2624 = vmatpush1.bf16.msra.mxu1 %v9402_v28  ;;  %v9420_v27 = vld [vmem:[%s13232_s4 + $0x80] sm:$0xff]   ;;  %v9421_v28 = vld [vmem:[%s13232_s4 + $0x48] sm:$0xff]   ;;  %v11242_v20 = vsub.s32 1, %v11230_v16 }
  0xc0   : > { %2173 = vmatprep.subr.bf16.mxu0 %v9407_v30  ;;  %2625 = vmatprep.subr.bf16.mxu1 %v9410_v31  ;;  %v546_v30 = vld [vmem:[%s10526_s23 + $0xa0] sm:$0xff]  ;;  %v553_v31 = vld [vmem:[%s10526_s23 + $0xd8] sm:$0xff] }
  0xc1   : > { %2175 = vmatprep.mubr.bf16.mxu0 %v643_v32  ;;  %2627 = vmatprep.mubr.bf16.mxu1 %v643_v32  ;;  %v9422_v32 = vld [vmem:[%s13232_s4 + $0x8] sm:$0xff]   ;;  %v651_v36 = vpack.c.bf16 %v553_v31, %v546_v30 }
  0xc3   : > { %2174 = vmatpush1.bf16.msra.mxu0 %v9405_v33  ;;  %2626 = vmatpush1.bf16.msra.mxu1 %v9408_v34  ;;  %v9424_v33 = vld [vmem:[%s13232_s4 + $0x88] sm:$0xff]   ;;  %v9425_v34 = vld [vmem:[%s13232_s4 + $0x50] sm:$0xff]  }
  0xc4   : > { %2256 = vmatprep.subr.bf16.mxu0 %v9413_v37  ;;  %2708 = vmatprep.subr.bf16.mxu1 %v9416_v38  ;;  %v9426_v37 = vld [vmem:[%s13232_s4 + $0x10] sm:$0xff]  }
  0xc5   : > { %v9428_v38 = vld [vmem:[%s13232_s4 + $0x90] sm:$0xff]  }
  0xc6   : > { %2176 = vmatmul.mubr.bf16.vlgmr.msra.gmra.mrb[0].mxu0 %v642_v41  ;;  %2628 = vmatmul.mubr.bf16.vlgmr.msra.gmra.mrb[0].mxu1 %v642_v41  ;;  %v560_v41 = vld [vmem:[%s10526_s23 + $0x110] sm:$0xff] }
  0xc7   : > { %2257 = vmatpush1.bf16.msra.mxu0 %v9411_v42  ;;  %2709 = vmatpush1.bf16.msra.mxu1 %v9414_v43  ;;  %v567_v42 = vld [vmem:[%s10526_s23 + $0x148] sm:$0xff]  ;;  %v9430_v43 = vld [vmem:[%s13232_s4 + $0x18] sm:$0xff]  }
  0xc8   : > { %2185 = vmatprep.mubr.bf16.mxu0 %v650_v44  ;;  %2637 = vmatprep.mubr.bf16.mxu1 %v650_v44  ;;  %v9432_v44 = vld [vmem:[%s13232_s4 + $0x98] sm:$0xff]   ;;  %v658_v47 = vpack.c.bf16 %v567_v42, %v560_v41 }
  0xc9   : > { %8281 = vmatprep.subr.bf16.mxu0 %v9417_v45  ;;  %8345 = vmatprep.subr.bf16.mxu1 %v9419_v46  ;;  %v9433_v45 = vld [vmem:[%s13232_s4 + $0x60] sm:$0xff]  }
  0xca   : > { %v9435_v46 = vld [vmem:[%s13232_s4 + $0xe0] sm:$0xff]  }
  0xce   : > { %2186 = vmatmul.mubr.bf16.gmra.mrb[4].mxu0 %v649_v51  ;;  %2638 = vmatmul.mubr.bf16.gmra.mrb[4].mxu1 %v649_v51  ;;  %v9439_v51 = vld [vmem:[%s13232_s4 + $0xe8] sm:$0xff]  }
  0xcf   : > { %2195 = vmatprep.mubr.bf16.mxu0 %v657_v52  ;;  %2647 = vmatprep.mubr.bf16.mxu1 %v657_v52  ;;  %v574_v52 = vld [vmem:[%s10526_s23 + $0x180] sm:$0xff] }
  0xd6   : > { %2196 = vmatmul.mubr.bf16.gmra.mrb[8].mxu0 %v656_v57  ;;  %2648 = vmatmul.mubr.bf16.gmra.mrb[8].mxu1 %v656_v57  ;;  %v9443_v57 = vld [vmem:[%s13232_s4 + $0xf0] sm:$0xff]  }
  0xd7   : > { %2205 = vmatprep.mubr.bf16.mxu0 %v664_v58  ;;  %2657 = vmatprep.mubr.bf16.mxu1 %v664_v58  ;;  %v665_v58 = vpack.c.bf16 %v581_v53, %v574_v52 }
  0xde   : > { %2206 = vmatmul.mubr.bf16.gmra.mrb[12].mxu0 %v663_v63  ;;  %2658 = vmatmul.mubr.bf16.gmra.mrb[12].mxu1 %v663_v63  ;;  %v672_v63 = vpack.c.bf16 %v595_v62, %v588_v61 }
  0xdf   : > { %2215 = vmatprep.mubr.bf16.mxu0 %v671_v0  ;;  %2667 = vmatprep.mubr.bf16.mxu1 %v671_v0  ;;  %v602_v0 = vld [vmem:[%s10526_s23 + $0x260] sm:$0xff] }
  0xe0   : > { %v679_v2 = vpack.c.bf16 %v609_v1, %v602_v0  ;;  %v9455_v0 = vld [vmem:[%s13234_s6 + $0xc8] sm:$0xff]  }
  0xe6   : > { %2216 = vmatmul.mubr.bf16.gmra.mrb[16].mxu0 %v670_v5  ;;  %2668 = vmatmul.mubr.bf16.gmra.mrb[16].mxu1 %v670_v5  ;;  %v686_v5 = vpack.c.bf16 %v623_v4, %v616_v3 }
  0xe7   : > { %2225 = vmatprep.mubr.bf16.mxu0 %v678_v6  ;;  %2677 = vmatprep.mubr.bf16.mxu1 %v678_v6  ;;  %v630_v6 = vld [vmem:[%s10526_s23 + $0x340] sm:$0xff] }
  0xe8   : > { %v693_v8 = vpack.c.bf16 %v637_v7, %v630_v6 }
  0xee   : > { %2226 = vmatmul.mubr.bf16.gmra.mrb[20].mxu0 %v677_v11  ;;  %2678 = vmatmul.mubr.bf16.gmra.mrb[20].mxu1 %v677_v11  ;;  %v9446_v11 = vld [vmem:[%s13232_s4 + $0x38] sm:$0xff]  }
  0xef   : > { %2235 = vmatprep.mubr.bf16.mxu0 %v685_v12  ;;  %2687 = vmatprep.mubr.bf16.mxu1 %v685_v12  ;;  %v9448_v12 = vld [vmem:[%s13232_s4 + $0xb8] sm:$0xff]  }
  0xf6   : > { %2236 = vmatmul.mubr.bf16.gmra.mrb[24].mxu0 %v684_v17  ;;  %2688 = vmatmul.mubr.bf16.gmra.mrb[24].mxu1 %v684_v17  ;;  %v11233_v17 = vsub.s32 0, %v11230_v16 }
  0xf7   : > { %2245 = vmatprep.mubr.bf16.mxu0 %v692_v18  ;;  %2697 = vmatprep.mubr.bf16.mxu1 %v692_v18  ;;  %v11236_v18 = vsub.s32 2, %v11230_v16 }
  0xf8   : > { %v11248_v22 = vrot.slane %v890_v19, %v11233_v17 }
  0xf9   : > { %v11251_v23 = vrot.slane %v890_v19, %v11236_v18 }
  0xfe   : > { %2246 = vmatmul.mubr.bf16.gmra.mrb[28].mxu0 %v691_v21  ;;  %2698 = vmatmul.mubr.bf16.gmra.mrb[28].mxu1 %v691_v21  ;;  %v11245_v21 = vsub.s32 3, %v11230_v16 }
  0xff   : > { %2288 = vmatprep.mubr.bf16.mxu0 %v10300_v24  ;;  %2740 = vmatprep.mubr.bf16.mxu1 %v10300_v24 }
 0x106   : > { %7835 = vmatmul.mubr.msk.bf16.vlgmr.msra.gmra.mrb[0].mxu0 %vm1892_vm0, %v644_v25  ;;  %7843 = vmatmul.mubr.msk.bf16.vlgmr.msra.gmra.mrb[0].mxu1 %vm1892_vm0, %v644_v25  ;;  %v11254_v25 = vrot.slane %v890_v19, %v11242_v20 }
 0x107   : > { %2298 = vmatprep.mubr.bf16.mxu0 %v10300_v24  ;;  %2750 = vmatprep.mubr.bf16.mxu1 %v10300_v24 }
 0x108   : > { %8282 = vmatpush3.bf16.msra.mxu0 %v9418_v26  ;;  %8346 = vmatpush3.bf16.msra.mxu1 %v9420_v27  ;;  %v11257_v26 = vrot.slane %v890_v19, %v11245_v21 }
 0x109   : > { %8283 = vmatprep.subr.bf16.mxu0 %v9421_v28  ;;  %8347 = vmatprep.subr.bf16.mxu1 %v9423_v29 }
 0x10c   : > { %8284 = vmatpush3.bf16.msra.mxu0 %v9422_v32  ;;  %8348 = vmatpush3.bf16.msra.mxu1 %v9424_v33 }
 0x10d   : > { %8285 = vmatprep.subr.bf16.mxu0 %v9425_v34  ;;  %8349 = vmatprep.subr.bf16.mxu1 %v9427_v35 }
 0x10e   : > { %7836 = vmatmul.mubr.msk.bf16.gmra.mrb[4].mxu0 %vm1892_vm0, %v651_v36  ;;  %7844 = vmatmul.mubr.msk.bf16.gmra.mrb[4].mxu1 %vm1892_vm0, %v651_v36 }
 0x10f   : > { %2308 = vmatprep.mubr.bf16.mxu0 %v10300_v24  ;;  %2760 = vmatprep.mubr.bf16.mxu1 %v10300_v24 }
 0x110   : > { %8286 = vmatpush3.bf16.msra.mxu0 %v9426_v37  ;;  %8350 = vmatpush3.bf16.msra.mxu1 %v9428_v38 }
 0x111   : > { %8287 = vmatprep.subr.bf16.mxu0 %v9429_v39  ;;  %8351 = vmatprep.subr.bf16.mxu1 %v9431_v40 }
 0x114   : > { %8288 = vmatpush3.bf16.msra.mxu0 %v9430_v43  ;;  %8352 = vmatpush3.bf16.msra.mxu1 %v9432_v44 }
 0x115   : > { %8289 = vmatprep.subr.bf16.mxu0 %v9433_v45  ;;  %8353 = vmatprep.subr.bf16.mxu1 %v9435_v46 }
 0x116   : > { %7837 = vmatmul.mubr.msk.bf16.gmra.mrb[8].mxu0 %vm1892_vm0, %v658_v47  ;;  %7845 = vmatmul.mubr.msk.bf16.gmra.mrb[8].mxu1 %vm1892_vm0, %v658_v47 }
 0x117   : > { %2318 = vmatprep.mubr.bf16.mxu0 %v10300_v24  ;;  %2770 = vmatprep.mubr.bf16.mxu1 %v10300_v24 }
 0x118   : > { %8290 = vmatpush3.bf16.msra.mxu0 %v9434_v48  ;;  %8354 = vmatpush3.bf16.msra.mxu1 %v9436_v49 }
 0x119   : > { %8291 = vmatprep.subr.bf16.mxu0 %v9437_v50  ;;  %8355 = vmatprep.subr.bf16.mxu1 %v9439_v51 }
 0x11c   : > { %8292 = vmatpush3.bf16.msra.mxu0 %v9438_v54  ;;  %8356 = vmatpush3.bf16.msra.mxu1 %v9440_v55 }
 0x11d   : > { %8293 = vmatprep.subr.bf16.mxu0 %v9441_v56  ;;  %8357 = vmatprep.subr.bf16.mxu1 %v9443_v57  ;;  %v9450_v57 = vld [vmem:[%s13234_s6] sm:$0xff]  }
 0x11e   : > { %7838 = vmatmul.mubr.msk.bf16.gmra.mrb[12].mxu0 %vm1892_vm0, %v665_v58  ;;  %7846 = vmatmul.mubr.msk.bf16.gmra.mrb[12].mxu1 %vm1892_vm0, %v665_v58  ;;  %v9452_v58 = vld [vmem:[%s13234_s6 + $0x80] sm:$0xff]  }
 0x11f   : > { %2328 = vmatprep.mubr.bf16.mxu0 %v10300_v24  ;;  %2780 = vmatprep.mubr.bf16.mxu1 %v10300_v24 }
 0x120   : > { %8294 = vmatpush3.bf16.msra.mxu0 %v9442_v59  ;;  %8358 = vmatpush3.bf16.msra.mxu1 %v9444_v60 }
 0x121   : > { %8295 = vmatprep.subr.bf16.mxu0 %v9445_v9  ;;  %8359 = vmatprep.subr.bf16.mxu1 %v9447_v10 }
 0x124   : > { %8296 = vmatpush3.bf16.msra.mxu0 %v9446_v11  ;;  %8360 = vmatpush3.bf16.msra.mxu1 %v9448_v12  ;;  %v9454_v11 = vld [vmem:[%s13234_s6 + $0x8] sm:$0xff]  }
 0x125   : > { %8409 = vmatprep.subr.bf16.mxu0 %v9449_v13  ;;  %8473 = vmatprep.subr.bf16.mxu1 %v9451_v14  ;;  %v9456_v12 = vld [vmem:[%s13234_s6 + $0x88] sm:$0xff]  }
 0x126   : > { %7839 = vmatmul.mubr.msk.bf16.gmra.mrb[16].mxu0 %vm1892_vm0, %v672_v63  ;;  %7847 = vmatmul.mubr.msk.bf16.gmra.mrb[16].mxu1 %vm1892_vm0, %v672_v63  ;;  %v9453_v63 = vld [vmem:[%s13234_s6 + $0x48] sm:$0xff]  }
 0x127   : > { %2338 = vmatprep.mubr.bf16.mxu0 %v10300_v24  ;;  %2790 = vmatprep.mubr.bf16.mxu1 %v10300_v24 }
 0x12e   : > { %7840 = vmatmul.mubr.msk.bf16.gmra.mrb[20].mxu0 %vm1892_vm0, %v679_v2  ;;  %7848 = vmatmul.mubr.msk.bf16.gmra.mrb[20].mxu1 %vm1892_vm0, %v679_v2 }
 0x12f   : > { %2348 = vmatprep.mubr.bf16.mxu0 %v10300_v24  ;;  %2800 = vmatprep.mubr.bf16.mxu1 %v10300_v24 }
 0x136   : > { %7841 = vmatmul.mubr.msk.bf16.gmra.mrb[24].mxu0 %vm1892_vm0, %v686_v5  ;;  %7849 = vmatmul.mubr.msk.bf16.gmra.mrb[24].mxu1 %vm1892_vm0, %v686_v5 }
 0x137   : > { %2358 = vmatprep.mubr.bf16.mxu0 %v10300_v24  ;;  %2810 = vmatprep.mubr.bf16.mxu1 %v10300_v24 }
 0x13e   : > { %7842 = vmatmul.mubr.msk.bf16.gmra.mrb[28].mxu0 %vm1892_vm0, %v693_v8  ;;  %7850 = vmatmul.mubr.msk.bf16.gmra.mrb[28].mxu1 %vm1892_vm0, %v693_v8 }
 0x1d9   : > { %v2290_v27 = vpop.f32.mrb[0].mxu0  ;;  %v2742_v28 = vpop.f32.mrb[0].mxu1 }
 0x1da   : > { %v8665_v29 = vadd.f32 %v2290_v27, %v11248_v22  ;;  %v8697_v30 = vadd.f32 %v2742_v28, %v11251_v23  ;;  %v2292_v31 = vpop.f32.mrb[1].mxu0  ;;  %v2744_v32 = vpop.f32.mrb[1].mxu1  ;;  %v9457_v27 = vld [vmem:[%s13234_s6 + $0x50] sm:$0xff]  }
 0x1db   : > { %v8666_v33 = vadd.f32 %v2292_v31, %v11254_v25  ;;  %v8698_v34 = vadd.f32 %v2744_v32, %v11257_v26  ;;  %v2294_v35 = vpop.f32.mrb[2].mxu0  ;;  %v2746_v36 = vpop.f32.mrb[2].mxu1  ;;  %v9459_v28 = vld [vmem:[%s13234_s6 + $0xd0] sm:$0xff]  }
 0x1dc   : > { %v8667_v37 = vadd.f32 %v2294_v35, %v11248_v22  ;;  %v8699_v38 = vadd.f32 %v2746_v36, %v11251_v23  ;;  %v2296_v39 = vpop.f32.mrb[3].mxu0  ;;  %v2748_v40 = vpop.f32.mrb[3].mxu1  ;;  %v2821_v43 = vmax.f32 %v8665_v29, 0.0  ;;  %v2823_v44 = vmax.f32 %v8697_v30, 0.0 }
 0x1dd   : > { %v8668_v41 = vadd.f32 %v2296_v39, %v11254_v25  ;;  %v8700_v42 = vadd.f32 %v2748_v40, %v11257_v26  ;;  %v2822_v47 = vmax.f32 %v8666_v33, 0.0  ;;  %v2824_v48 = vmax.f32 %v8698_v34, 0.0  ;;  %v9458_v39 = vld [vmem:[%s13234_s6 + $0x10] sm:$0xff]  }
 0x1de   : > { %v2825_v45 = vmax.f32 %v8667_v37, 0.0  ;;  %v2827_v46 = vmax.f32 %v8699_v38, 0.0  ;;  %v9460_v40 = vld [vmem:[%s13234_s6 + $0x90] sm:$0xff]  }
 0x1df   : > { %v2826_v49 = vmax.f32 %v8668_v41, 0.0  ;;  %v2828_v50 = vmax.f32 %v8700_v42, 0.0 }
 0x1e0   : > { %v11267_v51 = vpack.c.bf16 %v2825_v45, %v2821_v43  ;;  %v11269_v52 = vpack.c.bf16 %v2827_v46, %v2823_v44  ;;  %v9461_v45 = vld [vmem:[%s13234_s6 + $0x58] sm:$0xff]  }
 0x1e1   : > { %v11271_v53 = vpack.c.bf16 %v2826_v49, %v2822_v47  ;;  %v11273_v54 = vpack.c.bf16 %v2828_v50, %v2824_v48  ;;  %v2300_v55 = vpop.f32.mrb[4].mxu0  ;;  %v2752_v56 = vpop.f32.mrb[4].mxu1  ;;  %v9463_v46 = vld [vmem:[%s13234_s6 + $0xd8] sm:$0xff]  }
 0x1e2   : > { %v8669_v59 = vadd.f32 %v2300_v55, %v11248_v22  ;;  %v8701_v60 = vadd.f32 %v2752_v56, %v11251_v23  ;;  %v2302_v61 = vpop.f32.mrb[5].mxu0  ;;  %v2754_v62 = vpop.f32.mrb[5].mxu1 }
 0x1e3   : > { %v8670_v1 = vadd.f32 %v2302_v61, %v11254_v25  ;;  %v8702_v2 = vadd.f32 %v2754_v62, %v11257_v26  ;;  %v2304_v3 = vpop.f32.mrb[6].mxu0  ;;  %v2756_v4 = vpop.f32.mrb[6].mxu1  ;;  %3212 = vmatprep.mubr.bf16.mxu0 %v11271_v53  ;;  %3309 = vmatprep.mubr.bf16.mxu1 %v11273_v54  ;;  %v9462_v61 = vld [vmem:[%s13234_s6 + $0x18] sm:$0xff]  }
 0x1e4   : > { %v8671_v5 = vadd.f32 %v2304_v3, %v11248_v22  ;;  %v8703_v6 = vadd.f32 %v2756_v4, %v11251_v23  ;;  %v2306_v7 = vpop.f32.mrb[7].mxu0  ;;  %v2758_v8 = vpop.f32.mrb[7].mxu1  ;;  %3213 = vmatmul.mubr.bf16.vlgmr.msra.gmra.mrb[32].mxu0 %v11267_v51  ;;  %3310 = vmatmul.mubr.bf16.vlgmr.msra.gmra.mrb[32].mxu1 %v11269_v52  ;;  %v2829_v13 = vmax.f32 %v8669_v59, 0.0  ;;  %v2831_v14 = vmax.f32 %v8701_v60, 0.0  ;;  %v9464_v62 = vld [vmem:[%s13234_s6 + $0x98] sm:$0xff]   ;;  %v9465_v3 = vld [vmem:[%s13234_s6 + $0x60] sm:$0xff]  }
 0x1e5   : > { %v8672_v9 = vadd.f32 %v2306_v7, %v11254_v25  ;;  %v8704_v10 = vadd.f32 %v2758_v8, %v11257_v26  ;;  %8410 = vmatpush3.bf16.msra.mxu0 %v9450_v57  ;;  %8474 = vmatpush3.bf16.msra.mxu1 %v9452_v58  ;;  %v2830_v29 = vmax.f32 %v8670_v1, 0.0  ;;  %v2832_v30 = vmax.f32 %v8702_v2, 0.0  ;;  %v9467_v4 = vld [vmem:[%s13234_s6 + $0xe0] sm:$0xff]  }
 0x1e6   : > { %v2833_v15 = vmax.f32 %v8671_v5, 0.0  ;;  %v2835_v19 = vmax.f32 %v8703_v6, 0.0  ;;  %8411 = vmatprep.subr.bf16.mxu0 %v9453_v63  ;;  %8475 = vmatprep.subr.bf16.mxu1 %v9455_v0 }
 0x1e7   : > { %v2834_v31 = vmax.f32 %v8672_v9, 0.0  ;;  %v2836_v32 = vmax.f32 %v8704_v10, 0.0 }
 0x1e8   : > { %v11311_v33 = vpack.c.bf16 %v2833_v15, %v2829_v13  ;;  %v11313_v34 = vpack.c.bf16 %v2835_v19, %v2831_v14  ;;  %v9466_v15 = vld [vmem:[%s13234_s6 + $0x20] sm:$0xff]  }
 0x1e9   : > { %v11315_v35 = vpack.c.bf16 %v2834_v31, %v2830_v29  ;;  %v11317_v36 = vpack.c.bf16 %v2836_v32, %v2832_v30  ;;  %v2310_v37 = vpop.f32.mrb[8].mxu0  ;;  %v2762_v38 = vpop.f32.mrb[8].mxu1  ;;  %8412 = vmatpush3.bf16.msra.mxu0 %v9454_v11  ;;  %8476 = vmatpush3.bf16.msra.mxu1 %v9456_v12  ;;  %v9468_v19 = vld [vmem:[%s13234_s6 + $0xa0] sm:$0xff]   ;;  %v9469_v31 = vld [vmem:[%s13234_s6 + $0x68] sm:$0xff]  }
 0x1ea   : > { %v8673_v41 = vadd.f32 %v2310_v37, %v11248_v22  ;;  %v8705_v42 = vadd.f32 %v2762_v38, %v11251_v23  ;;  %v2312_v43 = vpop.f32.mrb[9].mxu0  ;;  %v2764_v44 = vpop.f32.mrb[9].mxu1  ;;  %8413 = vmatprep.subr.bf16.mxu0 %v9457_v27  ;;  %8477 = vmatprep.subr.bf16.mxu1 %v9459_v28  ;;  %v9471_v32 = vld [vmem:[%s13234_s6 + $0xe8] sm:$0xff]  }
 0x1eb   : > { %v8674_v47 = vadd.f32 %v2312_v43, %v11254_v25  ;;  %v8706_v48 = vadd.f32 %v2764_v44, %v11257_v26  ;;  %v2314_v49 = vpop.f32.mrb[10].mxu0  ;;  %v2766_v50 = vpop.f32.mrb[10].mxu1  ;;  %3220 = vmatprep.mubr.bf16.mxu0 %v11315_v35  ;;  %3317 = vmatprep.mubr.bf16.mxu1 %v11317_v36 }
 0x1ec   : > { %v8675_v55 = vadd.f32 %v2314_v49, %v11248_v22  ;;  %v8707_v56 = vadd.f32 %v2766_v50, %v11251_v23  ;;  %v2316_v57 = vpop.f32.mrb[11].mxu0  ;;  %v2768_v58 = vpop.f32.mrb[11].mxu1  ;;  %3221 = vmatmul.mubr.bf16.gmra.mrb[36].mxu0 %v11311_v33  ;;  %3318 = vmatmul.mubr.bf16.gmra.mrb[36].mxu1 %v11313_v34  ;;  %v2837_v63 = vmax.f32 %v8673_v41, 0.0  ;;  %v2839_v0 = vmax.f32 %v8705_v42, 0.0 }
 0x1ed   : > { %v8676_v59 = vadd.f32 %v2316_v57, %v11254_v25  ;;  %v8708_v60 = vadd.f32 %v2768_v58, %v11257_v26  ;;  %8414 = vmatpush3.bf16.msra.mxu0 %v9458_v39  ;;  %8478 = vmatpush3.bf16.msra.mxu1 %v9460_v40  ;;  %v2838_v5 = vmax.f32 %v8674_v47, 0.0  ;;  %v2840_v6 = vmax.f32 %v8706_v48, 0.0  ;;  %v9470_v47 = vld [vmem:[%s13234_s6 + $0x28] sm:$0xff]   ;;  %v9473_v57 = vld [vmem:[%s13234_s6 + $0x70] sm:$0xff]  }
 0x1ee   : > { %v2841_v1 = vmax.f32 %v8675_v55, 0.0  ;;  %v2843_v2 = vmax.f32 %v8707_v56, 0.0  ;;  %8415 = vmatprep.subr.bf16.mxu0 %v9461_v45  ;;  %8479 = vmatprep.subr.bf16.mxu1 %v9463_v46  ;;  %v9472_v48 = vld [vmem:[%s13234_s6 + $0xa8] sm:$0xff]   ;;  %v9475_v58 = vld [vmem:[%s13234_s6 + $0xf0] sm:$0xff]  }
 0x1ef   : > { %v2842_v7 = vmax.f32 %v8676_v59, 0.0  ;;  %v2844_v8 = vmax.f32 %v8708_v60, 0.0 }
 0x1f0   : > { %v11355_v9 = vpack.c.bf16 %v2841_v1, %v2837_v63  ;;  %v11357_v10 = vpack.c.bf16 %v2843_v2, %v2839_v0 }
 0x1f1   : > { %v11359_v11 = vpack.c.bf16 %v2842_v7, %v2838_v5  ;;  %v11361_v12 = vpack.c.bf16 %v2844_v8, %v2840_v6  ;;  %v2320_v13 = vpop.f32.mrb[12].mxu0  ;;  %v2772_v14 = vpop.f32.mrb[12].mxu1  ;;  %8416 = vmatpush3.bf16.msra.mxu0 %v9462_v61  ;;  %8480 = vmatpush3.bf16.msra.mxu1 %v9464_v62  ;;  %v9474_v5 = vld [vmem:[%s13234_s6 + $0x30] sm:$0xff]  }
 0x1f2   : > { %v8677_v27 = vadd.f32 %v2320_v13, %v11248_v22  ;;  %v8709_v28 = vadd.f32 %v2772_v14, %v11251_v23  ;;  %v2322_v29 = vpop.f32.mrb[13].mxu0  ;;  %v2774_v30 = vpop.f32.mrb[13].mxu1  ;;  %8417 = vmatprep.subr.bf16.mxu0 %v9465_v3  ;;  %8481 = vmatprep.subr.bf16.mxu1 %v9467_v4  ;;  %v9476_v6 = vld [vmem:[%s13234_s6 + $0xb0] sm:$0xff]  }
 0x1f3   : > { %v8678_v37 = vadd.f32 %v2322_v29, %v11254_v25  ;;  %v8710_v38 = vadd.f32 %v2774_v30, %v11257_v26  ;;  %v2324_v39 = vpop.f32.mrb[14].mxu0  ;;  %v2776_v40 = vpop.f32.mrb[14].mxu1  ;;  %3228 = vmatprep.mubr.bf16.mxu0 %v11359_v11  ;;  %3325 = vmatprep.mubr.bf16.mxu1 %v11361_v12 }
 0x1f4   : > { %v8679_v41 = vadd.f32 %v2324_v39, %v11248_v22  ;;  %v8711_v42 = vadd.f32 %v2776_v40, %v11251_v23  ;;  %v2326_v43 = vpop.f32.mrb[15].mxu0  ;;  %v2778_v44 = vpop.f32.mrb[15].mxu1  ;;  %3229 = vmatmul.mubr.bf16.gmra.mrb[40].mxu0 %v11355_v9  ;;  %3326 = vmatmul.mubr.bf16.gmra.mrb[40].mxu1 %v11357_v10  ;;  %v2845_v49 = vmax.f32 %v8677_v27, 0.0  ;;  %v2847_v50 = vmax.f32 %v8709_v28, 0.0 }
 0x1f5   : > { %v8680_v45 = vadd.f32 %v2326_v43, %v11254_v25  ;;  %v8712_v46 = vadd.f32 %v2778_v44, %v11257_v26  ;;  %8418 = vmatpush3.bf16.msra.mxu0 %v9466_v15  ;;  %8482 = vmatpush3.bf16.msra.mxu1 %v9468_v19  ;;  %v2846_v59 = vmax.f32 %v8678_v37, 0.0  ;;  %v2848_v60 = vmax.f32 %v8710_v38, 0.0  ;;  %v9477_v15 = vld [vmem:[%s13234_s6 + $0x78] sm:$0xff]  }
 0x1f6   : > { %v2849_v55 = vmax.f32 %v8679_v41, 0.0  ;;  %v2851_v56 = vmax.f32 %v8711_v42, 0.0  ;;  %8419 = vmatprep.subr.bf16.mxu0 %v9469_v31  ;;  %8483 = vmatprep.subr.bf16.mxu1 %v9471_v32  ;;  %v9479_v19 = vld [vmem:[%s13234_s6 + $0xf8] sm:$0xff]  }
 0x1f7   : > { %v2850_v61 = vmax.f32 %v8680_v45, 0.0  ;;  %v2852_v62 = vmax.f32 %v8712_v46, 0.0  ;;  %v9478_v41 = vld [vmem:[%s13234_s6 + $0x38] sm:$0xff]  }
 0x1f8   : > { %v11399_v63 = vpack.c.bf16 %v2849_v55, %v2845_v49  ;;  %v11401_v0 = vpack.c.bf16 %v2851_v56, %v2847_v50  ;;  %v9480_v42 = vld [vmem:[%s13234_s6 + $0xb8] sm:$0xff]  }
 0x1f9   : > { %v11403_v1 = vpack.c.bf16 %v2850_v61, %v2846_v59  ;;  %v11405_v2 = vpack.c.bf16 %v2852_v62, %v2848_v60  ;;  %v2330_v3 = vpop.f32.mrb[16].mxu0  ;;  %v2782_v4 = vpop.f32.mrb[16].mxu1  ;;  %8420 = vmatpush3.bf16.msra.mxu0 %v9470_v47  ;;  %8484 = vmatpush3.bf16.msra.mxu1 %v9472_v48 }
 0x1fa   : > { %v8681_v7 = vadd.f32 %v2330_v3, %v11248_v22  ;;  %v8713_v8 = vadd.f32 %v2782_v4, %v11251_v23  ;;  %v2332_v13 = vpop.f32.mrb[17].mxu0  ;;  %v2784_v14 = vpop.f32.mrb[17].mxu1  ;;  %8421 = vmatprep.subr.bf16.mxu0 %v9473_v57  ;;  %8485 = vmatprep.subr.bf16.mxu1 %v9475_v58 }
 0x1fb   : > { %v8682_v27 = vadd.f32 %v2332_v13, %v11254_v25  ;;  %v8714_v28 = vadd.f32 %v2784_v14, %v11257_v26  ;;  %v2334_v29 = vpop.f32.mrb[18].mxu0  ;;  %v2786_v30 = vpop.f32.mrb[18].mxu1  ;;  %3236 = vmatprep.mubr.bf16.mxu0 %v11403_v1  ;;  %3333 = vmatprep.mubr.bf16.mxu1 %v11405_v2 }
 0x1fc   : > { %v8683_v31 = vadd.f32 %v2334_v29, %v11248_v22  ;;  %v8715_v32 = vadd.f32 %v2786_v30, %v11251_v23  ;;  %v2336_v37 = vpop.f32.mrb[19].mxu0  ;;  %v2788_v38 = vpop.f32.mrb[19].mxu1  ;;  %3237 = vmatmul.mubr.bf16.gmra.mrb[44].mxu0 %v11399_v63  ;;  %3334 = vmatmul.mubr.bf16.gmra.mrb[44].mxu1 %v11401_v0  ;;  %v2853_v43 = vmax.f32 %v8681_v7, 0.0  ;;  %v2855_v44 = vmax.f32 %v8713_v8, 0.0 }
 0x1fd   : > { %v8684_v39 = vadd.f32 %v2336_v37, %v11254_v25  ;;  %v8716_v40 = vadd.f32 %v2788_v38, %v11257_v26  ;;  %8422 = vmatpush3.bf16.msra.mxu0 %v9474_v5  ;;  %8486 = vmatpush3.bf16.msra.mxu1 %v9476_v6  ;;  %v2854_v47 = vmax.f32 %v8682_v27, 0.0  ;;  %v2856_v48 = vmax.f32 %v8714_v28, 0.0 }
 0x1fe   : > { %v2857_v45 = vmax.f32 %v8683_v31, 0.0  ;;  %v2859_v46 = vmax.f32 %v8715_v32, 0.0  ;;  %8423 = vmatprep.subr.bf16.mxu0 %v9477_v15  ;;  %8487 = vmatprep.subr.bf16.mxu1 %v9479_v19 }
 0x1ff   : > { %v2858_v49 = vmax.f32 %v8684_v39, 0.0  ;;  %v2860_v50 = vmax.f32 %v8716_v40, 0.0 }
 0x200   : > { %v11437_v55 = vpack.c.bf16 %v2857_v45, %v2853_v43  ;;  %v11439_v56 = vpack.c.bf16 %v2859_v46, %v2855_v44 }
 0x201   : > { %v11441_v57 = vpack.c.bf16 %v2858_v49, %v2854_v47  ;;  %v11443_v58 = vpack.c.bf16 %v2860_v50, %v2856_v48  ;;  %v2340_v59 = vpop.f32.mrb[20].mxu0  ;;  %v2792_v60 = vpop.f32.mrb[20].mxu1  ;;  %8424 = vmatpush3.bf16.msra.mxu0 %v9478_v41  ;;  %8488 = vmatpush3.bf16.msra.mxu1 %v9480_v42 }
 0x202   : > { %v8685_v61 = vadd.f32 %v2340_v59, %v11248_v22  ;;  %v8717_v62 = vadd.f32 %v2792_v60, %v11251_v23  ;;  %v2342_v3 = vpop.f32.mrb[21].mxu0  ;;  %v2794_v4 = vpop.f32.mrb[21].mxu1 }
 0x203   : > { %v8686_v5 = vadd.f32 %v2342_v3, %v11254_v25  ;;  %v8718_v6 = vadd.f32 %v2794_v4, %v11257_v26  ;;  %v2344_v7 = vpop.f32.mrb[22].mxu0  ;;  %v2796_v8 = vpop.f32.mrb[22].mxu1  ;;  %3244 = vmatprep.mubr.bf16.mxu0 %v11441_v57  ;;  %3341 = vmatprep.mubr.bf16.mxu1 %v11443_v58 }
 0x204   : > { %v8687_v13 = vadd.f32 %v2344_v7, %v11248_v22  ;;  %v8719_v14 = vadd.f32 %v2796_v8, %v11251_v23  ;;  %v2346_v15 = vpop.f32.mrb[23].mxu0  ;;  %v2798_v19 = vpop.f32.mrb[23].mxu1  ;;  %3245 = vmatmul.mubr.bf16.gmra.mrb[48].mxu0 %v11437_v55  ;;  %3342 = vmatmul.mubr.bf16.gmra.mrb[48].mxu1 %v11439_v56  ;;  %v2861_v29 = vmax.f32 %v8685_v61, 0.0  ;;  %v2863_v30 = vmax.f32 %v8717_v62, 0.0 }
 0x205   : > { %v8688_v27 = vadd.f32 %v2346_v15, %v11254_v25  ;;  %v8720_v28 = vadd.f32 %v2798_v19, %v11257_v26  ;;  %v2862_v37 = vmax.f32 %v8686_v5, 0.0  ;;  %v2864_v38 = vmax.f32 %v8718_v6, 0.0 }
 0x206   : > { %v2865_v31 = vmax.f32 %v8687_v13, 0.0  ;;  %v2867_v32 = vmax.f32 %v8719_v14, 0.0 }
 0x207   : > { %v2866_v39 = vmax.f32 %v8688_v27, 0.0  ;;  %v2868_v40 = vmax.f32 %v8720_v28, 0.0 }
 0x208   : > { %v11457_v41 = vpack.c.bf16 %v2865_v31, %v2861_v29  ;;  %v11459_v42 = vpack.c.bf16 %v2867_v32, %v2863_v30 }
 0x209   : > { %v11461_v43 = vpack.c.bf16 %v2866_v39, %v2862_v37  ;;  %v11463_v44 = vpack.c.bf16 %v2868_v40, %v2864_v38  ;;  %v2350_v45 = vpop.f32.mrb[24].mxu0  ;;  %v2802_v46 = vpop.f32.mrb[24].mxu1 }
 0x20a   : > { %v8689_v47 = vadd.f32 %v2350_v45, %v11248_v22  ;;  %v8721_v48 = vadd.f32 %v2802_v46, %v11251_v23  ;;  %v2352_v49 = vpop.f32.mrb[25].mxu0  ;;  %v2804_v50 = vpop.f32.mrb[25].mxu1 }
 0x20b   : > { %v8690_v59 = vadd.f32 %v2352_v49, %v11254_v25  ;;  %v8722_v60 = vadd.f32 %v2804_v50, %v11257_v26  ;;  %v2354_v61 = vpop.f32.mrb[26].mxu0  ;;  %v2806_v62 = vpop.f32.mrb[26].mxu1  ;;  %3252 = vmatprep.mubr.bf16.mxu0 %v11461_v43  ;;  %3349 = vmatprep.mubr.bf16.mxu1 %v11463_v44 }
 0x20c   : > { %v8691_v3 = vadd.f32 %v2354_v61, %v11248_v22  ;;  %v8723_v4 = vadd.f32 %v2806_v62, %v11251_v23  ;;  %v2356_v5 = vpop.f32.mrb[27].mxu0  ;;  %v2808_v6 = vpop.f32.mrb[27].mxu1  ;;  %3253 = vmatmul.mubr.bf16.gmra.mrb[52].mxu0 %v11457_v41  ;;  %3350 = vmatmul.mubr.bf16.gmra.mrb[52].mxu1 %v11459_v42  ;;  %v2869_v13 = vmax.f32 %v8689_v47, 0.0  ;;  %v2871_v14 = vmax.f32 %v8721_v48, 0.0 }
 0x20d   : > { %v8692_v7 = vadd.f32 %v2356_v5, %v11254_v25  ;;  %v8724_v8 = vadd.f32 %v2808_v6, %v11257_v26  ;;  %v2870_v27 = vmax.f32 %v8690_v59, 0.0  ;;  %v2872_v28 = vmax.f32 %v8722_v60, 0.0 }
 0x20e   : > { %v2873_v15 = vmax.f32 %v8691_v3, 0.0  ;;  %v2875_v19 = vmax.f32 %v8723_v4, 0.0 }
 0x20f   : > { %v2874_v29 = vmax.f32 %v8692_v7, 0.0  ;;  %v2876_v30 = vmax.f32 %v8724_v8, 0.0 }
 0x210   : > { %v11477_v31 = vpack.c.bf16 %v2873_v15, %v2869_v13  ;;  %v11479_v32 = vpack.c.bf16 %v2875_v19, %v2871_v14 }
 0x211   : > { %v2910_v37 = vpack.c.bf16 %v2874_v29, %v2870_v27  ;;  %v2912_v38 = vpack.c.bf16 %v2876_v30, %v2872_v28  ;;  %v2360_v39 = vpop.f32.mrb[28].mxu0  ;;  %v2812_v40 = vpop.f32.mrb[28].mxu1 }
 0x212   : > { %v8693_v45 = vadd.f32 %v2360_v39, %v11248_v22  ;;  %v8725_v46 = vadd.f32 %v2812_v40, %v11251_v23  ;;  %v2362_v47 = vpop.f32.mrb[29].mxu0  ;;  %v2814_v48 = vpop.f32.mrb[29].mxu1 }
 0x213   : > { %v8694_v49 = vadd.f32 %v2362_v47, %v11254_v25  ;;  %v8726_v50 = vadd.f32 %v2814_v48, %v11257_v26  ;;  %v2364_v59 = vpop.f32.mrb[30].mxu0  ;;  %v2816_v60 = vpop.f32.mrb[30].mxu1  ;;  %3260 = vmatprep.mubr.bf16.mxu0 %v2910_v37  ;;  %3357 = vmatprep.mubr.bf16.mxu1 %v2912_v38 }
 0x214   : > { %v8695_v61 = vadd.f32 %v2364_v59, %v11248_v22  ;;  %v8727_v62 = vadd.f32 %v2816_v60, %v11251_v23  ;;  %v2366_v3 = vpop.f32.mrb[31].mxu0  ;;  %v2818_v4 = vpop.f32.mrb[31].mxu1  ;;  %3261 = vmatmul.mubr.bf16.gmra.mrb[56].mxu0 %v11477_v31  ;;  %3358 = vmatmul.mubr.bf16.gmra.mrb[56].mxu1 %v11479_v32  ;;  %v2877_v7 = vmax.f32 %v8693_v45, 0.0  ;;  %v2879_v8 = vmax.f32 %v8725_v46, 0.0 }
 0x215   : > { %v8696_v5 = vadd.f32 %v2366_v3, %v11254_v25  ;;  %v8728_v6 = vadd.f32 %v2818_v4, %v11257_v26  ;;  %v2878_v15 = vmax.f32 %v8694_v49, 0.0  ;;  %v2880_v19 = vmax.f32 %v8726_v50, 0.0  ;;  %v9481_v25 = vld [vmem:[%s13236_s8] ss:$16 sps:$4 sm:$0xff]   ;;  %v9483_v26 = vld [vmem:[%s13236_s8 + $0x4] ss:$16 sps:$4 sm:$0xff]  }
 0x216   : > { %v2881_v13 = vmax.f32 %v8695_v61, 0.0  ;;  %v2883_v14 = vmax.f32 %v8727_v62, 0.0  ;;  %4031 = vmatprep.subr.bf16.mxu0 %v9483_v26 }
 0x217   : > { %v2882_v27 = vmax.f32 %v8696_v5, 0.0  ;;  %v2884_v22 = vmax.f32 %v8728_v6, 0.0 }
 0x218   : > { %v2913_v28 = vpack.c.bf16 %v2881_v13, %v2877_v7  ;;  %v2915_v23 = vpack.c.bf16 %v2883_v14, %v2879_v8 }
 0x219   : > { %v2914_v29 = vpack.c.bf16 %v2882_v27, %v2878_v15  ;;  %v2916_v30 = vpack.c.bf16 %v2884_v22, %v2880_v19 }
 0x21b   : > { %3268 = vmatprep.mubr.bf16.mxu0 %v2914_v29  ;;  %3365 = vmatprep.mubr.bf16.mxu1 %v2916_v30 }
 0x21c   : > { %3269 = vmatmul.mubr.bf16.gmra.mrb[60].mxu0 %v2913_v28  ;;  %3366 = vmatmul.mubr.bf16.gmra.mrb[60].mxu1 %v2915_v23 }
 0x21d   : > { %3669 = vmatprep.mubr.bf16.mxu0 %v11271_v53  ;;  %3766 = vmatprep.mubr.bf16.mxu1 %v11273_v54 }
 0x224   : > { %3670 = vmatmul.mubr.bf16.vlgmr.msra.gmra.mrb[64].mxu0 %v11267_v51  ;;  %3767 = vmatmul.mubr.bf16.vlgmr.msra.gmra.mrb[64].mxu1 %v11269_v52  ;;  %v3939_v51 = vld [vmem:[%s13236_s8 + $0x20] sm:$0x33] }
 0x225   : > { %3677 = vmatprep.mubr.bf16.mxu0 %v11315_v35  ;;  %3774 = vmatprep.mubr.bf16.mxu1 %v11317_v36  ;;  %v7922_v52 = vcombine.high %v3939_v51, %v3939_v51  ;;  %v7921_v53 = vcombine.low %v3939_v51, %v3939_v51  ;;  %v3940_v35 = vld [vmem:[%s13236_s8 + $0x28] sm:$0x33]  ;;  %v9493_v51 = vld [vmem:[%s13238_s10 + $0x4] ss:$28 sps:$4 sm:$0xff]  }
 0x226   : > { %4032 = vmatpush1.bf16.msra.mxu0 %v9481_v25  ;;  %v7924_v36 = vcombine.high %v3940_v35, %v3940_v35 }
 0x227   : > { %7925 = vmatprep.subr.msk.bf16.mxu0 %vm4018_vm1, %v7922_v52  ;;  %v4020_v54 = vsel %vm4018_vm1, %v7921_v53, 0 }
 0x22a   : > { %4034 = vmatpush1.bf16.msra.mxu0 %v4020_v54 }
 0x22b   : > { %5798 = vmatprep.subr.bf16.mxu0 %v9493_v51 }
 0x22c   : > { %3678 = vmatmul.mubr.bf16.gmra.mrb[68].mxu0 %v11311_v33  ;;  %3775 = vmatmul.mubr.bf16.gmra.mrb[68].mxu1 %v11313_v34  ;;  %v9488_v33 = vld [vmem:[%s13236_s8 + $0xc] ss:$16 sps:$4 sm:$0xff]   ;;  %v9486_v34 = vld [vmem:[%s13236_s8 + $0x8] ss:$16 sps:$4 sm:$0xff]  }
 0x22d   : > { %3685 = vmatprep.mubr.bf16.mxu0 %v11359_v11  ;;  %3782 = vmatprep.mubr.bf16.mxu1 %v11361_v12 }
 0x22e   : > { %4144 = vmatprep.subr.bf16.mxu1 %v9488_v33  ;;  %v9496_v33 = vld [vmem:[%s13238_s10 + $0xc] ss:$28 sps:$4 sm:$0xff]  }
 0x22f   : > { %4145 = vmatpush1.bf16.msra.mxu1 %v9486_v34 }
 0x230   : > { %7934 = vmatprep.subr.msk.bf16.mxu1 %vm4018_vm1, %v7924_v36 }
 0x234   : > { %3686 = vmatmul.mubr.bf16.gmra.mrb[72].mxu0 %v11355_v9  ;;  %3783 = vmatmul.mubr.bf16.gmra.mrb[72].mxu1 %v11357_v10  ;;  %v7923_v9 = vcombine.low %v3940_v35, %v3940_v35 }
 0x235   : > { %3693 = vmatprep.mubr.bf16.mxu0 %v11403_v1  ;;  %3790 = vmatprep.mubr.bf16.mxu1 %v11405_v2 }
 0x236   : > { %v4026_v10 = vsel %vm4018_vm1, %v7923_v9, 0 }
 0x237   : > { %4147 = vmatpush1.bf16.msra.mxu1 %v4026_v10 }
 0x238   : > { %6024 = vmatprep.subr.bf16.mxu1 %v9496_v33 }
 0x23c   : > { %3694 = vmatmul.mubr.bf16.gmra.mrb[76].mxu0 %v11399_v63  ;;  %3791 = vmatmul.mubr.bf16.gmra.mrb[76].mxu1 %v11401_v0  ;;  %v11540_v63 = vld [vmem:[%s13233_s5] ss:$0 sm:$0xff] }
 0x23d   : > { %3701 = vmatprep.mubr.bf16.mxu0 %v11441_v57  ;;  %3798 = vmatprep.mubr.bf16.mxu1 %v11443_v58 }
 0x244   : > { %3702 = vmatmul.mubr.bf16.gmra.mrb[80].mxu0 %v11437_v55  ;;  %3799 = vmatmul.mubr.bf16.gmra.mrb[80].mxu1 %v11439_v56 }
 0x245   : > { %3709 = vmatprep.mubr.bf16.mxu0 %v11461_v43  ;;  %3806 = vmatprep.mubr.bf16.mxu1 %v11463_v44 }
 0x24c   : > { %3710 = vmatmul.mubr.bf16.gmra.mrb[84].mxu0 %v11457_v41  ;;  %3807 = vmatmul.mubr.bf16.gmra.mrb[84].mxu1 %v11459_v42 }
 0x24d   : > { %3717 = vmatprep.mubr.bf16.mxu0 %v2910_v37  ;;  %3814 = vmatprep.mubr.bf16.mxu1 %v2912_v38 }
 0x254   : > { %3718 = vmatmul.mubr.bf16.gmra.mrb[88].mxu0 %v11477_v31  ;;  %3815 = vmatmul.mubr.bf16.gmra.mrb[88].mxu1 %v11479_v32 }
 0x255   : > { %3725 = vmatprep.mubr.bf16.mxu0 %v2914_v29  ;;  %3822 = vmatprep.mubr.bf16.mxu1 %v2916_v30 }
 0x25c   : > { %3726 = vmatmul.mubr.bf16.gmra.mrb[92].mxu0 %v2913_v28  ;;  %3823 = vmatmul.mubr.bf16.gmra.mrb[92].mxu1 %v2915_v23 }
 0x25d   : > { %4063 = vmatprep.mubr.bf16.mxu0 %v10300_v24  ;;  %4176 = vmatprep.mubr.bf16.mxu1 %v10300_v24 }
 0x2b7   : > { %v8297_v11 = vpop.f32.mrb[32].mxu0  ;;  %v8361_v12 = vpop.f32.mrb[32].mxu1 }
 0x2b8   : > { %v8298_v0 = vpop.f32.mrb[33].mxu0  ;;  %v8362_v1 = vpop.f32.mrb[33].mxu1 }
 0x2b9   : > { %v8299_v2 = vadd.f32 %v8298_v0, %v8297_v11  ;;  %v8363_v55 = vadd.f32 %v8362_v1, %v8361_v12  ;;  %v8300_v56 = vpop.f32.mrb[34].mxu0  ;;  %v8364_v57 = vpop.f32.mrb[34].mxu1 }
 0x2ba   : > { %v8301_v58 = vpop.f32.mrb[35].mxu0  ;;  %v8365_v41 = vpop.f32.mrb[35].mxu1 }
 0x2bb   : > { %v3215_v42 = vadd.f32 %v8299_v2, %v11540_v63  ;;  %v8302_v43 = vadd.f32 %v8301_v58, %v8300_v56  ;;  %v8366_v44 = vadd.f32 %v8365_v41, %v8364_v57 }
 0x2bd   : > { %v11552_v31 = vadd.f32 %v8363_v55, %v3215_v42  ;;  %v3218_v32 = vadd.f32 %v8302_v43, %v11540_v63 }
 0x2bf   : > { %7454 = vst.msk [vmem:[%s11550_s25] sm:$0xff] %vm3993_vm2, %v11552_v31  ;;  %v11558_v37 = vadd.f32 %v8366_v44, %v3218_v32  ;;  %v8303_v38 = vpop.f32.mrb[36].mxu0  ;;  %v8367_v39 = vpop.f32.mrb[36].mxu1 }
 0x2c0   : > { %v8304_v40 = vpop.f32.mrb[37].mxu0  ;;  %v8368_v45 = vpop.f32.mrb[37].mxu1 }
 0x2c1   : > { %7455 = vst.msk [vmem:[%s11550_s25 + $0x8] sm:$0xff] %vm3993_vm2, %v11558_v37  ;;  %v8305_v46 = vadd.f32 %v8304_v40, %v8303_v38  ;;  %v8369_v47 = vadd.f32 %v8368_v45, %v8367_v39  ;;  %v8306_v48 = vpop.f32.mrb[38].mxu0  ;;  %v8370_v49 = vpop.f32.mrb[38].mxu1 }
 0x2c2   : > { %v8307_v50 = vpop.f32.mrb[39].mxu0  ;;  %v8371_v59 = vpop.f32.mrb[39].mxu1 }
 0x2c3   : > { %v3223_v60 = vadd.f32 %v8305_v46, %v11540_v63  ;;  %v8308_v61 = vadd.f32 %v8307_v50, %v8306_v48  ;;  %v8372_v62 = vadd.f32 %v8371_v59, %v8370_v49 }
 0x2c5   : > { %v11564_v3 = vadd.f32 %v8369_v47, %v3223_v60  ;;  %v3226_v4 = vadd.f32 %v8308_v61, %v11540_v63 }
 0x2c7   : > { %7456 = vst.msk [vmem:[%s11550_s25 + $0x10] sm:$0xff] %vm3993_vm2, %v11564_v3  ;;  %v11570_v5 = vadd.f32 %v8372_v62, %v3226_v4  ;;  %v8309_v6 = vpop.f32.mrb[40].mxu0  ;;  %v8373_v7 = vpop.f32.mrb[40].mxu1 }
 0x2c8   : > { %v8310_v8 = vpop.f32.mrb[41].mxu0  ;;  %v8374_v13 = vpop.f32.mrb[41].mxu1 }
 0x2c9   : > { %7457 = vst.msk [vmem:[%s11550_s25 + $0x18] sm:$0xff] %vm3993_vm2, %v11570_v5  ;;  %v8311_v14 = vadd.f32 %v8310_v8, %v8309_v6  ;;  %v8375_v15 = vadd.f32 %v8374_v13, %v8373_v7  ;;  %v8312_v19 = vpop.f32.mrb[42].mxu0  ;;  %v8376_v27 = vpop.f32.mrb[42].mxu1 }
 0x2ca   : > { %v8313_v22 = vpop.f32.mrb[43].mxu0  ;;  %v8377_v28 = vpop.f32.mrb[43].mxu1 }
 0x2cb   : > { %v3231_v23 = vadd.f32 %v8311_v14, %v11540_v63  ;;  %v8314_v29 = vadd.f32 %v8313_v22, %v8312_v19  ;;  %v8378_v30 = vadd.f32 %v8377_v28, %v8376_v27 }
 0x2cd   : > { %v11576_v25 = vadd.f32 %v8375_v15, %v3231_v23  ;;  %v3234_v26 = vadd.f32 %v8314_v29, %v11540_v63 }
 0x2cf   : > { %7458 = vst.msk [vmem:[%s11550_s25 + $0x20] sm:$0xff] %vm3993_vm2, %v11576_v25  ;;  %v11585_v52 = vadd.f32 %v8378_v30, %v3234_v26  ;;  %v8315_v53 = vpop.f32.mrb[44].mxu0  ;;  %v8379_v54 = vpop.f32.mrb[44].mxu1 }
 0x2d0   : > { %v8316_v34 = vpop.f32.mrb[45].mxu0  ;;  %v8380_v35 = vpop.f32.mrb[45].mxu1 }
 0x2d1   : > { %7459 = vst.msk [vmem:[%s11550_s25 + $0x28] sm:$0xff] %vm3993_vm2, %v11585_v52  ;;  %v8317_v36 = vadd.f32 %v8316_v34, %v8315_v53  ;;  %v8381_v9 = vadd.f32 %v8380_v35, %v8379_v54  ;;  %v8318_v10 = vpop.f32.mrb[46].mxu0  ;;  %v8382_v11 = vpop.f32.mrb[46].mxu1 }
 0x2d2   : > { %v8319_v12 = vpop.f32.mrb[47].mxu0  ;;  %v8383_v0 = vpop.f32.mrb[47].mxu1 }
 0x2d3   : > { %v3239_v1 = vadd.f32 %v8317_v36, %v11540_v63  ;;  %v8320_v2 = vadd.f32 %v8319_v12, %v8318_v10  ;;  %v8384_v55 = vadd.f32 %v8383_v0, %v8382_v11 }
 0x2d5   : > { %v11594_v56 = vadd.f32 %v8381_v9, %v3239_v1  ;;  %v3242_v57 = vadd.f32 %v8320_v2, %v11540_v63 }
 0x2d7   : > { %7460 = vst.msk [vmem:[%s11550_s25 + $0x30] sm:$0xff] %vm3993_vm2, %v11594_v56  ;;  %v11600_v58 = vadd.f32 %v8384_v55, %v3242_v57  ;;  %v8321_v41 = vpop.f32.mrb[48].mxu0  ;;  %v8385_v42 = vpop.f32.mrb[48].mxu1 }
 0x2d8   : > { %v8322_v43 = vpop.f32.mrb[49].mxu0  ;;  %v8386_v44 = vpop.f32.mrb[49].mxu1 }
 0x2d9   : > { %7461 = vst.msk [vmem:[%s11550_s25 + $0x38] sm:$0xff] %vm3993_vm2, %v11600_v58  ;;  %v8323_v32 = vadd.f32 %v8322_v43, %v8321_v41  ;;  %v8387_v38 = vadd.f32 %v8386_v44, %v8385_v42  ;;  %v8324_v39 = vpop.f32.mrb[50].mxu0  ;;  %v8388_v40 = vpop.f32.mrb[50].mxu1 }
 0x2da   : > { %v8325_v45 = vpop.f32.mrb[51].mxu0  ;;  %v8389_v46 = vpop.f32.mrb[51].mxu1 }
 0x2db   : > { %v3247_v47 = vadd.f32 %v8323_v32, %v11540_v63  ;;  %v8326_v48 = vadd.f32 %v8325_v45, %v8324_v39  ;;  %v8390_v49 = vadd.f32 %v8389_v46, %v8388_v40 }
 0x2dd   : > { %v11606_v50 = vadd.f32 %v8387_v38, %v3247_v47  ;;  %v3250_v59 = vadd.f32 %v8326_v48, %v11540_v63 }
 0x2df   : > { %7462 = vst.msk [vmem:[%s11550_s25 + $0x40] sm:$0xff] %vm3993_vm2, %v11606_v50  ;;  %v11612_v60 = vadd.f32 %v8390_v49, %v3250_v59  ;;  %v8327_v61 = vpop.f32.mrb[52].mxu0  ;;  %v8391_v62 = vpop.f32.mrb[52].mxu1 }
 0x2e0   : > { %v8328_v4 = vpop.f32.mrb[53].mxu0  ;;  %v8392_v6 = vpop.f32.mrb[53].mxu1 }
 0x2e1   : > { %7463 = vst.msk [vmem:[%s11550_s25 + $0x48] sm:$0xff] %vm3993_vm2, %v11612_v60  ;;  %v8329_v7 = vadd.f32 %v8328_v4, %v8327_v61  ;;  %v8393_v8 = vadd.f32 %v8392_v6, %v8391_v62  ;;  %v8330_v13 = vpop.f32.mrb[54].mxu0  ;;  %v8394_v14 = vpop.f32.mrb[54].mxu1  ;;  %v11653_v6 = vld [vmem:[%s13235_s7] ss:$0 sm:$0xff] }
 0x2e2   : > { %v8331_v15 = vpop.f32.mrb[55].mxu0  ;;  %v8395_v19 = vpop.f32.mrb[55].mxu1 }
 0x2e3   : > { %v3255_v27 = vadd.f32 %v8329_v7, %v11540_v63  ;;  %v8332_v22 = vadd.f32 %v8331_v15, %v8330_v13  ;;  %v8396_v28 = vadd.f32 %v8395_v19, %v8394_v14 }
 0x2e5   : > { %v11618_v23 = vadd.f32 %v8393_v8, %v3255_v27  ;;  %v3258_v29 = vadd.f32 %v8332_v22, %v11540_v63 }
 0x2e7   : > { %7464 = vst.msk [vmem:[%s11550_s25 + $0x50] sm:$0xff] %vm3993_vm2, %v11618_v23  ;;  %v11624_v30 = vadd.f32 %v8396_v28, %v3258_v29  ;;  %v8333_v26 = vpop.f32.mrb[56].mxu0  ;;  %v8397_v51 = vpop.f32.mrb[56].mxu1 }
 0x2e8   : > { %v8334_v53 = vpop.f32.mrb[57].mxu0  ;;  %v8398_v54 = vpop.f32.mrb[57].mxu1 }
 0x2e9   : > { %7465 = vst.msk [vmem:[%s11550_s25 + $0x58] sm:$0xff] %vm3993_vm2, %v11624_v30  ;;  %v8335_v33 = vadd.f32 %v8334_v53, %v8333_v26  ;;  %v8399_v34 = vadd.f32 %v8398_v54, %v8397_v51  ;;  %v8336_v35 = vpop.f32.mrb[58].mxu0  ;;  %v8400_v36 = vpop.f32.mrb[58].mxu1 }
 0x2ea   : > { %v8337_v9 = vpop.f32.mrb[59].mxu0  ;;  %v8401_v10 = vpop.f32.mrb[59].mxu1 }
 0x2eb   : > { %v3263_v11 = vadd.f32 %v8335_v33, %v11540_v63  ;;  %v8338_v12 = vadd.f32 %v8337_v9, %v8336_v35  ;;  %v8402_v0 = vadd.f32 %v8401_v10, %v8400_v36 }
 0x2ed   : > { %v11630_v1 = vadd.f32 %v8399_v34, %v3263_v11  ;;  %v3266_v2 = vadd.f32 %v8338_v12, %v11540_v63 }
 0x2ef   : > { %7466 = vst.msk [vmem:[%s11550_s25 + $0x60] sm:$0xff] %vm3993_vm2, %v11630_v1  ;;  %v11636_v55 = vadd.f32 %v8402_v0, %v3266_v2  ;;  %v8339_v57 = vpop.f32.mrb[60].mxu0  ;;  %v8403_v41 = vpop.f32.mrb[60].mxu1 }
 0x2f0   : > { %v8340_v42 = vpop.f32.mrb[61].mxu0  ;;  %v8404_v43 = vpop.f32.mrb[61].mxu1 }
 0x2f1   : > { %7467 = vst.msk [vmem:[%s11550_s25 + $0x68] sm:$0xff] %vm3993_vm2, %v11636_v55  ;;  %v8341_v44 = vadd.f32 %v8340_v42, %v8339_v57  ;;  %v8405_v32 = vadd.f32 %v8404_v43, %v8403_v41  ;;  %v8342_v38 = vpop.f32.mrb[62].mxu0  ;;  %v8406_v39 = vpop.f32.mrb[62].mxu1 }
 0x2f2   : > { %v8343_v40 = vpop.f32.mrb[63].mxu0  ;;  %v8407_v45 = vpop.f32.mrb[63].mxu1 }
 0x2f3   : > { %v3271_v46 = vadd.f32 %v8341_v44, %v11540_v63  ;;  %v8344_v47 = vadd.f32 %v8343_v40, %v8342_v38  ;;  %v8408_v48 = vadd.f32 %v8407_v45, %v8406_v39 }
 0x2f5   : > { %v11642_v49 = vadd.f32 %v8405_v32, %v3271_v46  ;;  %v3274_v59 = vadd.f32 %v8344_v47, %v11540_v63 }
 0x2f7   : > { %7468 = vst.msk [vmem:[%s11550_s25 + $0x70] sm:$0xff] %vm3993_vm2, %v11642_v49  ;;  %v11648_v61 = vadd.f32 %v8408_v48, %v3274_v59  ;;  %v8425_v62 = vpop.f32.mrb[64].mxu0  ;;  %v8489_v4 = vpop.f32.mrb[64].mxu1 }
 0x2f8   : > { %v8426_v7 = vpop.f32.mrb[65].mxu0  ;;  %v8490_v8 = vpop.f32.mrb[65].mxu1 }
 0x2f9   : > { %7469 = vst.msk [vmem:[%s11550_s25 + $0x78] sm:$0xff] %vm3993_vm2, %v11648_v61  ;;  %v8427_v13 = vadd.f32 %v8426_v7, %v8425_v62  ;;  %v8491_v63 = vadd.f32 %v8490_v8, %v8489_v4  ;;  %v8428_v14 = vpop.f32.mrb[66].mxu0  ;;  %v8492_v15 = vpop.f32.mrb[66].mxu1  ;;  %s11678_s25 = scalar_lea.vmem %s13229_s1, %s11543_s20 }
 0x2fa   : > { %v8429_v19 = vpop.f32.mrb[67].mxu0  ;;  %v8493_v27 = vpop.f32.mrb[67].mxu1 }
 0x2fb   : > { %v3672_v22 = vadd.f32 %v8427_v13, %v11653_v6  ;;  %v8430_v28 = vadd.f32 %v8429_v19, %v8428_v14  ;;  %v8494_v29 = vadd.f32 %v8493_v27, %v8492_v15  ;;  %v3831_v19 = vld [vmem:[%s11678_s25] sm:$0xff] }
 0x2fd   : > { %v3769_v26 = vadd.f32 %v8491_v63, %v3672_v22  ;;  %v3675_v51 = vadd.f32 %v8430_v28, %v11653_v6 }
 0x2ff   : > { %v3847_v53 = vmul.f32 0.5, %v3769_v26  ;;  %7470 = vst.msk [vmem:[%s11663_s19] sm:$0xff] %vm3993_vm2, %v3769_v26  ;;  %v3772_v54 = vadd.f32 %v8494_v29, %v3675_v51  ;;  %v8431_v33 = vpop.f32.mrb[68].mxu0  ;;  %v8495_v34 = vpop.f32.mrb[68].mxu1  ;;  %v3832_v51 = vld [vmem:[%s11678_s25 + $0x8] sm:$0xff] }
 0x300   : > { %v8432_v35 = vpop.f32.mrb[69].mxu0  ;;  %v8496_v36 = vpop.f32.mrb[69].mxu1 }
 0x301   : > { %v3863_v9 = vmul.f32 1.442695, %v3847_v53  ;;  %v3848_v10 = vmul.f32 0.5, %v3772_v54  ;;  %7471 = vst.msk [vmem:[%s11663_s19 + $0x8] sm:$0xff] %vm3993_vm2, %v3772_v54  ;;  %v8433_v11 = vadd.f32 %v8432_v35, %v8431_v33  ;;  %v8497_v12 = vadd.f32 %v8496_v36, %v8495_v34  ;;  %v8434_v0 = vpop.f32.mrb[70].mxu0  ;;  %v8498_v2 = vpop.f32.mrb[70].mxu1 }
 0x302   : > { %v8435_v57 = vpop.f32.mrb[71].mxu0  ;;  %v8499_v41 = vpop.f32.mrb[71].mxu1 }
 0x303   : > { %9811 = vpow2.f32 %v3863_v9  ;;  %v3865_v42 = vmul.f32 1.442695, %v3848_v10  ;;  %v3680_v43 = vadd.f32 %v8433_v11, %v11653_v6  ;;  %v8436_v44 = vadd.f32 %v8435_v57, %v8434_v0 }
 0x304   : > { %v8500_v32 = vadd.f32 %v8499_v41, %v8498_v2 }
 0x305   : > { %9813 = vpow2.f32 %v3865_v42  ;;  %v3777_v38 = vadd.f32 %v8497_v12, %v3680_v43  ;;  %v3683_v39 = vadd.f32 %v8436_v44, %v11653_v6 }
 0x307   : > { %v3849_v40 = vmul.f32 0.5, %v3777_v38  ;;  %7472 = vst.msk [vmem:[%s11663_s19 + $0x10] sm:$0xff] %vm3993_vm2, %v3777_v38  ;;  %v3780_v45 = vadd.f32 %v8500_v32, %v3683_v39  ;;  %v8437_v46 = vpop.f32.mrb[72].mxu0  ;;  %v8501_v47 = vpop.f32.mrb[72].mxu1 }
 0x308   : > { %v8438_v48 = vpop.f32.mrb[73].mxu0  ;;  %v8502_v59 = vpop.f32.mrb[73].mxu1 }
 0x309   : > { %v3867_v62 = vmul.f32 1.442695, %v3849_v40  ;;  %v3850_v4 = vmul.f32 0.5, %v3780_v45  ;;  %7473 = vst.msk [vmem:[%s11663_s19 + $0x18] sm:$0xff] %vm3993_vm2, %v3780_v45  ;;  %v8439_v7 = vadd.f32 %v8438_v48, %v8437_v46  ;;  %v8503_v8 = vadd.f32 %v8502_v59, %v8501_v47  ;;  %v8440_v13 = vpop.f32.mrb[74].mxu0  ;;  %v8504_v63 = vpop.f32.mrb[74].mxu1 }
 0x30a   : > { %v8441_v14 = vpop.f32.mrb[75].mxu0  ;;  %v8505_v15 = vpop.f32.mrb[75].mxu1  ;;  %v3833_v48 = vld [vmem:[%s11678_s25 + $0x10] sm:$0xff] }
 0x30b   : > { %9815 = vpow2.f32 %v3867_v62  ;;  %v3869_v27 = vmul.f32 1.442695, %v3850_v4  ;;  %v3688_v22 = vadd.f32 %v8439_v7, %v11653_v6  ;;  %v8442_v28 = vadd.f32 %v8441_v14, %v8440_v13  ;;  %v9491_v4 = vld [vmem:[%s13238_s10] ss:$28 sps:$4 sm:$0xff]  }
 0x30c   : > { %v8506_v29 = vadd.f32 %v8505_v15, %v8504_v63  ;;  %v3834_v13 = vld [vmem:[%s11678_s25 + $0x18] sm:$0xff]  ;;  %v9502_v14 = vld [vmem:[%s13238_s10 + $0x44] ss:$28 sps:$4 sm:$0xff]  }
 0x30d   : > { %v9812_v26 = vpop.eup %9811  ;;  %9817 = vpow2.f32 %v3869_v27  ;;  %v3785_v53 = vadd.f32 %v8503_v8, %v3688_v22  ;;  %v3691_v54 = vadd.f32 %v8442_v28, %v11653_v6  ;;  %v9499_v63 = vld [vmem:[%s13238_s10 + $0x3c] ss:$28 sps:$4 sm:$0xff]  }
 0x30e   : > { %v3895_v33 = vmul.f32 %v9812_v26, %v3831_v19  ;;  %v9497_v19 = vld [vmem:[%s13238_s10 + $0x38] ss:$28 sps:$4 sm:$0xff]  }
 0x30f   : > { %v9814_v34 = vpop.eup %9813  ;;  %v3851_v35 = vmul.f32 0.5, %v3785_v53  ;;  %7474 = vst.msk [vmem:[%s11663_s19 + $0x20] sm:$0xff] %vm3993_vm2, %v3785_v53  ;;  %v3788_v36 = vadd.f32 %v8506_v29, %v3691_v54  ;;  %v8443_v9 = vpop.f32.mrb[76].mxu0 }
 0x310   : > { %v8507_v10 = vpop.f32.mrb[76].mxu1  ;;  %v3896_v11 = vmul.f32 %v9814_v34, %v3832_v51  ;;  %v8444_v12 = vpop.f32.mrb[77].mxu0  ;;  %v3911_v32 = vadd.f32 %v3895_v33, %v11552_v31  ;;  %v9494_v31 = vld [vmem:[%s13238_s10 + $0x8] ss:$28 sps:$4 sm:$0xff]   ;;  %v9500_v51 = vld [vmem:[%s13238_s10 + $0x40] ss:$28 sps:$4 sm:$0xff]  }
 0x311   : > { %v8508_v0 = vpop.f32.mrb[77].mxu1  ;;  %v3871_v2 = vmul.f32 1.442695, %v3851_v35  ;;  %v3852_v57 = vmul.f32 0.5, %v3788_v36  ;;  %7475 = vst.msk [vmem:[%s11663_s19 + $0x28] sm:$0xff] %vm3993_vm2, %v3788_v36  ;;  %v8445_v41 = vadd.f32 %v8444_v12, %v8443_v9  ;;  %v8446_v43 = vpop.f32.mrb[78].mxu0 }
 0x312   : > { %v8509_v42 = vadd.f32 %v8508_v0, %v8507_v10  ;;  %v8510_v44 = vpop.f32.mrb[78].mxu1  ;;  %v3912_v38 = vadd.f32 %v3896_v11, %v11558_v37  ;;  %v8447_v39 = vpop.f32.mrb[79].mxu0  ;;  %v9505_v34 = vld [vmem:[%s13238_s10 + $0x74] ss:$28 sps:$4 sm:$0xff]   ;;  %v9508_v35 = vld [vmem:[%s13238_s10 + $0x7c] ss:$28 sps:$4 sm:$0xff]  }
 0x313   : > { %v8511_v40 = vpop.f32.mrb[79].mxu1  ;;  %9819 = vpow2.f32 %v3871_v2  ;;  %v3873_v45 = vmul.f32 1.442695, %v3852_v57  ;;  %v3696_v46 = vadd.f32 %v8445_v41, %v11653_v6  ;;  %v8448_v47 = vadd.f32 %v8447_v39, %v8446_v43 }
 0x314   : > { %v8512_v59 = vadd.f32 %v8511_v40, %v8510_v44  ;;  %v3927_v62 = vpack.c.bf16 %v3912_v38, %v3911_v32  ;;  %v3835_v38 = vld [vmem:[%s11678_s25 + $0x20] sm:$0xff] }
 0x315   : > { %v9816_v37 = vpop.eup %9815  ;;  %9821 = vpow2.f32 %v3873_v45  ;;  %v3793_v7 = vadd.f32 %v8509_v42, %v3696_v46  ;;  %v3699_v8 = vadd.f32 %v8448_v47, %v11653_v6  ;;  %v9503_v45 = vld [vmem:[%s13238_s10 + $0x70] ss:$28 sps:$4 sm:$0xff]  }
 0x316   : > { %7926 = vmatmul.mubr.msk.bf16.vlgmr.msra.gmra.mrb[96].mxu0 %vm3993_vm2, %v3927_v62  ;;  %7935 = vmatmul.mubr.msk.bf16.vlgmr.msra.gmra.mrb[96].mxu1 %vm3993_vm2, %v3927_v62  ;;  %v3897_v15 = vmul.f32 %v9816_v37, %v3833_v48  ;;  %v3836_v48 = vld [vmem:[%s11678_s25 + $0x28] sm:$0xff]  ;;  %v9514_v62 = vld [vmem:[%s13238_s10 + $0xb4] ss:$28 sps:$4 sm:$0xff]  }
 0x317   : > { %v9818_v27 = vpop.eup %9817  ;;  %v3853_v22 = vmul.f32 0.5, %v3793_v7  ;;  %7476 = vst.msk [vmem:[%s11663_s19 + $0x30] sm:$0xff] %vm3993_vm2, %v3793_v7  ;;  %v3796_v28 = vadd.f32 %v8512_v59, %v3699_v8  ;;  %v8449_v29 = vpop.f32.mrb[80].mxu0  ;;  %4073 = vmatprep.mubr.bf16.mxu0 %v10300_v24  ;;  %4186 = vmatprep.mubr.bf16.mxu1 %v10300_v24  ;;  %v9511_v59 = vld [vmem:[%s13238_s10 + $0xac] ss:$28 sps:$4 sm:$0xff]  }
 0x318   : > { %v8513_v26 = vpop.f32.mrb[80].mxu1  ;;  %v8450_v53 = vpop.f32.mrb[81].mxu0  ;;  %v3898_v33 = vmul.f32 %v9818_v27, %v3834_v13  ;;  %5799 = vmatpush1.bf16.msra.mxu0 %v9491_v4  ;;  %6025 = vmatpush1.bf16.msra.mxu1 %v9494_v31  ;;  %v3913_v41 = vadd.f32 %v3897_v15, %v11564_v3  ;;  %v9506_v3 = vld [vmem:[%s13238_s10 + $0x78] ss:$28 sps:$4 sm:$0xff]   ;;  %v9509_v31 = vld [vmem:[%s13238_s10 + $0xa8] ss:$28 sps:$4 sm:$0xff]  }
 0x319   : > { %v8514_v54 = vpop.f32.mrb[81].mxu1  ;;  %v3875_v36 = vmul.f32 1.442695, %v3853_v22  ;;  %v3854_v9 = vmul.f32 0.5, %v3796_v28  ;;  %7477 = vst.msk [vmem:[%s11663_s19 + $0x38] sm:$0xff] %vm3993_vm2, %v3796_v28  ;;  %v8451_v10 = vadd.f32 %v8450_v53, %v8449_v29  ;;  %v8452_v12 = vpop.f32.mrb[82].mxu0  ;;  %5800 = vmatprep.subr.bf16.mxu0 %v9499_v63  ;;  %6026 = vmatprep.subr.bf16.mxu1 %v9502_v14 }
 0x31a   : > { %v8515_v11 = vadd.f32 %v8514_v54, %v8513_v26  ;;  %v8516_v0 = vpop.f32.mrb[82].mxu1  ;;  %v8453_v2 = vpop.f32.mrb[83].mxu0  ;;  %v3914_v42 = vadd.f32 %v3898_v33, %v11570_v5  ;;  %v9512_v14 = vld [vmem:[%s13238_s10 + $0xb0] ss:$28 sps:$4 sm:$0xff]   ;;  %v9517_v22 = vld [vmem:[%s13238_s10 + $0xe4] ss:$28 sps:$4 sm:$0xff]  }
 0x31b   : > { %v8517_v57 = vpop.f32.mrb[83].mxu1  ;;  %9823 = vpow2.f32 %v3875_v36  ;;  %v3877_v43 = vmul.f32 1.442695, %v3854_v9  ;;  %v3704_v44 = vadd.f32 %v8451_v10, %v11653_v6  ;;  %v8454_v32 = vadd.f32 %v8453_v2, %v8452_v12  ;;  %v9520_v28 = vld [vmem:[%s13238_s10 + $0xec] ss:$28 sps:$4 sm:$0xff]  }
 0x31c   : > { %v8518_v39 = vadd.f32 %v8517_v57, %v8516_v0  ;;  %v3928_v40 = vpack.c.bf16 %v3914_v42, %v3913_v41  ;;  %5801 = vmatpush1.bf16.msra.mxu0 %v9497_v19  ;;  %6027 = vmatpush1.bf16.msra.mxu1 %v9500_v51  ;;  %v3837_v0 = vld [vmem:[%s11678_s25 + $0x30] sm:$0xff]  ;;  %v9515_v41 = vld [vmem:[%s13238_s10 + $0xe0] ss:$28 sps:$4 sm:$0xff]  }
 0x31d   : > { %v9820_v5 = vpop.eup %9819  ;;  %9825 = vpow2.f32 %v3877_v43  ;;  %v3801_v46 = vadd.f32 %v8515_v11, %v3704_v44  ;;  %v3707_v47 = vadd.f32 %v8454_v32, %v11653_v6  ;;  %5802 = vmatprep.subr.bf16.mxu0 %v9505_v34  ;;  %6028 = vmatprep.subr.bf16.mxu1 %v9508_v35  ;;  %v3838_v44 = vld [vmem:[%s11678_s25 + $0x38] sm:$0xff] }
 0x31e   : > { %7927 = vmatmul.mubr.msk.bf16.gmra.mrb[100].mxu0 %vm3993_vm2, %v3928_v40  ;;  %7936 = vmatmul.mubr.msk.bf16.gmra.mrb[100].mxu1 %vm3993_vm2, %v3928_v40  ;;  %v3899_v4 = vmul.f32 %v9820_v5, %v3835_v38  ;;  %v9523_v32 = vld [vmem:[%s13238_s10 + $0x11c] ss:$28 sps:$4 sm:$0xff]   ;;  %v9526_v38 = vld [vmem:[%s13238_s10 + $0x124] ss:$28 sps:$4 sm:$0xff]  }
 0x31f   : > { %v9822_v37 = vpop.eup %9821  ;;  %v3855_v7 = vmul.f32 0.5, %v3801_v46  ;;  %7478 = vst.msk [vmem:[%s11663_s19 + $0x40] sm:$0xff] %vm3993_vm2, %v3801_v46  ;;  %v3804_v8 = vadd.f32 %v8518_v39, %v3707_v47  ;;  %v8455_v13 = vpop.f32.mrb[84].mxu0  ;;  %4083 = vmatprep.mubr.bf16.mxu0 %v10300_v24  ;;  %4196 = vmatprep.mubr.bf16.mxu1 %v10300_v24  ;;  %v9521_v40 = vld [vmem:[%s13238_s10 + $0x118] ss:$28 sps:$4 sm:$0xff]  }
 0x320   : > { %v8519_v63 = vpop.f32.mrb[84].mxu1  ;;  %v8456_v15 = vpop.f32.mrb[85].mxu0  ;;  %v3900_v27 = vmul.f32 %v9822_v37, %v3836_v48  ;;  %5803 = vmatpush1.bf16.msra.mxu0 %v9503_v45  ;;  %6029 = vmatpush1.bf16.msra.mxu1 %v9506_v3  ;;  %v3915_v36 = vadd.f32 %v3899_v4, %v11576_v25  ;;  %v9518_v25 = vld [vmem:[%s13238_s10 + $0xe8] ss:$28 sps:$4 sm:$0xff]   ;;  %v9524_v48 = vld [vmem:[%s13238_s10 + $0x120] ss:$28 sps:$4 sm:$0xff]  }
 0x321   : > { %v8520_v19 = vpop.f32.mrb[85].mxu1  ;;  %v3879_v29 = vmul.f32 1.442695, %v3855_v7  ;;  %v3856_v26 = vmul.f32 0.5, %v3804_v8  ;;  %7479 = vst.msk [vmem:[%s11663_s19 + $0x48] sm:$0xff] %vm3993_vm2, %v3804_v8  ;;  %v8457_v51 = vadd.f32 %v8456_v15, %v8455_v13  ;;  %v8458_v54 = vpop.f32.mrb[86].mxu0  ;;  %5804 = vmatprep.subr.bf16.mxu0 %v9511_v59  ;;  %6030 = vmatprep.subr.bf16.mxu1 %v9514_v62 }
 0x322   : > { %v8521_v53 = vadd.f32 %v8520_v19, %v8519_v63  ;;  %v8522_v33 = vpop.f32.mrb[86].mxu1  ;;  %v8459_v34 = vpop.f32.mrb[87].mxu0  ;;  %v3916_v9 = vadd.f32 %v3900_v27, %v11585_v52  ;;  %v9532_v37 = vld [vmem:[%s13238_s10 + $0x15c] ss:$28 sps:$4 sm:$0xff]  }
 0x323   : > { %v8523_v35 = vpop.f32.mrb[87].mxu1  ;;  %9827 = vpow2.f32 %v3879_v29  ;;  %v3881_v10 = vmul.f32 1.442695, %v3856_v26  ;;  %v3712_v11 = vadd.f32 %v8457_v51, %v11653_v6  ;;  %v8460_v12 = vadd.f32 %v8459_v34, %v8458_v54  ;;  %v9527_v34 = vld [vmem:[%s13238_s10 + $0x150] ss:$28 sps:$4 sm:$0xff]  }
 0x324   : > { %v8524_v2 = vadd.f32 %v8523_v35, %v8522_v33  ;;  %v3929_v57 = vpack.c.bf16 %v3916_v9, %v3915_v36  ;;  %5805 = vmatpush1.bf16.msra.mxu0 %v9509_v31  ;;  %6031 = vmatpush1.bf16.msra.mxu1 %v9512_v14  ;;  %v9529_v31 = vld [vmem:[%s13238_s10 + $0x154] ss:$28 sps:$4 sm:$0xff]   ;;  %v3840_v9 = vld [vmem:[%s11678_s25 + $0x48] sm:$0xff] }
 0x325   : > { %v9824_v52 = vpop.eup %9823  ;;  %9829 = vpow2.f32 %v3881_v10  ;;  %v3809_v42 = vadd.f32 %v8521_v53, %v3712_v11  ;;  %v3715_v43 = vadd.f32 %v8460_v12, %v11653_v6  ;;  %5806 = vmatprep.subr.bf16.mxu0 %v9517_v22  ;;  %6032 = vmatprep.subr.bf16.mxu1 %v9520_v28  ;;  %v3839_v53 = vld [vmem:[%s11678_s25 + $0x40] sm:$0xff]  ;;  %v9535_v10 = vld [vmem:[%s13238_s10 + $0x18c] ss:$28 sps:$4 sm:$0xff]   ;;  %v9538_v11 = vld [vmem:[%s13238_s10 + $0x194] ss:$28 sps:$4 sm:$0xff]  }
 0x326   : > { %7928 = vmatmul.mubr.msk.bf16.gmra.mrb[104].mxu0 %vm3993_vm2, %v3929_v57  ;;  %7937 = vmatmul.mubr.msk.bf16.gmra.mrb[104].mxu1 %vm3993_vm2, %v3929_v57  ;;  %v3901_v39 = vmul.f32 %v9824_v52, %v3837_v0  ;;  %v9533_v0 = vld [vmem:[%s13238_s10 + $0x188] ss:$28 sps:$4 sm:$0xff]  }
 0x327   : > { %v9826_v45 = vpop.eup %9825  ;;  %v3857_v3 = vmul.f32 0.5, %v3809_v42  ;;  %7480 = vst.msk [vmem:[%s11663_s19 + $0x50] sm:$0xff] %vm3993_vm2, %v3809_v42  ;;  %v3812_v5 = vadd.f32 %v8524_v2, %v3715_v43  ;;  %v8461_v46 = vpop.f32.mrb[88].mxu0  ;;  %4093 = vmatprep.mubr.bf16.mxu0 %v10300_v24  ;;  %4206 = vmatprep.mubr.bf16.mxu1 %v10300_v24  ;;  %v9536_v42 = vld [vmem:[%s13238_s10 + $0x190] ss:$28 sps:$4 sm:$0xff]  }
 0x328   : > { %v8525_v47 = vpop.f32.mrb[88].mxu1  ;;  %v8462_v59 = vpop.f32.mrb[89].mxu0  ;;  %v3902_v4 = vmul.f32 %v9826_v45, %v3838_v44  ;;  %5807 = vmatpush1.bf16.msra.mxu0 %v9515_v41  ;;  %6033 = vmatpush1.bf16.msra.mxu1 %v9518_v25  ;;  %v3917_v22 = vadd.f32 %v3901_v39, %v11594_v56  ;;  %v9530_v56 = vld [vmem:[%s13238_s10 + $0x158] ss:$28 sps:$4 sm:$0xff]   ;;  %v9544_v39 = vld [vmem:[%s13238_s10 + $0x1cc] ss:$28 sps:$4 sm:$0xff]  }
 0x329   : > { %v8526_v62 = vpop.f32.mrb[89].mxu1  ;;  %v3883_v7 = vmul.f32 1.442695, %v3857_v3  ;;  %v3858_v8 = vmul.f32 0.5, %v3812_v5  ;;  %7481 = vst.msk [vmem:[%s11663_s19 + $0x58] sm:$0xff] %vm3993_vm2, %v3812_v5  ;;  %v8463_v13 = vadd.f32 %v8462_v59, %v8461_v46  ;;  %v8464_v14 = vpop.f32.mrb[90].mxu0  ;;  %5808 = vmatprep.subr.bf16.mxu0 %v9523_v32  ;;  %6034 = vmatprep.subr.bf16.mxu1 %v9526_v38 }
 0x32a   : > { %v8527_v63 = vadd.f32 %v8526_v62, %v8525_v47  ;;  %v8528_v15 = vpop.f32.mrb[90].mxu1  ;;  %v8465_v19 = vpop.f32.mrb[91].mxu0  ;;  %v3918_v28 = vadd.f32 %v3902_v4, %v11600_v58  ;;  %v9541_v38 = vld [vmem:[%s13238_s10 + $0x1c4] ss:$28 sps:$4 sm:$0xff]  }
 0x32b   : > { %v8529_v27 = vpop.f32.mrb[91].mxu1  ;;  %9831 = vpow2.f32 %v3883_v7  ;;  %v3885_v29 = vmul.f32 1.442695, %v3858_v8  ;;  %v3720_v26 = vadd.f32 %v8463_v13, %v11653_v6  ;;  %v8466_v51 = vadd.f32 %v8465_v19, %v8464_v14  ;;  %v3841_v8 = vld [vmem:[%s11678_s25 + $0x50] sm:$0xff]  ;;  %v9539_v14 = vld [vmem:[%s13238_s10 + $0x1c0] ss:$28 sps:$4 sm:$0xff]  }
 0x32c   : > { %v8530_v54 = vadd.f32 %v8529_v27, %v8528_v15  ;;  %v3930_v33 = vpack.c.bf16 %v3918_v28, %v3917_v22  ;;  %5809 = vmatpush1.bf16.msra.mxu0 %v9521_v40  ;;  %6035 = vmatpush1.bf16.msra.mxu1 %v9524_v48  ;;  %v3842_v27 = vld [vmem:[%s11678_s25 + $0x58] sm:$0xff]  ;;  %v9550_v28 = vld [vmem:[%s13238_s10 + $0x204] ss:$28 sps:$4 sm:$0xff]  }
 0x32d   : > { %v9828_v58 = vpop.eup %9827  ;;  %9833 = vpow2.f32 %v3885_v29  ;;  %v3817_v35 = vadd.f32 %v8527_v63, %v3720_v26  ;;  %v3723_v36 = vadd.f32 %v8466_v51, %v11653_v6  ;;  %5810 = vmatprep.subr.bf16.mxu0 %v9529_v31  ;;  %6036 = vmatprep.subr.bf16.mxu1 %v9532_v37  ;;  %v9547_v22 = vld [vmem:[%s13238_s10 + $0x1fc] ss:$28 sps:$4 sm:$0xff]  }
 0x32e   : > { %7929 = vmatmul.mubr.msk.bf16.gmra.mrb[108].mxu0 %vm3993_vm2, %v3930_v33  ;;  %7938 = vmatmul.mubr.msk.bf16.gmra.mrb[108].mxu1 %vm3993_vm2, %v3930_v33  ;;  %v3903_v12 = vmul.f32 %v9828_v58, %v3839_v53  ;;  %v9548_v33 = vld [vmem:[%s13238_s10 + $0x200] ss:$28 sps:$4 sm:$0xff]  }
 0x32f   : > { %v9830_v2 = vpop.eup %9829  ;;  %v3859_v57 = vmul.f32 0.5, %v3817_v35  ;;  %7482 = vst.msk [vmem:[%s11663_s19 + $0x60] sm:$0xff] %vm3993_vm2, %v3817_v35  ;;  %v3820_v41 = vadd.f32 %v8530_v54, %v3723_v36  ;;  %v8467_v25 = vpop.f32.mrb[92].mxu0  ;;  %4103 = vmatprep.mubr.bf16.mxu0 %v10300_v24  ;;  %4216 = vmatprep.mubr.bf16.mxu1 %v10300_v24  ;;  %v9545_v54 = vld [vmem:[%s13238_s10 + $0x1f8] ss:$28 sps:$4 sm:$0xff]  }
 0x330   : > { %v8531_v52 = vpop.f32.mrb[92].mxu1  ;;  %v8468_v43 = vpop.f32.mrb[93].mxu0  ;;  %v3904_v32 = vmul.f32 %v9830_v2, %v3840_v9  ;;  %5811 = vmatpush1.bf16.msra.mxu0 %v9527_v34  ;;  %6037 = vmatpush1.bf16.msra.mxu1 %v9530_v56  ;;  %v3919_v62 = vadd.f32 %v3903_v12, %v11606_v50  ;;  %v9542_v50 = vld [vmem:[%s13238_s10 + $0x1c8] ss:$28 sps:$4 sm:$0xff]   ;;  %v9553_v34 = vld [vmem:[%s13238_s10 + $0x234] ss:$28 sps:$4 sm:$0xff]  }
 0x331   : > { %v8532_v44 = vpop.f32.mrb[93].mxu1  ;;  %v3887_v40 = vmul.f32 1.442695, %v3859_v57  ;;  %v3860_v45 = vmul.f32 0.5, %v3820_v41  ;;  %7483 = vst.msk [vmem:[%s11663_s19 + $0x68] sm:$0xff] %vm3993_vm2, %v3820_v41  ;;  %v8469_v3 = vadd.f32 %v8468_v43, %v8467_v25  ;;  %v8470_v46 = vpop.f32.mrb[94].mxu0  ;;  %5812 = vmatprep.subr.bf16.mxu0 %v9535_v10  ;;  %6038 = vmatprep.subr.bf16.mxu1 %v9538_v11 }
 0x332   : > { %v8533_v5 = vadd.f32 %v8532_v44, %v8531_v52  ;;  %v8534_v47 = vpop.f32.mrb[94].mxu1  ;;  %v8471_v48 = vpop.f32.mrb[95].mxu0  ;;  %v3920_v4 = vadd.f32 %v3904_v32, %v11612_v60  ;;  %v9556_v35 = vld [vmem:[%s13238_s10 + $0x23c] ss:$28 sps:$4 sm:$0xff]   ;;  %v3843_v11 = vld [vmem:[%s11678_s25 + $0x60] sm:$0xff]  ;;  %v3844_v41 = vld [vmem:[%s11678_s25 + $0x68] sm:$0xff] }
 0x333   : > { %v8535_v59 = vpop.f32.mrb[95].mxu1  ;;  %9835 = vpow2.f32 %v3887_v40  ;;  %v3889_v31 = vmul.f32 1.442695, %v3860_v45  ;;  %v3728_v37 = vadd.f32 %v8469_v3, %v11653_v6  ;;  %v8472_v7 = vadd.f32 %v8471_v48, %v8470_v46  ;;  %v9554_v2 = vld [vmem:[%s13238_s10 + $0x238] ss:$28 sps:$4 sm:$0xff]  }
 0x334   : > { %v8536_v13 = vadd.f32 %v8535_v59, %v8534_v47  ;;  %v3931_v63 = vpack.c.bf16 %v3920_v4, %v3919_v62  ;;  %5813 = vmatpush1.bf16.msra.mxu0 %v9533_v0  ;;  %6039 = vmatpush1.bf16.msra.mxu1 %v9536_v42  ;;  %v9551_v0 = vld [vmem:[%s13238_s10 + $0x230] ss:$28 sps:$4 sm:$0xff]   ;;  %v9557_v43 = vld [vmem:[%s13238_s10 + $0x268] ss:$28 sps:$4 sm:$0xff]   ;;  %v3846_v48 = vld [vmem:[%s11678_s25 + $0x78] sm:$0xff] }
 0x335   : > { %v9832_v60 = vpop.eup %9831  ;;  %9837 = vpow2.f32 %v3889_v31  ;;  %v3825_v15 = vadd.f32 %v8533_v5, %v3728_v37  ;;  %v3731_v19 = vadd.f32 %v8472_v7, %v11653_v6  ;;  %5814 = vmatprep.subr.bf16.mxu0 %v9541_v38  ;;  %6040 = vmatprep.subr.bf16.mxu1 %v9544_v39  ;;  %v9560_v44 = vld [vmem:[%s13238_s10 + $0x270] ss:$28 sps:$4 sm:$0xff]   ;;  %v9565_v32 = vld [vmem:[%s13238_s10 + $0x2a4] ss:$28 sps:$4 sm:$0xff]   ;;  %v9569_v31 = vld [vmem:[%s13238_s10 + $0x2d8] ss:$28 sps:$4 sm:$0xff]  }
 0x336   : > { %7930 = vmatmul.mubr.msk.bf16.gmra.mrb[112].mxu0 %vm3993_vm2, %v3931_v63  ;;  %7939 = vmatmul.mubr.msk.bf16.gmra.mrb[112].mxu1 %vm3993_vm2, %v3931_v63  ;;  %v3905_v29 = vmul.f32 %v9832_v60, %v3841_v8  ;;  %v9568_v38 = vld [vmem:[%s13238_s10 + $0x2ac] ss:$28 sps:$4 sm:$0xff]   ;;  %v3845_v45 = vld [vmem:[%s11678_s25 + $0x70] sm:$0xff]  ;;  %v9563_v5 = vld [vmem:[%s13238_s10 + $0x2a0] ss:$28 sps:$4 sm:$0xff]  }
 0x337   : > { %v9834_v26 = vpop.eup %9833  ;;  %v3861_v51 = vmul.f32 0.5, %v3825_v15  ;;  %7484 = vst.msk [vmem:[%s11663_s19 + $0x70] sm:$0xff] %vm3993_vm2, %v3825_v15  ;;  %v3828_v6 = vadd.f32 %v8536_v13, %v3731_v19  ;;  %4113 = vmatprep.mubr.bf16.mxu0 %v10300_v24  ;;  %4226 = vmatprep.mubr.bf16.mxu1 %v10300_v24  ;;  %v9566_v46 = vld [vmem:[%s13238_s10 + $0x2a8] ss:$28 sps:$4 sm:$0xff]   ;;  %v9572_v37 = vld [vmem:[%s13238_s10 + $0x2e0] ss:$28 sps:$4 sm:$0xff]  }
 0x338   : > { %v3906_v53 = vmul.f32 %v9834_v26, %v3842_v27  ;;  %5815 = vmatpush1.bf16.msra.mxu0 %v9539_v14  ;;  %6041 = vmatpush1.bf16.msra.mxu1 %v9542_v50  ;;  %v3921_v36 = vadd.f32 %v3905_v29, %v11618_v23  ;;  %v9559_v23 = vld [vmem:[%s13238_s10 + $0x26c] ss:$28 sps:$4 sm:$0xff]   ;;  %v9580_v63 = vld [vmem:[%s13238_s10 + $0x31c] ss:$28 sps:$4 sm:$0xff]   ;;  %v9586_v50 = vld [vmem:[%s13238_s10 + $0x354] ss:$28 sps:$4 sm:$0xff]  }
 0x339   : > { %v3891_v56 = vmul.f32 1.442695, %v3861_v51  ;;  %v3862_v58 = vmul.f32 0.5, %v3828_v6  ;;  %7485 = vst.msk [vmem:[%s11663_s19 + $0x78] sm:$0xff] %vm3993_vm2, %v3828_v6  ;;  %5816 = vmatprep.subr.bf16.mxu0 %v9547_v22  ;;  %6042 = vmatprep.subr.bf16.mxu1 %v9550_v28  ;;  %v9583_v14 = vld [vmem:[%s13238_s10 + $0x34c] ss:$28 sps:$4 sm:$0xff]  }
 0x33a   : > { %v3922_v9 = vadd.f32 %v3906_v53, %v11624_v30  ;;  %v9562_v30 = vld [vmem:[%s13238_s10 + $0x274] ss:$28 sps:$4 sm:$0xff]   ;;  %v9581_v60 = vld [vmem:[%s13238_s10 + $0x348] ss:$28 sps:$4 sm:$0xff]   ;;  %v3941_v22 = vld [vmem:[%s13237_s9] sm:$0xf] }
 0x33b   : > { %9839 = vpow2.f32 %v3891_v56  ;;  %v3893_v10 = vmul.f32 1.442695, %v3862_v58  ;;  %v9584_v15 = vld [vmem:[%s13238_s10 + $0x350] ss:$28 sps:$4 sm:$0xff]   ;;  %v9589_v19 = vld [vmem:[%s13238_s10 + $0x384] ss:$28 sps:$4 sm:$0xff]   ;;  %v11976_v28 = vrot.slane %v3941_v22, %v11233_v17  ;;  %v11979_v29 = vrot.slane %v3941_v22, %v11236_v18 }
 0x33c   : > { %v3932_v12 = vpack.c.bf16 %v3922_v9, %v3921_v36  ;;  %5817 = vmatpush1.bf16.msra.mxu0 %v9545_v54  ;;  %6043 = vmatpush1.bf16.msra.mxu1 %v9548_v33  ;;  %v9592_v27 = vld [vmem:[%s13238_s10 + $0x38c] ss:$28 sps:$4 sm:$0xff]   ;;  %v11982_v26 = vrot.slane %v3941_v22, %v11242_v20  ;;  %v11985_v51 = vrot.slane %v3941_v22, %v11245_v21 }
 0x33d   : > { %v9836_v57 = vpop.eup %9835  ;;  %9841 = vpow2.f32 %v3893_v10  ;;  %5818 = vmatprep.subr.bf16.mxu0 %v9553_v34  ;;  %6044 = vmatprep.subr.bf16.mxu1 %v9556_v35 }
 0x33e   : > { %7931 = vmatmul.mubr.msk.bf16.gmra.mrb[116].mxu0 %vm3993_vm2, %v3932_v12  ;;  %7940 = vmatmul.mubr.msk.bf16.gmra.mrb[116].mxu1 %vm3993_vm2, %v3932_v12  ;;  %v3907_v25 = vmul.f32 %v9836_v57, %v3843_v11 }
 0x33f   : > { %v9838_v52 = vpop.eup %9837  ;;  %4123 = vmatprep.mubr.bf16.mxu0 %v10300_v24  ;;  %4236 = vmatprep.mubr.bf16.mxu1 %v10300_v24 }
 0x340   : > { %v3908_v42 = vmul.f32 %v9838_v52, %v3844_v41  ;;  %5819 = vmatpush1.bf16.msra.mxu0 %v9551_v0  ;;  %6045 = vmatpush1.bf16.msra.mxu1 %v9554_v2  ;;  %v3923_v39 = vadd.f32 %v3907_v25, %v11630_v1  ;;  %v9571_v1 = vld [vmem:[%s13238_s10 + $0x2dc] ss:$28 sps:$4 sm:$0xff]  }
 0x341   : > { %5820 = vmatprep.subr.bf16.mxu0 %v9559_v23  ;;  %6046 = vmatprep.subr.bf16.mxu1 %v9562_v30 }
 0x342   : > { %v3924_v40 = vadd.f32 %v3908_v42, %v11636_v55  ;;  %v9574_v55 = vld [vmem:[%s13238_s10 + $0x2e4] ss:$28 sps:$4 sm:$0xff]  }
 0x344   : > { %v3933_v3 = vpack.c.bf16 %v3924_v40, %v3923_v39  ;;  %5821 = vmatpush1.bf16.msra.mxu0 %v9557_v43  ;;  %6047 = vmatpush1.bf16.msra.mxu1 %v9560_v44 }
 0x345   : > { %v9840_v47 = vpop.eup %9839  ;;  %5822 = vmatprep.subr.bf16.mxu0 %v9565_v32  ;;  %6048 = vmatprep.subr.bf16.mxu1 %v9568_v38 }
 0x346   : > { %7932 = vmatmul.mubr.msk.bf16.gmra.mrb[120].mxu0 %vm3993_vm2, %v3933_v3  ;;  %7941 = vmatmul.mubr.msk.bf16.gmra.mrb[120].mxu1 %vm3993_vm2, %v3933_v3  ;;  %v3909_v59 = vmul.f32 %v9840_v47, %v3845_v45 }
 0x347   : > { %v9842_v62 = vpop.eup %9841  ;;  %4133 = vmatprep.mubr.bf16.mxu0 %v10300_v24  ;;  %4246 = vmatprep.mubr.bf16.mxu1 %v10300_v24  ;;  %v9577_v24 = vld [vmem:[%s13238_s10 + $0x314] ss:$28 sps:$4 sm:$0xff]  }
 0x348   : > { %v3910_v4 = vmul.f32 %v9842_v62, %v3846_v48  ;;  %5823 = vmatpush1.bf16.msra.mxu0 %v9563_v5  ;;  %6049 = vmatpush1.bf16.msra.mxu1 %v9566_v46  ;;  %v3925_v7 = vadd.f32 %v3909_v59, %v11642_v49  ;;  %v9575_v49 = vld [vmem:[%s13238_s10 + $0x310] ss:$28 sps:$4 sm:$0xff]   ;;  %v9587_v5 = vld [vmem:[%s13238_s10 + $0x380] ss:$28 sps:$4 sm:$0xff]   ;;  %v9590_v46 = vld [vmem:[%s13238_s10 + $0x388] ss:$28 sps:$4 sm:$0xff]  }
 0x349   : > { %5824 = vmatprep.subr.bf16.mxu0 %v9571_v1  ;;  %6050 = vmatprep.subr.bf16.mxu1 %v9574_v55  ;;  %v9595_v59 = vld [vmem:[%s13238_s10 + $0x3bc] ss:$28 sps:$4 sm:$0xff]   ;;  %v9598_v62 = vld [vmem:[%s13238_s10 + $0x3c4] ss:$28 sps:$4 sm:$0xff]  }
 0x34a   : > { %v3926_v8 = vadd.f32 %v3910_v4, %v11648_v61  ;;  %v9578_v61 = vld [vmem:[%s13238_s10 + $0x318] ss:$28 sps:$4 sm:$0xff]  }
 0x34c   : > { %v3934_v13 = vpack.c.bf16 %v3926_v8, %v3925_v7  ;;  %5825 = vmatpush1.bf16.msra.mxu0 %v9569_v31  ;;  %6051 = vmatpush1.bf16.msra.mxu1 %v9572_v37 }
 0x34d   : > { %5826 = vmatprep.subr.bf16.mxu0 %v9577_v24  ;;  %6052 = vmatprep.subr.bf16.mxu1 %v9580_v63 }
 0x34e   : > { %7933 = vmatmul.mubr.msk.bf16.gmra.mrb[124].mxu0 %vm3993_vm2, %v3934_v13  ;;  %7942 = vmatmul.mubr.msk.bf16.gmra.mrb[124].mxu1 %vm3993_vm2, %v3934_v13 }
 0x350   : > { %5827 = vmatpush1.bf16.msra.mxu0 %v9575_v49  ;;  %6053 = vmatpush1.bf16.msra.mxu1 %v9578_v61 }
 0x351   : > { %5828 = vmatprep.subr.bf16.mxu0 %v9583_v14  ;;  %6054 = vmatprep.subr.bf16.mxu1 %v9586_v50  ;;  %v9593_v14 = vld [vmem:[%s13238_s10 + $0x3b8] ss:$28 sps:$4 sm:$0xff]   ;;  %v9596_v50 = vld [vmem:[%s13238_s10 + $0x3c0] ss:$28 sps:$4 sm:$0xff]  }
 0x354   : > { %5829 = vmatpush1.bf16.msra.mxu0 %v9581_v60  ;;  %6055 = vmatpush1.bf16.msra.mxu1 %v9584_v15  ;;  %v9601_v60 = vld [vmem:[%s13238_s10 + $0x3f4] ss:$28 sps:$4 sm:$0xff]  }
 0x355   : > { %5911 = vmatprep.subr.bf16.mxu0 %v9589_v19  ;;  %6137 = vmatprep.subr.bf16.mxu1 %v9592_v27 }
 0x3e9   : > { %v4065_v6 = vpop.f32.mrb[96].mxu0  ;;  %v4178_v53 = vpop.f32.mrb[96].mxu1 }
 0x3ea   : > { %v4066_v54 = vadd.f32 %v4065_v6, %v11976_v28  ;;  %v4179_v33 = vadd.f32 %v4178_v53, %v11979_v29  ;;  %v4067_v34 = vpop.f32.mrb[97].mxu0  ;;  %v4180_v56 = vpop.f32.mrb[97].mxu1  ;;  %v9604_v6 = vld [vmem:[%s13238_s10 + $0x3fc] ss:$28 sps:$4 sm:$0xff]  }
 0x3eb   : > { %v4068_v58 = vadd.f32 %v4067_v34, %v11982_v26  ;;  %v4181_v35 = vadd.f32 %v4180_v56, %v11985_v51  ;;  %v4069_v36 = vpop.f32.mrb[98].mxu0  ;;  %v4182_v9 = vpop.f32.mrb[98].mxu1 }
 0x3ec   : > { %v4070_v10 = vadd.f32 %v4069_v36, %v11976_v28  ;;  %v4183_v11 = vadd.f32 %v4182_v9, %v11979_v29  ;;  %v4071_v12 = vpop.f32.mrb[99].mxu0  ;;  %v4184_v0 = vpop.f32.mrb[99].mxu1  ;;  %v4257_v41 = vmax.f32 %v4066_v54, 0.0  ;;  %v4259_v23 = vmax.f32 %v4179_v33, 0.0 }
 0x3ed   : > { %v4072_v2 = vadd.f32 %v4071_v12, %v11982_v26  ;;  %v4185_v57 = vadd.f32 %v4184_v0, %v11985_v51  ;;  %v4258_v52 = vmax.f32 %v4068_v58, 0.0  ;;  %v4260_v42 = vmax.f32 %v4181_v35, 0.0  ;;  %v9602_v12 = vld [vmem:[%s13238_s10 + $0x3f8] ss:$28 sps:$4 sm:$0xff]  }
 0x3ee   : > { %v4261_v30 = vmax.f32 %v4070_v10, 0.0  ;;  %v4263_v25 = vmax.f32 %v4183_v11, 0.0  ;;  %v9599_v11 = vld [vmem:[%s13238_s10 + $0x3f0] ss:$28 sps:$4 sm:$0xff]  }
 0x3ef   : > { %v4262_v43 = vmax.f32 %v4072_v2, 0.0  ;;  %v4264_v44 = vmax.f32 %v4185_v57, 0.0 }
 0x3f0   : > { %v11995_v32 = vpack.c.bf16 %v4261_v30, %v4257_v41  ;;  %v11997_v38 = vpack.c.bf16 %v4263_v25, %v4259_v23  ;;  %v9607_v23 = vld [vmem:[%s13238_s10 + $0x42c] ss:$28 sps:$4 sm:$0xff]   ;;  %v9610_v30 = vld [vmem:[%s13238_s10 + $0x434] ss:$28 sps:$4 sm:$0xff]  }
 0x3f1   : > { %v11999_v39 = vpack.c.bf16 %v4262_v43, %v4258_v52  ;;  %v12001_v40 = vpack.c.bf16 %v4264_v44, %v4260_v42  ;;  %v4075_v45 = vpop.f32.mrb[100].mxu0  ;;  %v4188_v3 = vpop.f32.mrb[100].mxu1 }
 0x3f2   : > { %v4076_v47 = vadd.f32 %v4075_v45, %v11976_v28  ;;  %v4189_v48 = vadd.f32 %v4188_v3, %v11979_v29  ;;  %v4077_v1 = vpop.f32.mrb[101].mxu0  ;;  %v4190_v55 = vpop.f32.mrb[101].mxu1 }
 0x3f3   : > { %v4078_v4 = vadd.f32 %v4077_v1, %v11982_v26  ;;  %v4191_v31 = vadd.f32 %v4190_v55, %v11985_v51  ;;  %v4079_v37 = vpop.f32.mrb[102].mxu0  ;;  %v4192_v7 = vpop.f32.mrb[102].mxu1  ;;  %5830 = vmatprep.mubr.bf16.mxu0 %v11999_v39  ;;  %6056 = vmatprep.mubr.bf16.mxu1 %v11999_v39  ;;  %v9608_v1 = vld [vmem:[%s13238_s10 + $0x430] ss:$28 sps:$4 sm:$0xff]   ;;  %v9613_v55 = vld [vmem:[%s13238_s10 + $0x464] ss:$28 sps:$4 sm:$0xff]  }
 0x3f4   : > { %v4080_v8 = vadd.f32 %v4079_v37, %v11976_v28  ;;  %v4193_v13 = vadd.f32 %v4192_v7, %v11979_v29  ;;  %v4081_v24 = vpop.f32.mrb[103].mxu0  ;;  %v4194_v63 = vpop.f32.mrb[103].mxu1  ;;  %5831 = vmatmul.mubr.bf16.vlgmr.msra.gmra.mrb[128].mxu0 %v11995_v32  ;;  %6057 = vmatmul.mubr.bf16.vlgmr.msra.gmra.mrb[128].mxu1 %v11995_v32  ;;  %v4265_v15 = vmax.f32 %v4076_v47, 0.0  ;;  %v4267_v19 = vmax.f32 %v4189_v48, 0.0  ;;  %v9605_v48 = vld [vmem:[%s13238_s10 + $0x428] ss:$28 sps:$4 sm:$0xff]  }
 0x3f5   : > { %v4082_v49 = vadd.f32 %v4081_v24, %v11982_v26  ;;  %v4195_v61 = vadd.f32 %v4194_v63, %v11985_v51  ;;  %5912 = vmatpush1.bf16.msra.mxu0 %v9587_v5  ;;  %6138 = vmatpush1.bf16.msra.mxu1 %v9590_v46  ;;  %v4266_v53 = vmax.f32 %v4078_v4, 0.0  ;;  %v4268_v54 = vmax.f32 %v4191_v31, 0.0  ;;  %v9616_v37 = vld [vmem:[%s13238_s10 + $0x46c] ss:$28 sps:$4 sm:$0xff]  }
 0x3f6   : > { %v4269_v27 = vmax.f32 %v4080_v8, 0.0  ;;  %v4271_v22 = vmax.f32 %v4193_v13, 0.0  ;;  %5913 = vmatprep.subr.bf16.mxu0 %v9595_v59  ;;  %6139 = vmatprep.subr.bf16.mxu1 %v9598_v62 }
 0x3f7   : > { %v4270_v33 = vmax.f32 %v4082_v49, 0.0  ;;  %v4272_v34 = vmax.f32 %v4195_v61, 0.0 }
 0x3f8   : > { %v12039_v56 = vpack.c.bf16 %v4269_v27, %v4265_v15  ;;  %v12041_v58 = vpack.c.bf16 %v4271_v22, %v4267_v19  ;;  %v9611_v15 = vld [vmem:[%s13238_s10 + $0x460] ss:$28 sps:$4 sm:$0xff]   ;;  %v9614_v19 = vld [vmem:[%s13238_s10 + $0x468] ss:$28 sps:$4 sm:$0xff]  }
 0x3f9   : > { %v12043_v35 = vpack.c.bf16 %v4270_v33, %v4266_v53  ;;  %v12045_v36 = vpack.c.bf16 %v4272_v34, %v4268_v54  ;;  %v4085_v9 = vpop.f32.mrb[104].mxu0  ;;  %v4198_v10 = vpop.f32.mrb[104].mxu1  ;;  %5914 = vmatpush1.bf16.msra.mxu0 %v9593_v14  ;;  %6140 = vmatpush1.bf16.msra.mxu1 %v9596_v50  ;;  %v9619_v54 = vld [vmem:[%s13238_s10 + $0x49c] ss:$28 sps:$4 sm:$0xff]   ;;  %v9622_v33 = vld [vmem:[%s13238_s10 + $0x4a4] ss:$28 sps:$4 sm:$0xff]  }
 0x3fa   : > { %v4086_v0 = vadd.f32 %v4085_v9, %v11976_v28  ;;  %v4199_v2 = vadd.f32 %v4198_v10, %v11979_v29  ;;  %v4087_v57 = vpop.f32.mrb[105].mxu0  ;;  %v4200_v41 = vpop.f32.mrb[105].mxu1  ;;  %5915 = vmatprep.subr.bf16.mxu0 %v9601_v60  ;;  %6141 = vmatprep.subr.bf16.mxu1 %v9604_v6 }
 0x3fb   : > { %v4088_v25 = vadd.f32 %v4087_v57, %v11982_v26  ;;  %v4201_v52 = vadd.f32 %v4200_v41, %v11985_v51  ;;  %v4089_v42 = vpop.f32.mrb[106].mxu0  ;;  %v4202_v43 = vpop.f32.mrb[106].mxu1  ;;  %5840 = vmatprep.mubr.bf16.mxu0 %v12043_v35  ;;  %6066 = vmatprep.mubr.bf16.mxu1 %v12043_v35 }
 0x3fc   : > { %v4090_v44 = vadd.f32 %v4089_v42, %v11976_v28  ;;  %v4203_v45 = vadd.f32 %v4202_v43, %v11979_v29  ;;  %v4091_v3 = vpop.f32.mrb[107].mxu0  ;;  %v4204_v5 = vpop.f32.mrb[107].mxu1  ;;  %5841 = vmatmul.mubr.bf16.gmra.mrb[132].mxu0 %v12039_v56  ;;  %6067 = vmatmul.mubr.bf16.gmra.mrb[132].mxu1 %v12039_v56  ;;  %v4273_v59 = vmax.f32 %v4086_v0, 0.0  ;;  %v4275_v62 = vmax.f32 %v4199_v2, 0.0 }
 0x3fd   : > { %v4092_v46 = vadd.f32 %v4091_v3, %v11982_v26  ;;  %v4205_v47 = vadd.f32 %v4204_v5, %v11985_v51  ;;  %5916 = vmatpush1.bf16.msra.mxu0 %v9599_v11  ;;  %6142 = vmatpush1.bf16.msra.mxu1 %v9602_v12  ;;  %v4274_v7 = vmax.f32 %v4088_v25, 0.0  ;;  %v4276_v8 = vmax.f32 %v4201_v52, 0.0  ;;  %v9620_v25 = vld [vmem:[%s13238_s10 + $0x4a0] ss:$28 sps:$4 sm:$0xff]   ;;  %v9625_v52 = vld [vmem:[%s13238_s10 + $0x4d4] ss:$28 sps:$4 sm:$0xff]  }
 0x3fe   : > { %v4277_v4 = vmax.f32 %v4090_v44, 0.0  ;;  %v4279_v31 = vmax.f32 %v4203_v45, 0.0  ;;  %5917 = vmatprep.subr.bf16.mxu0 %v9607_v23  ;;  %6143 = vmatprep.subr.bf16.mxu1 %v9610_v30  ;;  %v9617_v30 = vld [vmem:[%s13238_s10 + $0x498] ss:$28 sps:$4 sm:$0xff]  }
 0x3ff   : > { %v4278_v13 = vmax.f32 %v4092_v46, 0.0  ;;  %v4280_v24 = vmax.f32 %v4205_v47, 0.0  ;;  %v9628_v3 = vld [vmem:[%s13238_s10 + $0x4dc] ss:$28 sps:$4 sm:$0xff]  }
 0x400   : > { %v12083_v63 = vpack.c.bf16 %v4277_v4, %v4273_v59  ;;  %v12085_v49 = vpack.c.bf16 %v4279_v31, %v4275_v62 }
 0x401   : > { %v12087_v61 = vpack.c.bf16 %v4278_v13, %v4274_v7  ;;  %v12089_v14 = vpack.c.bf16 %v4280_v24, %v4276_v8  ;;  %v4095_v50 = vpop.f32.mrb[108].mxu0  ;;  %v4208_v60 = vpop.f32.mrb[108].mxu1  ;;  %5918 = vmatpush1.bf16.msra.mxu0 %v9605_v48  ;;  %6144 = vmatpush1.bf16.msra.mxu1 %v9608_v1  ;;  %v9626_v7 = vld [vmem:[%s13238_s10 + $0x4d8] ss:$28 sps:$4 sm:$0xff]  }
 0x402   : > { %v4096_v27 = vadd.f32 %v4095_v50, %v11976_v28  ;;  %v4209_v22 = vadd.f32 %v4208_v60, %v11979_v29  ;;  %v4097_v6 = vpop.f32.mrb[109].mxu0  ;;  %v4210_v53 = vpop.f32.mrb[109].mxu1  ;;  %5919 = vmatprep.subr.bf16.mxu0 %v9613_v55  ;;  %6145 = vmatprep.subr.bf16.mxu1 %v9616_v37  ;;  %v9623_v37 = vld [vmem:[%s13238_s10 + $0x4d0] ss:$28 sps:$4 sm:$0xff]  }
 0x403   : > { %v4098_v34 = vadd.f32 %v4097_v6, %v11982_v26  ;;  %v4211_v9 = vadd.f32 %v4210_v53, %v11985_v51  ;;  %v4099_v10 = vpop.f32.mrb[110].mxu0  ;;  %v4212_v11 = vpop.f32.mrb[110].mxu1  ;;  %5850 = vmatprep.mubr.bf16.mxu0 %v12087_v61  ;;  %6076 = vmatprep.mubr.bf16.mxu1 %v12087_v61  ;;  %v9631_v60 = vld [vmem:[%s13238_s10 + $0x50c] ss:$28 sps:$4 sm:$0xff]  }
 0x404   : > { %v4100_v12 = vadd.f32 %v4099_v10, %v11976_v28  ;;  %v4213_v0 = vadd.f32 %v4212_v11, %v11979_v29  ;;  %v4101_v2 = vpop.f32.mrb[111].mxu0  ;;  %v4214_v57 = vpop.f32.mrb[111].mxu1  ;;  %5851 = vmatmul.mubr.bf16.gmra.mrb[136].mxu0 %v12083_v63  ;;  %6077 = vmatmul.mubr.bf16.gmra.mrb[136].mxu1 %v12083_v63  ;;  %v4281_v42 = vmax.f32 %v4096_v27, 0.0  ;;  %v4283_v43 = vmax.f32 %v4209_v22, 0.0  ;;  %v9629_v11 = vld [vmem:[%s13238_s10 + $0x508] ss:$28 sps:$4 sm:$0xff]  }
 0x405   : > { %v4102_v41 = vadd.f32 %v4101_v2, %v11982_v26  ;;  %v4215_v23 = vadd.f32 %v4214_v57, %v11985_v51  ;;  %5920 = vmatpush1.bf16.msra.mxu0 %v9611_v15  ;;  %6146 = vmatpush1.bf16.msra.mxu1 %v9614_v19  ;;  %v4282_v5 = vmax.f32 %v4098_v34, 0.0  ;;  %v4284_v46 = vmax.f32 %v4211_v9, 0.0  ;;  %v9634_v15 = vld [vmem:[%s13238_s10 + $0x514] ss:$28 sps:$4 sm:$0xff]  }
 0x406   : > { %v4285_v44 = vmax.f32 %v4100_v12, 0.0  ;;  %v4287_v45 = vmax.f32 %v4213_v0, 0.0  ;;  %5921 = vmatprep.subr.bf16.mxu0 %v9619_v54  ;;  %6147 = vmatprep.subr.bf16.mxu1 %v9622_v33  ;;  %v9632_v12 = vld [vmem:[%s13238_s10 + $0x510] ss:$28 sps:$4 sm:$0xff]   ;;  %v9637_v0 = vld [vmem:[%s13238_s10 + $0x544] ss:$28 sps:$4 sm:$0xff]  }
 0x407   : > { %v4286_v47 = vmax.f32 %v4102_v41, 0.0  ;;  %v4288_v48 = vmax.f32 %v4215_v23, 0.0 }
 0x408   : > { %v12127_v1 = vpack.c.bf16 %v4285_v44, %v4281_v42  ;;  %v12129_v55 = vpack.c.bf16 %v4287_v45, %v4283_v43 }
 0x409   : > { %v12131_v59 = vpack.c.bf16 %v4286_v47, %v4282_v5  ;;  %v12133_v62 = vpack.c.bf16 %v4288_v48, %v4284_v46  ;;  %v4105_v4 = vpop.f32.mrb[112].mxu0  ;;  %v4218_v31 = vpop.f32.mrb[112].mxu1  ;;  %5922 = vmatpush1.bf16.msra.mxu0 %v9617_v30  ;;  %6148 = vmatpush1.bf16.msra.mxu1 %v9620_v25  ;;  %v9640_v30 = vld [vmem:[%s13238_s10 + $0x54c] ss:$28 sps:$4 sm:$0xff]   ;;  %v9635_v48 = vld [vmem:[%s13238_s10 + $0x540] ss:$28 sps:$4 sm:$0xff]  }
 0x40a   : > { %v4106_v8 = vadd.f32 %v4105_v4, %v11976_v28  ;;  %v4219_v13 = vadd.f32 %v4218_v31, %v11979_v29  ;;  %v4107_v24 = vpop.f32.mrb[113].mxu0  ;;  %v4220_v50 = vpop.f32.mrb[113].mxu1  ;;  %5923 = vmatprep.subr.bf16.mxu0 %v9625_v52  ;;  %6149 = vmatprep.subr.bf16.mxu1 %v9628_v3  ;;  %v9638_v4 = vld [vmem:[%s13238_s10 + $0x548] ss:$28 sps:$4 sm:$0xff]  }
 0x40b   : > { %v4108_v19 = vadd.f32 %v4107_v24, %v11982_v26  ;;  %v4221_v27 = vadd.f32 %v4220_v50, %v11985_v51  ;;  %v4109_v22 = vpop.f32.mrb[114].mxu0  ;;  %v4222_v6 = vpop.f32.mrb[114].mxu1  ;;  %5860 = vmatprep.mubr.bf16.mxu0 %v12131_v59  ;;  %6086 = vmatprep.mubr.bf16.mxu1 %v12131_v59  ;;  %v9646_v24 = vld [vmem:[%s13238_s10 + $0x584] ss:$28 sps:$4 sm:$0xff]  }
 0x40c   : > { %v4110_v53 = vadd.f32 %v4109_v22, %v11976_v28  ;;  %v4223_v54 = vadd.f32 %v4222_v6, %v11979_v29  ;;  %v4111_v33 = vpop.f32.mrb[115].mxu0  ;;  %v4224_v34 = vpop.f32.mrb[115].mxu1  ;;  %5861 = vmatmul.mubr.bf16.gmra.mrb[140].mxu0 %v12127_v1  ;;  %6087 = vmatmul.mubr.bf16.gmra.mrb[140].mxu1 %v12127_v1  ;;  %v4289_v2 = vmax.f32 %v4106_v8, 0.0  ;;  %v4291_v57 = vmax.f32 %v4219_v13, 0.0  ;;  %v9643_v13 = vld [vmem:[%s13238_s10 + $0x57c] ss:$28 sps:$4 sm:$0xff]  }
 0x40d   : > { %v4112_v9 = vadd.f32 %v4111_v33, %v11982_v26  ;;  %v4225_v10 = vadd.f32 %v4224_v34, %v11985_v51  ;;  %5924 = vmatpush1.bf16.msra.mxu0 %v9623_v37  ;;  %6150 = vmatpush1.bf16.msra.mxu1 %v9626_v7  ;;  %v4290_v25 = vmax.f32 %v4108_v19, 0.0  ;;  %v4292_v52 = vmax.f32 %v4221_v27, 0.0  ;;  %v9641_v34 = vld [vmem:[%s13238_s10 + $0x578] ss:$28 sps:$4 sm:$0xff]  }
 0x40e   : > { %v4293_v41 = vmax.f32 %v4110_v53, 0.0  ;;  %v4295_v23 = vmax.f32 %v4223_v54, 0.0  ;;  %5925 = vmatprep.subr.bf16.mxu0 %v9631_v60  ;;  %6151 = vmatprep.subr.bf16.mxu1 %v9634_v15 }
 0x40f   : > { %v4294_v42 = vmax.f32 %v4112_v9, 0.0  ;;  %v4296_v43 = vmax.f32 %v4225_v10, 0.0  ;;  %v9644_v9 = vld [vmem:[%s13238_s10 + $0x580] ss:$28 sps:$4 sm:$0xff]   ;;  %v9649_v10 = vld [vmem:[%s13238_s10 + $0x5b4] ss:$28 sps:$4 sm:$0xff]  }
 0x410   : > { %v12171_v44 = vpack.c.bf16 %v4293_v41, %v4289_v2  ;;  %v12173_v45 = vpack.c.bf16 %v4295_v23, %v4291_v57  ;;  %v9652_v57 = vld [vmem:[%s13238_s10 + $0x5bc] ss:$28 sps:$4 sm:$0xff]  }
 0x411   : > { %v12175_v3 = vpack.c.bf16 %v4294_v42, %v4290_v25  ;;  %v12177_v5 = vpack.c.bf16 %v4296_v43, %v4292_v52  ;;  %v4115_v46 = vpop.f32.mrb[116].mxu0  ;;  %v4228_v47 = vpop.f32.mrb[116].mxu1  ;;  %5926 = vmatpush1.bf16.msra.mxu0 %v9629_v11  ;;  %6152 = vmatpush1.bf16.msra.mxu1 %v9632_v12 }
 0x412   : > { %v4116_v31 = vadd.f32 %v4115_v46, %v11976_v28  ;;  %v4229_v37 = vadd.f32 %v4228_v47, %v11979_v29  ;;  %v4117_v7 = vpop.f32.mrb[117].mxu0  ;;  %v4230_v8 = vpop.f32.mrb[117].mxu1  ;;  %5927 = vmatprep.subr.bf16.mxu0 %v9637_v0  ;;  %6153 = vmatprep.subr.bf16.mxu1 %v9640_v30 }
 0x413   : > { %v4118_v50 = vadd.f32 %v4117_v7, %v11982_v26  ;;  %v4231_v60 = vadd.f32 %v4230_v8, %v11985_v51  ;;  %v4119_v15 = vpop.f32.mrb[118].mxu0  ;;  %v4232_v19 = vpop.f32.mrb[118].mxu1  ;;  %5870 = vmatprep.mubr.bf16.mxu0 %v12175_v3  ;;  %6096 = vmatprep.mubr.bf16.mxu1 %v12175_v3 }
 0x414   : > { %v4120_v27 = vadd.f32 %v4119_v15, %v11976_v28  ;;  %v4233_v22 = vadd.f32 %v4232_v19, %v11979_v29  ;;  %v4121_v6 = vpop.f32.mrb[119].mxu0  ;;  %v4234_v53 = vpop.f32.mrb[119].mxu1  ;;  %5871 = vmatmul.mubr.bf16.gmra.mrb[144].mxu0 %v12171_v44  ;;  %6097 = vmatmul.mubr.bf16.gmra.mrb[144].mxu1 %v12171_v44  ;;  %v4297_v11 = vmax.f32 %v4116_v31, 0.0  ;;  %v4299_v12 = vmax.f32 %v4229_v37, 0.0  ;;  %v9650_v31 = vld [vmem:[%s13238_s10 + $0x5b8] ss:$28 sps:$4 sm:$0xff]  }
 0x415   : > { %v4122_v54 = vadd.f32 %v4121_v6, %v11982_v26  ;;  %v4235_v33 = vadd.f32 %v4234_v53, %v11985_v51  ;;  %5928 = vmatpush1.bf16.msra.mxu0 %v9635_v48  ;;  %6154 = vmatpush1.bf16.msra.mxu1 %v9638_v4  ;;  %v4298_v41 = vmax.f32 %v4118_v50, 0.0  ;;  %v4300_v23 = vmax.f32 %v4231_v60, 0.0  ;;  %v9647_v4 = vld [vmem:[%s13238_s10 + $0x5b0] ss:$28 sps:$4 sm:$0xff]  }
 0x416   : > { %v4301_v0 = vmax.f32 %v4120_v27, 0.0  ;;  %v4303_v2 = vmax.f32 %v4233_v22, 0.0  ;;  %5929 = vmatprep.subr.bf16.mxu0 %v9643_v13  ;;  %6155 = vmatprep.subr.bf16.mxu1 %v9646_v24  ;;  %v9655_v24 = vld [vmem:[%s13238_s10 + $0x5ec] ss:$28 sps:$4 sm:$0xff]   ;;  %v9658_v50 = vld [vmem:[%s13238_s10 + $0x5f4] ss:$28 sps:$4 sm:$0xff]  }
 0x417   : > { %v4302_v30 = vmax.f32 %v4122_v54, 0.0  ;;  %v4304_v25 = vmax.f32 %v4235_v33, 0.0 }
 0x418   : > { %v12215_v52 = vpack.c.bf16 %v4301_v0, %v4297_v11  ;;  %v12217_v42 = vpack.c.bf16 %v4303_v2, %v4299_v12  ;;  %v9661_v11 = vld [vmem:[%s13238_s10 + $0x624] ss:$28 sps:$4 sm:$0xff]  }
 0x419   : > { %v12219_v43 = vpack.c.bf16 %v4302_v30, %v4298_v41  ;;  %v12221_v46 = vpack.c.bf16 %v4304_v25, %v4300_v23  ;;  %v4125_v47 = vpop.f32.mrb[120].mxu0  ;;  %v4238_v48 = vpop.f32.mrb[120].mxu1  ;;  %5930 = vmatpush1.bf16.msra.mxu0 %v9641_v34  ;;  %6156 = vmatpush1.bf16.msra.mxu1 %v9644_v9  ;;  %v9653_v9 = vld [vmem:[%s13238_s10 + $0x5e8] ss:$28 sps:$4 sm:$0xff]  }
 0x41a   : > { %v4126_v37 = vadd.f32 %v4125_v47, %v11976_v28  ;;  %v4239_v7 = vadd.f32 %v4238_v48, %v11979_v29  ;;  %v4127_v8 = vpop.f32.mrb[121].mxu0  ;;  %v4240_v13 = vpop.f32.mrb[121].mxu1  ;;  %5931 = vmatprep.subr.bf16.mxu0 %v9649_v10  ;;  %6157 = vmatprep.subr.bf16.mxu1 %v9652_v57  ;;  %v9656_v10 = vld [vmem:[%s13238_s10 + $0x5f0] ss:$28 sps:$4 sm:$0xff]  }
 0x41b   : > { %v4128_v60 = vadd.f32 %v4127_v8, %v11982_v26  ;;  %v4241_v15 = vadd.f32 %v4240_v13, %v11985_v51  ;;  %v4129_v19 = vpop.f32.mrb[122].mxu0  ;;  %v4242_v27 = vpop.f32.mrb[122].mxu1  ;;  %5880 = vmatprep.mubr.bf16.mxu0 %v12219_v43  ;;  %6106 = vmatprep.mubr.bf16.mxu1 %v12219_v43  ;;  %v9664_v41 = vld [vmem:[%s13238_s10 + $0x62c] ss:$28 sps:$4 sm:$0xff]   ;;  %v9659_v13 = vld [vmem:[%s13238_s10 + $0x620] ss:$28 sps:$4 sm:$0xff]  }
 0x41c   : > { %v4130_v22 = vadd.f32 %v4129_v19, %v11976_v28  ;;  %v4243_v6 = vadd.f32 %v4242_v27, %v11979_v29  ;;  %v4131_v53 = vpop.f32.mrb[123].mxu0  ;;  %v4244_v54 = vpop.f32.mrb[123].mxu1  ;;  %5881 = vmatmul.mubr.bf16.gmra.mrb[148].mxu0 %v12215_v52  ;;  %6107 = vmatmul.mubr.bf16.gmra.mrb[148].mxu1 %v12215_v52  ;;  %v4305_v12 = vmax.f32 %v4126_v37, 0.0  ;;  %v4307_v0 = vmax.f32 %v4239_v7, 0.0  ;;  %v9667_v27 = vld [vmem:[%s13238_s10 + $0x65c] ss:$28 sps:$4 sm:$0xff]  }
 0x41d   : > { %v4132_v33 = vadd.f32 %v4131_v53, %v11982_v26  ;;  %v4245_v34 = vadd.f32 %v4244_v54, %v11985_v51  ;;  %5932 = vmatpush1.bf16.msra.mxu0 %v9647_v4  ;;  %6158 = vmatpush1.bf16.msra.mxu1 %v9650_v31  ;;  %v4306_v23 = vmax.f32 %v4128_v60, 0.0  ;;  %v4308_v30 = vmax.f32 %v4241_v15, 0.0 }
 0x41e   : > { %v4309_v2 = vmax.f32 %v4130_v22, 0.0  ;;  %v4311_v57 = vmax.f32 %v4243_v6, 0.0  ;;  %5933 = vmatprep.subr.bf16.mxu0 %v9655_v24  ;;  %6159 = vmatprep.subr.bf16.mxu1 %v9658_v50  ;;  %v9662_v24 = vld [vmem:[%s13238_s10 + $0x628] ss:$28 sps:$4 sm:$0xff]  }
 0x41f   : > { %v4310_v25 = vmax.f32 %v4132_v33, 0.0  ;;  %v4312_v47 = vmax.f32 %v4245_v34, 0.0  ;;  %v9670_v22 = vld [vmem:[%s13238_s10 + $0x664] ss:$28 sps:$4 sm:$0xff]  }
 0x420   : > { %v12259_v48 = vpack.c.bf16 %v4309_v2, %v4305_v12  ;;  %v12261_v4 = vpack.c.bf16 %v4311_v57, %v4307_v0  ;;  %v9665_v2 = vld [vmem:[%s13238_s10 + $0x658] ss:$28 sps:$4 sm:$0xff]  }
 0x421   : > { %v12263_v31 = vpack.c.bf16 %v4310_v25, %v4306_v23  ;;  %v12265_v37 = vpack.c.bf16 %v4312_v47, %v4308_v30  ;;  %v4135_v7 = vpop.f32.mrb[124].mxu0  ;;  %v4248_v8 = vpop.f32.mrb[124].mxu1  ;;  %5934 = vmatpush1.bf16.msra.mxu0 %v9653_v9  ;;  %6160 = vmatpush1.bf16.msra.mxu1 %v9656_v10 }
 0x422   : > { %v4136_v50 = vadd.f32 %v4135_v7, %v11976_v28  ;;  %v4249_v60 = vadd.f32 %v4248_v8, %v11979_v29  ;;  %v4137_v15 = vpop.f32.mrb[125].mxu0  ;;  %v4250_v19 = vpop.f32.mrb[125].mxu1  ;;  %5935 = vmatprep.subr.bf16.mxu0 %v9661_v11  ;;  %6161 = vmatprep.subr.bf16.mxu1 %v9664_v41 }
 0x423   : > { %v4138_v6 = vadd.f32 %v4137_v15, %v11982_v26  ;;  %v4251_v53 = vadd.f32 %v4250_v19, %v11985_v51  ;;  %v4139_v54 = vpop.f32.mrb[126].mxu0  ;;  %v4252_v33 = vpop.f32.mrb[126].mxu1  ;;  %5890 = vmatprep.mubr.bf16.mxu0 %v12263_v31  ;;  %6116 = vmatprep.mubr.bf16.mxu1 %v12263_v31  ;;  %v9674_v15 = vld [vmem:[%s13238_s10 + $0x698] ss:$28 sps:$4 sm:$0xff]   ;;  %v9679_v19 = vld [vmem:[%s13238_s10 + $0x6cc] ss:$28 sps:$4 sm:$0xff]  }
 0x424   : > { %v4140_v34 = vadd.f32 %v4139_v54, %v11976_v28  ;;  %v4253_v9 = vadd.f32 %v4252_v33, %v11979_v29  ;;  %v4141_v10 = vpop.f32.mrb[127].mxu0  ;;  %v4254_v11 = vpop.f32.mrb[127].mxu1  ;;  %5891 = vmatmul.mubr.bf16.gmra.mrb[152].mxu0 %v12259_v48  ;;  %6117 = vmatmul.mubr.bf16.gmra.mrb[152].mxu1 %v12259_v48  ;;  %v9668_v28 = vld [vmem:[%s13238_s10 + $0x660] ss:$28 sps:$4 sm:$0xff]   ;;  %v9673_v29 = vld [vmem:[%s13238_s10 + $0x694] ss:$28 sps:$4 sm:$0xff]  }
 0x425   : > { %v4142_v12 = vadd.f32 %v4141_v10, %v11982_v26  ;;  %v4255_v0 = vadd.f32 %v4254_v11, %v11985_v51  ;;  %5936 = vmatpush1.bf16.msra.mxu0 %v9659_v13  ;;  %6162 = vmatpush1.bf16.msra.mxu1 %v9662_v24  ;;  %v4313_v57 = vmax.f32 %v4136_v50, 0.0  ;;  %v4315_v41 = vmax.f32 %v4249_v60, 0.0  ;;  %v9676_v51 = vld [vmem:[%s13238_s10 + $0x69c] ss:$28 sps:$4 sm:$0xff]   ;;  %v9671_v60 = vld [vmem:[%s13238_s10 + $0x690] ss:$28 sps:$4 sm:$0xff]  }
 0x426   : > { %v4317_v23 = vmax.f32 %v4140_v34, 0.0  ;;  %v4319_v26 = vmax.f32 %v4253_v9, 0.0  ;;  %5937 = vmatprep.subr.bf16.mxu0 %v9667_v27  ;;  %6163 = vmatprep.subr.bf16.mxu1 %v9670_v22  ;;  %v4314_v30 = vmax.f32 %v4138_v6, 0.0  ;;  %v4316_v25 = vmax.f32 %v4251_v53, 0.0  ;;  %v9682_v27 = vld [vmem:[%s13238_s10 + $0x6d4] ss:$28 sps:$4 sm:$0xff]  }
 0x427   : > { %v4318_v47 = vmax.f32 %v4142_v12, 0.0  ;;  %v4320_v7 = vmax.f32 %v4255_v0, 0.0  ;;  %v9677_v22 = vld [vmem:[%s13238_s10 + $0x6c8] ss:$28 sps:$4 sm:$0xff]   ;;  %v9680_v6 = vld [vmem:[%s13238_s10 + $0x6d0] ss:$28 sps:$4 sm:$0xff]  }
 0x428   : > { %v12303_v8 = vpack.c.bf16 %v4317_v23, %v4313_v57  ;;  %v12305_v13 = vpack.c.bf16 %v4319_v26, %v4315_v41  ;;  %v9685_v53 = vld [vmem:[%s13238_s10 + $0x14] ss:$28 sps:$4 sm:$0xff]   ;;  %v9690_v9 = vld [vmem:[%s13238_s10 + $0x4c] ss:$28 sps:$4 sm:$0xff]   ;;  %v9693_v12 = vld [vmem:[%s13238_s10 + $0x84] ss:$28 sps:$4 sm:$0xff]  }
 0x429   : > { %v12307_v24 = vpack.c.bf16 %v4318_v47, %v4314_v30  ;;  %v12309_v50 = vpack.c.bf16 %v4320_v7, %v4316_v25  ;;  %5938 = vmatpush1.bf16.msra.mxu0 %v9665_v2  ;;  %6164 = vmatpush1.bf16.msra.mxu1 %v9668_v28  ;;  %v9686_v54 = vld [vmem:[%s13238_s10 + $0x1d8] ss:$28 sps:$4 sm:$0xff]   ;;  %v9683_v33 = vld [vmem:[%s13238_s10 + $0x10] ss:$28 sps:$4 sm:$0xff]   ;;  %v9688_v11 = vld [vmem:[%s13238_s10 + $0x48] ss:$28 sps:$4 sm:$0xff]  }
 0x42a   : > { %5939 = vmatprep.subr.bf16.mxu0 %v9673_v29  ;;  %6165 = vmatprep.subr.bf16.mxu1 %v9676_v51  ;;  %v9687_v34 = vld [vmem:[%s13238_s10 + $0x18] ss:$28 sps:$4 sm:$0xff]   ;;  %v9694_v10 = vld [vmem:[%s13238_s10 + $0x210] ss:$28 sps:$4 sm:$0xff]   ;;  %v9702_v2 = vld [vmem:[%s13238_s10 + $0x248] ss:$28 sps:$4 sm:$0xff]  }
 0x42b   : > { %5900 = vmatprep.mubr.bf16.mxu0 %v12307_v24  ;;  %6126 = vmatprep.mubr.bf16.mxu1 %v12307_v24  ;;  %v9695_v0 = vld [vmem:[%s13238_s10 + $0x50] ss:$28 sps:$4 sm:$0xff]   ;;  %v9691_v28 = vld [vmem:[%s13238_s10 + $0x80] ss:$28 sps:$4 sm:$0xff]   ;;  %v9703_v57 = vld [vmem:[%s13238_s10 + $0x88] ss:$28 sps:$4 sm:$0xff]  }
 0x42c   : > { %5901 = vmatmul.mubr.bf16.gmra.mrb[156].mxu0 %v12303_v8  ;;  %6127 = vmatmul.mubr.bf16.gmra.mrb[156].mxu1 %v12303_v8  ;;  %v9698_v29 = vld [vmem:[%s13238_s10 + $0xbc] ss:$28 sps:$4 sm:$0xff]   ;;  %v9701_v26 = vld [vmem:[%s13238_s10 + $0xf4] ss:$28 sps:$4 sm:$0xff]   ;;  %v9706_v47 = vld [vmem:[%s13238_s10 + $0x12c] ss:$28 sps:$4 sm:$0xff]  }
 0x42d   : > { %5940 = vmatpush1.bf16.msra.mxu0 %v9671_v60  ;;  %5943 = vmatprep.mubr.bf16.mxu0 %v12001_v40  ;;  %v9710_v41 = vld [vmem:[%s13238_s10 + $0x280] ss:$28 sps:$4 sm:$0xff]   ;;  %v9696_v23 = vld [vmem:[%s13238_s10 + $0xb8] ss:$28 sps:$4 sm:$0xff]   ;;  %v9699_v25 = vld [vmem:[%s13238_s10 + $0xf0] ss:$28 sps:$4 sm:$0xff]  }
 0x42e   : > { %6166 = vmatpush1.bf16.msra.mxu1 %v9674_v15  ;;  %6169 = vmatprep.mubr.bf16.mxu1 %v12001_v40  ;;  %v9711_v51 = vld [vmem:[%s13238_s10 + $0xc0] ss:$28 sps:$4 sm:$0xff]   ;;  %v9718_v30 = vld [vmem:[%s13238_s10 + $0x2b8] ss:$28 sps:$4 sm:$0xff]   ;;  %v9726_v60 = vld [vmem:[%s13238_s10 + $0x2f0] ss:$28 sps:$4 sm:$0xff]  }
 0x42f   : > { %5941 = vmatprep.subr.bf16.mxu0 %v9679_v19  ;;  %6167 = vmatprep.subr.bf16.mxu1 %v9682_v27  ;;  %v9719_v7 = vld [vmem:[%s13238_s10 + $0xf8] ss:$28 sps:$4 sm:$0xff]   ;;  %v9704_v15 = vld [vmem:[%s13238_s10 + $0x128] ss:$28 sps:$4 sm:$0xff]   ;;  %v9727_v27 = vld [vmem:[%s13238_s10 + $0x130] ss:$28 sps:$4 sm:$0xff]  }
 0x430   : > { %v9709_v19 = vld [vmem:[%s13238_s10 + $0x164] ss:$28 sps:$4 sm:$0xff]  }
 0x431   : > { %5942 = vmatpush1.bf16.msra.mxu0 %v9677_v22  ;;  %v9734_v22 = vld [vmem:[%s13238_s10 + $0x328] ss:$28 sps:$4 sm:$0xff]  }
 0x432   : > { %6168 = vmatpush1.bf16.msra.mxu1 %v9680_v6  ;;  %6250 = vmatprep.subr.bf16.mxu0 %v9685_v53  ;;  %v9707_v6 = vld [vmem:[%s13238_s10 + $0x160] ss:$28 sps:$4 sm:$0xff]  }
 0x433   : > { %8537 = vmatprep.subr.bf16.mxu1 %v9686_v54  ;;  %v9714_v53 = vld [vmem:[%s13238_s10 + $0x19c] ss:$28 sps:$4 sm:$0xff]   ;;  %v9735_v54 = vld [vmem:[%s13238_s10 + $0x168] ss:$28 sps:$4 sm:$0xff]  }
 0x434   : > { %5944 = vmatmul.mubr.bf16.vlgmr.msra.gmra.mrb[128].mxu0 %v11997_v38 }
 0x435   : > { %6170 = vmatmul.mubr.bf16.vlgmr.msra.gmra.mrb[128].mxu1 %v11997_v38  ;;  %5953 = vmatprep.mubr.bf16.mxu0 %v12045_v36 }
 0x436   : > { %6179 = vmatprep.mubr.bf16.mxu1 %v12045_v36  ;;  %6251 = vmatpush1.bf16.msra.mxu0 %v9683_v33  ;;  %v9742_v33 = vld [vmem:[%s13238_s10 + $0x360] ss:$28 sps:$4 sm:$0xff]  }
 0x437   : > { %8538 = vmatpush3.bf16.msra.mxu1 %v9687_v34  ;;  %6252 = vmatprep.subr.bf16.mxu0 %v9690_v9  ;;  %v9712_v34 = vld [vmem:[%s13238_s10 + $0x198] ss:$28 sps:$4 sm:$0xff]  }
 0x438   : > { %8539 = vmatprep.subr.bf16.mxu1 %v9694_v10  ;;  %v9717_v9 = vld [vmem:[%s13238_s10 + $0x1d4] ss:$28 sps:$4 sm:$0xff]   ;;  %v9743_v10 = vld [vmem:[%s13238_s10 + $0x1a0] ss:$28 sps:$4 sm:$0xff]  }
 0x43a   : > { %6253 = vmatpush1.bf16.msra.mxu0 %v9688_v11  ;;  %v9750_v11 = vld [vmem:[%s13238_s10 + $0x558] ss:$28 sps:$4 sm:$0xff]  }
 0x43b   : > { %6254 = vmatprep.subr.bf16.mxu0 %v9693_v12  ;;  %8540 = vmatpush3.bf16.msra.mxu1 %v9695_v0  ;;  %v9715_v12 = vld [vmem:[%s13238_s10 + $0x1d0] ss:$28 sps:$4 sm:$0xff]  }
 0x43c   : > { %5954 = vmatmul.mubr.bf16.gmra.mrb[132].mxu0 %v12041_v58  ;;  %8541 = vmatprep.subr.bf16.mxu1 %v9702_v2  ;;  %v9722_v0 = vld [vmem:[%s13238_s10 + $0x20c] ss:$28 sps:$4 sm:$0xff]  }
 0x43d   : > { %6180 = vmatmul.mubr.bf16.gmra.mrb[132].mxu1 %v12041_v58  ;;  %5963 = vmatprep.mubr.bf16.mxu0 %v12089_v14  ;;  %v9720_v2 = vld [vmem:[%s13238_s10 + $0x208] ss:$28 sps:$4 sm:$0xff]  }
 0x43e   : > { %6189 = vmatprep.mubr.bf16.mxu1 %v12089_v14  ;;  %6255 = vmatpush1.bf16.msra.mxu0 %v9691_v28  ;;  %v9725_v28 = vld [vmem:[%s13238_s10 + $0x244] ss:$28 sps:$4 sm:$0xff]  }
 0x43f   : > { %6256 = vmatprep.subr.bf16.mxu0 %v9698_v29  ;;  %8542 = vmatpush3.bf16.msra.mxu1 %v9703_v57  ;;  %v9723_v29 = vld [vmem:[%s13238_s10 + $0x240] ss:$28 sps:$4 sm:$0xff]  }
 0x440   : > { %8543 = vmatprep.subr.bf16.mxu1 %v9710_v41  ;;  %v9730_v57 = vld [vmem:[%s13238_s10 + $0x27c] ss:$28 sps:$4 sm:$0xff]  }
 0x441   : > { %v9728_v41 = vld [vmem:[%s13238_s10 + $0x278] ss:$28 sps:$4 sm:$0xff]  }
 0x442   : > { %6257 = vmatpush1.bf16.msra.mxu0 %v9696_v23  ;;  %v9733_v23 = vld [vmem:[%s13238_s10 + $0x2b4] ss:$28 sps:$4 sm:$0xff]  }
 0x443   : > { %6258 = vmatprep.subr.bf16.mxu0 %v9701_v26  ;;  %8544 = vmatpush3.bf16.msra.mxu1 %v9711_v51  ;;  %v9731_v26 = vld [vmem:[%s13238_s10 + $0x2b0] ss:$28 sps:$4 sm:$0xff]  }
 0x444   : > { %5964 = vmatmul.mubr.bf16.gmra.mrb[136].mxu0 %v12085_v49  ;;  %8545 = vmatprep.subr.bf16.mxu1 %v9718_v30  ;;  %v9738_v51 = vld [vmem:[%s13238_s10 + $0x2ec] ss:$28 sps:$4 sm:$0xff]  }
 0x445   : > { %6190 = vmatmul.mubr.bf16.gmra.mrb[136].mxu1 %v12085_v49  ;;  %5973 = vmatprep.mubr.bf16.mxu0 %v12133_v62  ;;  %v9736_v30 = vld [vmem:[%s13238_s10 + $0x2e8] ss:$28 sps:$4 sm:$0xff]  }
 0x446   : > { %6199 = vmatprep.mubr.bf16.mxu1 %v12133_v62  ;;  %6259 = vmatpush1.bf16.msra.mxu0 %v9699_v25  ;;  %v9741_v25 = vld [vmem:[%s13238_s10 + $0x324] ss:$28 sps:$4 sm:$0xff]  }
 0x447   : > { %6260 = vmatprep.subr.bf16.mxu0 %v9706_v47  ;;  %8546 = vmatpush3.bf16.msra.mxu1 %v9719_v7  ;;  %v9739_v47 = vld [vmem:[%s13238_s10 + $0x320] ss:$28 sps:$4 sm:$0xff]  }
 0x448   : > { %8547 = vmatprep.subr.bf16.mxu1 %v9726_v60  ;;  %v9746_v7 = vld [vmem:[%s13238_s10 + $0x35c] ss:$28 sps:$4 sm:$0xff]  }
 0x449   : > { %v9744_v60 = vld [vmem:[%s13238_s10 + $0x358] ss:$28 sps:$4 sm:$0xff]  }
 0x44a   : > { %6261 = vmatpush1.bf16.msra.mxu0 %v9704_v15  ;;  %v9749_v15 = vld [vmem:[%s13238_s10 + $0x394] ss:$28 sps:$4 sm:$0xff]  }
 0x44b   : > { %6262 = vmatprep.subr.bf16.mxu0 %v9709_v19  ;;  %8548 = vmatpush3.bf16.msra.mxu1 %v9727_v27  ;;  %v9747_v19 = vld [vmem:[%s13238_s10 + $0x390] ss:$28 sps:$4 sm:$0xff]   ;;  %v9751_v27 = vld [vmem:[%s13238_s10 + $0x398] ss:$28 sps:$4 sm:$0xff]  }
 0x44c   : > { %5974 = vmatmul.mubr.bf16.gmra.mrb[140].mxu0 %v12129_v55  ;;  %8549 = vmatprep.subr.bf16.mxu1 %v9734_v22  ;;  %v9758_v22 = vld [vmem:[%s13238_s10 + $0x590] ss:$28 sps:$4 sm:$0xff]  }
 0x44d   : > { %6200 = vmatmul.mubr.bf16.gmra.mrb[140].mxu1 %v12129_v55  ;;  %5983 = vmatprep.mubr.bf16.mxu0 %v12177_v5 }
 0x44e   : > { %6209 = vmatprep.mubr.bf16.mxu1 %v12177_v5  ;;  %6263 = vmatpush1.bf16.msra.mxu0 %v9707_v6  ;;  %v9752_v6 = vld [vmem:[%s13238_s10 + $0x3c8] ss:$28 sps:$4 sm:$0xff]  }
 0x44f   : > { %6264 = vmatprep.subr.bf16.mxu0 %v9714_v53  ;;  %8550 = vmatpush3.bf16.msra.mxu1 %v9735_v54  ;;  %v9757_v53 = vld [vmem:[%s13238_s10 + $0x404] ss:$28 sps:$4 sm:$0xff]   ;;  %v9759_v54 = vld [vmem:[%s13238_s10 + $0x3d0] ss:$28 sps:$4 sm:$0xff]  }
 0x450   : > { %8551 = vmatprep.subr.bf16.mxu1 %v9742_v33  ;;  %v9762_v33 = vld [vmem:[%s13238_s10 + $0x43c] ss:$28 sps:$4 sm:$0xff]  }
 0x452   : > { %6265 = vmatpush1.bf16.msra.mxu0 %v9712_v34  ;;  %v9767_v34 = vld [vmem:[%s13238_s10 + $0x408] ss:$28 sps:$4 sm:$0xff]  }
 0x453   : > { %6266 = vmatprep.subr.bf16.mxu0 %v9717_v9  ;;  %8552 = vmatpush3.bf16.msra.mxu1 %v9743_v10  ;;  %v9774_v9 = vld [vmem:[%s13238_s10 + $0x600] ss:$28 sps:$4 sm:$0xff]   ;;  %v9760_v10 = vld [vmem:[%s13238_s10 + $0x438] ss:$28 sps:$4 sm:$0xff]  }
 0x454   : > { %5984 = vmatmul.mubr.bf16.gmra.mrb[144].mxu0 %v12173_v45  ;;  %8601 = vmatprep.subr.bf16.mxu1 %v9750_v11  ;;  %v9765_v11 = vld [vmem:[%s13238_s10 + $0x474] ss:$28 sps:$4 sm:$0xff]  }
 0x455   : > { %6210 = vmatmul.mubr.bf16.gmra.mrb[144].mxu1 %v12173_v45  ;;  %5993 = vmatprep.mubr.bf16.mxu0 %v12221_v46 }
 0x456   : > { %6219 = vmatprep.mubr.bf16.mxu1 %v12221_v46  ;;  %6267 = vmatpush1.bf16.msra.mxu0 %v9715_v12  ;;  %v9763_v12 = vld [vmem:[%s13238_s10 + $0x470] ss:$28 sps:$4 sm:$0xff]  }
 0x457   : > { %6268 = vmatprep.subr.bf16.mxu0 %v9722_v0  ;;  %v9782_v0 = vld [vmem:[%s13238_s10 + $0x638] ss:$28 sps:$4 sm:$0xff]  }
 0x45a   : > { %6269 = vmatpush1.bf16.msra.mxu0 %v9720_v2  ;;  %v9783_v2 = vld [vmem:[%s13238_s10 + $0x478] ss:$28 sps:$4 sm:$0xff]  }
 0x45b   : > { %6270 = vmatprep.subr.bf16.mxu0 %v9725_v28  ;;  %v9768_v28 = vld [vmem:[%s13238_s10 + $0x4a8] ss:$28 sps:$4 sm:$0xff]  }
 0x45c   : > { %5994 = vmatmul.mubr.bf16.gmra.mrb[148].mxu0 %v12217_v42 }
 0x45d   : > { %6220 = vmatmul.mubr.bf16.gmra.mrb[148].mxu1 %v12217_v42  ;;  %6003 = vmatprep.mubr.bf16.mxu0 %v12265_v37 }
 0x45e   : > { %6229 = vmatprep.mubr.bf16.mxu1 %v12265_v37  ;;  %6271 = vmatpush1.bf16.msra.mxu0 %v9723_v29  ;;  %v9790_v29 = vld [vmem:[%s13238_s10 + $0x670] ss:$28 sps:$4 sm:$0xff]  }
 0x45f   : > { %6272 = vmatprep.subr.bf16.mxu0 %v9730_v57  ;;  %v9771_v57 = vld [vmem:[%s13238_s10 + $0x4e0] ss:$28 sps:$4 sm:$0xff]  }
 0x462   : > { %6273 = vmatpush1.bf16.msra.mxu0 %v9728_v41  ;;  %v9778_v41 = vld [vmem:[%s13238_s10 + $0x51c] ss:$28 sps:$4 sm:$0xff]  }
 0x463   : > { %6274 = vmatprep.subr.bf16.mxu0 %v9733_v23  ;;  %v9798_v23 = vld [vmem:[%s13238_s10 + $0x6a8] ss:$28 sps:$4 sm:$0xff]  }
 0x464   : > { %6004 = vmatmul.mubr.bf16.gmra.mrb[152].mxu0 %v12261_v4 }
 0x465   : > { %6230 = vmatmul.mubr.bf16.gmra.mrb[152].mxu1 %v12261_v4  ;;  %6013 = vmatprep.mubr.bf16.mxu0 %v12309_v50 }
 0x466   : > { %6239 = vmatprep.mubr.bf16.mxu1 %v12309_v50  ;;  %6275 = vmatpush1.bf16.msra.mxu0 %v9731_v26  ;;  %v9776_v26 = vld [vmem:[%s13238_s10 + $0x518] ss:$28 sps:$4 sm:$0xff]  }
 0x467   : > { %6276 = vmatprep.subr.bf16.mxu0 %v9738_v51  ;;  %v9781_v51 = vld [vmem:[%s13238_s10 + $0x554] ss:$28 sps:$4 sm:$0xff]  }
 0x46a   : > { %6277 = vmatpush1.bf16.msra.mxu0 %v9736_v30  ;;  %v9779_v30 = vld [vmem:[%s13238_s10 + $0x550] ss:$28 sps:$4 sm:$0xff]  }
 0x46b   : > { %6278 = vmatprep.subr.bf16.mxu0 %v9741_v25  ;;  %v9806_v25 = vld [vmem:[%s13238_s10 + $0x6e0] ss:$28 sps:$4 sm:$0xff]  }
 0x46c   : > { %6014 = vmatmul.mubr.bf16.gmra.mrb[156].mxu0 %v12305_v13 }
 0x46d   : > { %6240 = vmatmul.mubr.bf16.gmra.mrb[156].mxu1 %v12305_v13  ;;  %6282 = vmatprep.mubr.bf16.mxu0 %v11999_v39 }
 0x46e   : > { %6279 = vmatpush1.bf16.msra.mxu0 %v9739_v47  ;;  %6508 = vmatprep.mubr.bf16.mxu1 %v11999_v39  ;;  %v9754_v39 = vld [vmem:[%s13238_s10 + $0x3cc] ss:$28 sps:$4 sm:$0xff]   ;;  %v9807_v47 = vld [vmem:[%s13238_s10 + $0x520] ss:$28 sps:$4 sm:$0xff]  }
 0x46f   : > { %6280 = vmatprep.subr.bf16.mxu0 %v9746_v7  ;;  %v9784_v7 = vld [vmem:[%s13238_s10 + $0x588] ss:$28 sps:$4 sm:$0xff]  }
 0x472   : > { %6281 = vmatpush1.bf16.msra.mxu0 %v9744_v60  ;;  %v9789_v60 = vld [vmem:[%s13238_s10 + $0x5c4] ss:$28 sps:$4 sm:$0xff]  }
 0x473   : > { %6363 = vmatprep.subr.bf16.mxu0 %v9749_v15  ;;  %v9794_v15 = vld [vmem:[%s13238_s10 + $0x5fc] ss:$28 sps:$4 sm:$0xff]  }
 0x475   : > { %6283 = vmatmul.mubr.bf16.vlgmr.msra.gmra.mrb[160].mxu0 %v11995_v32  ;;  %6509 = vmatmul.mubr.bf16.vlgmr.msra.gmra.mrb[160].mxu1 %v11995_v32  ;;  %v9766_v32 = vld [vmem:[%s13238_s10 + $0x5c8] ss:$28 sps:$4 sm:$0xff]  }
 0x476   : > { %6292 = vmatprep.mubr.bf16.mxu0 %v12043_v35  ;;  %6364 = vmatpush1.bf16.msra.mxu0 %v9747_v19  ;;  %v9797_v19 = vld [vmem:[%s13238_s10 + $0x634] ss:$28 sps:$4 sm:$0xff]  }
 0x477   : > { %6516 = vmatprep.mubr.bf16.mxu1 %v12043_v35  ;;  %8602 = vmatpush3.bf16.msra.mxu1 %v9751_v27  ;;  %v9755_v35 = vld [vmem:[%s13238_s10 + $0x400] ss:$28 sps:$4 sm:$0xff]   ;;  %v9795_v27 = vld [vmem:[%s13238_s10 + $0x630] ss:$28 sps:$4 sm:$0xff]  }
 0x478   : > { %6365 = vmatprep.subr.bf16.mxu0 %v9754_v39  ;;  %8603 = vmatprep.subr.bf16.mxu1 %v9758_v22  ;;  %v9805_v39 = vld [vmem:[%s13238_s10 + $0x6a4] ss:$28 sps:$4 sm:$0xff]  }
 0x479   : > { %v9803_v22 = vld [vmem:[%s13238_s10 + $0x6a0] ss:$28 sps:$4 sm:$0xff]  }
 0x47a   : > { %6366 = vmatpush1.bf16.msra.mxu0 %v9752_v6 }
 0x47b   : > { %6367 = vmatprep.subr.bf16.mxu0 %v9757_v53  ;;  %8604 = vmatpush3.bf16.msra.mxu1 %v9759_v54 }
 0x47c   : > { %8605 = vmatprep.subr.bf16.mxu1 %v9766_v32 }
 0x47d   : > { %6293 = vmatmul.mubr.bf16.gmra.mrb[164].mxu0 %v12039_v56  ;;  %6517 = vmatmul.mubr.bf16.gmra.mrb[164].mxu1 %v12039_v56  ;;  %v9775_v56 = vld [vmem:[%s13238_s10 + $0x440] ss:$28 sps:$4 sm:$0xff]  }
 0x47e   : > { %6302 = vmatprep.mubr.bf16.mxu0 %v12087_v61  ;;  %6368 = vmatpush1.bf16.msra.mxu0 %v9755_v35 }
 0x47f   : > { %6524 = vmatprep.mubr.bf16.mxu1 %v12087_v61  ;;  %6369 = vmatprep.subr.bf16.mxu0 %v9762_v33  ;;  %v9770_v61 = vld [vmem:[%s13238_s10 + $0x4ac] ss:$28 sps:$4 sm:$0xff]  }
 0x480   : > { %8606 = vmatpush3.bf16.msra.mxu1 %v9767_v34 }
 0x481   : > { %8607 = vmatprep.subr.bf16.mxu1 %v9774_v9 }
 0x482   : > { %6370 = vmatpush1.bf16.msra.mxu0 %v9760_v10 }
 0x483   : > { %6371 = vmatprep.subr.bf16.mxu0 %v9765_v11 }
 0x484   : > { %8608 = vmatpush3.bf16.msra.mxu1 %v9775_v56 }
 0x485   : > { %6303 = vmatmul.mubr.bf16.gmra.mrb[168].mxu0 %v12083_v63  ;;  %6525 = vmatmul.mubr.bf16.gmra.mrb[168].mxu1 %v12083_v63  ;;  %v9773_v63 = vld [vmem:[%s13238_s10 + $0x4e4] ss:$28 sps:$4 sm:$0xff]  }
 0x486   : > { %6312 = vmatprep.mubr.bf16.mxu0 %v12131_v59  ;;  %6372 = vmatpush1.bf16.msra.mxu0 %v9763_v12 }
 0x487   : > { %6532 = vmatprep.mubr.bf16.mxu1 %v12131_v59  ;;  %6373 = vmatprep.subr.bf16.mxu0 %v9770_v61  ;;  %v9791_v59 = vld [vmem:[%s13238_s10 + $0x4b0] ss:$28 sps:$4 sm:$0xff]  }
 0x488   : > { %8609 = vmatprep.subr.bf16.mxu1 %v9782_v0 }
 0x489   : > { %8610 = vmatpush3.bf16.msra.mxu1 %v9783_v2 }
 0x48a   : > { %6374 = vmatpush1.bf16.msra.mxu0 %v9768_v28  ;;  %8611 = vmatprep.subr.bf16.mxu1 %v9790_v29 }
 0x48b   : > { %6375 = vmatprep.subr.bf16.mxu0 %v9773_v63 }
 0x48d   : > { %6313 = vmatmul.mubr.bf16.gmra.mrb[172].mxu0 %v12127_v1  ;;  %6533 = vmatmul.mubr.bf16.gmra.mrb[172].mxu1 %v12127_v1  ;;  %v9799_v1 = vld [vmem:[%s13238_s10 + $0x4e8] ss:$28 sps:$4 sm:$0xff]  }
 0x48e   : > { %6322 = vmatprep.mubr.bf16.mxu0 %v12175_v3  ;;  %6376 = vmatpush1.bf16.msra.mxu0 %v9771_v57 }
 0x48f   : > { %6540 = vmatprep.mubr.bf16.mxu1 %v12175_v3  ;;  %6377 = vmatprep.subr.bf16.mxu0 %v9778_v41  ;;  %v9786_v3 = vld [vmem:[%s13238_s10 + $0x58c] ss:$28 sps:$4 sm:$0xff]  }
 0x490   : > { %8612 = vmatpush3.bf16.msra.mxu1 %v9791_v59 }
 0x491   : > { %8613 = vmatprep.subr.bf16.mxu1 %v9798_v23 }
 0x492   : > { %6378 = vmatpush1.bf16.msra.mxu0 %v9776_v26 }
 0x493   : > { %6379 = vmatprep.subr.bf16.mxu0 %v9781_v51 }
 0x494   : > { %8614 = vmatpush3.bf16.msra.mxu1 %v9799_v1 }
 0x495   : > { %6323 = vmatmul.mubr.bf16.gmra.mrb[176].mxu0 %v12171_v44  ;;  %6541 = vmatmul.mubr.bf16.gmra.mrb[176].mxu1 %v12171_v44  ;;  %v9787_v44 = vld [vmem:[%s13238_s10 + $0x5c0] ss:$28 sps:$4 sm:$0xff]  }
 0x496   : > { %6332 = vmatprep.mubr.bf16.mxu0 %v12219_v43  ;;  %6380 = vmatpush1.bf16.msra.mxu0 %v9779_v30 }
 0x497   : > { %6548 = vmatprep.mubr.bf16.mxu1 %v12219_v43  ;;  %6381 = vmatprep.subr.bf16.mxu0 %v9786_v3  ;;  %v9792_v43 = vld [vmem:[%s13238_s10 + $0x5f8] ss:$28 sps:$4 sm:$0xff]  }
 0x498   : > { %8615 = vmatprep.subr.bf16.mxu1 %v9806_v25 }
 0x499   : > { %8616 = vmatpush3.bf16.msra.mxu1 %v9807_v47 }
 0x49a   : > { %6382 = vmatpush1.bf16.msra.mxu0 %v9784_v7 }
 0x49b   : > { %6383 = vmatprep.subr.bf16.mxu0 %v9789_v60 }
 0x49d   : > { %6333 = vmatmul.mubr.bf16.gmra.mrb[180].mxu0 %v12215_v52  ;;  %6549 = vmatmul.mubr.bf16.gmra.mrb[180].mxu1 %v12215_v52  ;;  %v9802_v52 = vld [vmem:[%s13238_s10 + $0x66c] ss:$28 sps:$4 sm:$0xff]  }
 0x49e   : > { %6342 = vmatprep.mubr.bf16.mxu0 %v12263_v31  ;;  %6384 = vmatpush1.bf16.msra.mxu0 %v9787_v44 }
 0x49f   : > { %6556 = vmatprep.mubr.bf16.mxu1 %v12263_v31  ;;  %6385 = vmatprep.subr.bf16.mxu0 %v9794_v15  ;;  %v9800_v31 = vld [vmem:[%s13238_s10 + $0x668] ss:$28 sps:$4 sm:$0xff]  }
 0x4a2   : > { %6386 = vmatpush1.bf16.msra.mxu0 %v9792_v43 }
 0x4a3   : > { %6387 = vmatprep.subr.bf16.mxu0 %v9797_v19 }
 0x4a5   : > { %6343 = vmatmul.mubr.bf16.gmra.mrb[184].mxu0 %v12259_v48  ;;  %6557 = vmatmul.mubr.bf16.gmra.mrb[184].mxu1 %v12259_v48  ;;  %v9810_v48 = vld [vmem:[%s13238_s10 + $0x6dc] ss:$28 sps:$4 sm:$0xff]  }
 0x4a6   : > { %6352 = vmatprep.mubr.bf16.mxu0 %v12307_v24  ;;  %6388 = vmatpush1.bf16.msra.mxu0 %v9795_v27 }
 0x4a7   : > { %6564 = vmatprep.mubr.bf16.mxu1 %v12307_v24  ;;  %6389 = vmatprep.subr.bf16.mxu0 %v9802_v52  ;;  %v9808_v24 = vld [vmem:[%s13238_s10 + $0x6d8] ss:$28 sps:$4 sm:$0xff]  }
 0x4aa   : > { %6390 = vmatpush1.bf16.msra.mxu0 %v9800_v31 }
 0x4ab   : > { %6391 = vmatprep.subr.bf16.mxu0 %v9805_v39 }
 0x4ad   : > { %6353 = vmatmul.mubr.bf16.gmra.mrb[188].mxu0 %v12303_v8  ;;  %6565 = vmatmul.mubr.bf16.gmra.mrb[188].mxu1 %v12303_v8 }
 0x4ae   : > { %6392 = vmatpush1.bf16.msra.mxu0 %v9803_v22  ;;  %6395 = vmatprep.mubr.bf16.mxu0 %v12001_v40 }
 0x4af   : > { %6605 = vmatprep.mubr.bf16.mxu1 %v12001_v40  ;;  %6393 = vmatprep.subr.bf16.mxu0 %v9810_v48 }
 0x4b2   : > { %6394 = vmatpush1.bf16.msra.mxu0 %v9808_v24 }
 0x4b5   : > { %6396 = vmatmul.mubr.bf16.vlgmr.msra.gmra.mrb[160].mxu0 %v11997_v38  ;;  %6606 = vmatmul.mubr.bf16.vlgmr.msra.gmra.mrb[192].mxu1 %v11997_v38  ;;  %v4609_v38 = vld [vmem:[%s13239_s11] sm:$0x7f] }
 0x4b6   : > { %6405 = vmatprep.mubr.bf16.mxu0 %v12045_v36  ;;  %6613 = vmatprep.mubr.bf16.mxu1 %v12045_v36  ;;  %v12721_v40 = vrot.slane %v4609_v38, %v11233_v17  ;;  %v12727_v36 = vrot.slane %v4609_v38, %v11242_v20 }
 0x4bd   : > { %6406 = vmatmul.mubr.bf16.gmra.mrb[164].mxu0 %v12041_v58  ;;  %6614 = vmatmul.mubr.bf16.gmra.mrb[196].mxu1 %v12041_v58  ;;  %v12724_v58 = vrot.slane %v4609_v38, %v11236_v18 }
 0x4be   : > { %6415 = vmatprep.mubr.bf16.mxu0 %v12089_v14  ;;  %6621 = vmatprep.mubr.bf16.mxu1 %v12089_v14 }
 0x4c5   : > { %6416 = vmatmul.mubr.bf16.gmra.mrb[168].mxu0 %v12085_v49  ;;  %6622 = vmatmul.mubr.bf16.gmra.mrb[200].mxu1 %v12085_v49  ;;  %v12730_v49 = vrot.slane %v4609_v38, %v11245_v21 }
 0x4c6   : > { %6425 = vmatprep.mubr.bf16.mxu0 %v12133_v62  ;;  %6629 = vmatprep.mubr.bf16.mxu1 %v12133_v62 }
 0x4cd   : > { %6426 = vmatmul.mubr.bf16.gmra.mrb[172].mxu0 %v12129_v55  ;;  %6630 = vmatmul.mubr.bf16.gmra.mrb[204].mxu1 %v12129_v55 }
 0x4ce   : > { %6435 = vmatprep.mubr.bf16.mxu0 %v12177_v5  ;;  %6637 = vmatprep.mubr.bf16.mxu1 %v12177_v5 }
 0x4d5   : > { %6436 = vmatmul.mubr.bf16.gmra.mrb[176].mxu0 %v12173_v45  ;;  %6638 = vmatmul.mubr.bf16.gmra.mrb[208].mxu1 %v12173_v45 }
 0x4d6   : > { %6445 = vmatprep.mubr.bf16.mxu0 %v12221_v46  ;;  %6645 = vmatprep.mubr.bf16.mxu1 %v12221_v46 }
 0x4dd   : > { %6446 = vmatmul.mubr.bf16.gmra.mrb[180].mxu0 %v12217_v42  ;;  %6646 = vmatmul.mubr.bf16.gmra.mrb[212].mxu1 %v12217_v42 }
 0x4de   : > { %6455 = vmatprep.mubr.bf16.mxu0 %v12265_v37  ;;  %6653 = vmatprep.mubr.bf16.mxu1 %v12265_v37 }
 0x4e5   : > { %6456 = vmatmul.mubr.bf16.gmra.mrb[184].mxu0 %v12261_v4  ;;  %6654 = vmatmul.mubr.bf16.gmra.mrb[216].mxu1 %v12261_v4 }
 0x4e6   : > { %6465 = vmatprep.mubr.bf16.mxu0 %v12309_v50  ;;  %6661 = vmatprep.mubr.bf16.mxu1 %v12309_v50 }
 0x4ed   : > { %6466 = vmatmul.mubr.bf16.gmra.mrb[188].mxu0 %v12305_v13  ;;  %6662 = vmatmul.mubr.bf16.gmra.mrb[220].mxu1 %v12305_v13 }
 0x507   : > { %v5945_v14 = vpop.f32.mrb[128].mxu0 }
 0x508   : > { %v8729_v55 = vadd.f32 %v5945_v14, %v12721_v40  ;;  %v6171_v62 = vpop.f32.mrb[128].mxu1  ;;  %v5947_v45 = vpop.f32.mrb[129].mxu0 }
 0x509   : > { %v8761_v5 = vadd.f32 %v6171_v62, %v12724_v58  ;;  %v8730_v42 = vadd.f32 %v5947_v45, %v12727_v36  ;;  %v6173_v17 = vpop.f32.mrb[129].mxu1  ;;  %v5949_v46 = vpop.f32.mrb[130].mxu0 }
 0x50a   : > { %v8167_v4 = vmul.f32 -1.442695, %v8729_v55  ;;  %v8762_v18 = vadd.f32 %v6173_v17, %v12730_v49  ;;  %v8731_v20 = vadd.f32 %v5949_v46, %v12721_v40  ;;  %v6175_v37 = vpop.f32.mrb[130].mxu1  ;;  %v5951_v8 = vpop.f32.mrb[131].mxu0 }
 0x50b   : > { %v8169_v21 = vmul.f32 -1.442695, %v8761_v5  ;;  %v8168_v13 = vmul.f32 -1.442695, %v8730_v42  ;;  %v8763_v50 = vadd.f32 %v6175_v37, %v12724_v58  ;;  %v8732_v6 = vadd.f32 %v5951_v8, %v12727_v36  ;;  %v6177_v53 = vpop.f32.mrb[131].mxu1 }
 0x50c   : > { %9843 = vpow2.f32 %v8167_v4  ;;  %v8170_v54 = vmul.f32 -1.442695, %v8762_v18  ;;  %v8174_v32 = vmul.f32 -1.442695, %v8731_v20  ;;  %v8764_v35 = vadd.f32 %v6177_v53, %v12730_v49 }
 0x50d   : > { %9845 = vpow2.f32 %v8169_v21  ;;  %v8176_v33 = vmul.f32 -1.442695, %v8763_v50  ;;  %v8175_v34 = vmul.f32 -1.442695, %v8732_v6 }
 0x50e   : > { %9847 = vpow2.f32 %v8168_v13  ;;  %v8177_v9 = vmul.f32 -1.442695, %v8764_v35 }
 0x50f   : > { %9849 = vpow2.f32 %v8170_v54  ;;  %v5955_v10 = vpop.f32.mrb[132].mxu0 }
 0x510   : > { %9851 = vpow2.f32 %v8174_v32  ;;  %v8733_v11 = vadd.f32 %v5955_v10, %v12721_v40  ;;  %v6181_v56 = vpop.f32.mrb[132].mxu1  ;;  %v5957_v12 = vpop.f32.mrb[133].mxu0 }
 0x511   : > { %9853 = vpow2.f32 %v8176_v33  ;;  %v8765_v61 = vadd.f32 %v6181_v56, %v12724_v58  ;;  %v8734_v0 = vadd.f32 %v5957_v12, %v12727_v36  ;;  %v6183_v2 = vpop.f32.mrb[133].mxu1  ;;  %v5959_v28 = vpop.f32.mrb[134].mxu0 }
 0x512   : > { %9855 = vpow2.f32 %v8175_v34  ;;  %v8181_v29 = vmul.f32 -1.442695, %v8733_v11  ;;  %v8766_v63 = vadd.f32 %v6183_v2, %v12730_v49  ;;  %v8735_v57 = vadd.f32 %v5959_v28, %v12721_v40  ;;  %v6185_v41 = vpop.f32.mrb[134].mxu1  ;;  %v5961_v59 = vpop.f32.mrb[135].mxu0 }
 0x513   : > { %9857 = vpow2.f32 %v8177_v9  ;;  %v8183_v23 = vmul.f32 -1.442695, %v8765_v61  ;;  %v8182_v26 = vmul.f32 -1.442695, %v8734_v0  ;;  %v6187_v51 = vpop.f32.mrb[135].mxu1  ;;  %v8767_v4 = vadd.f32 %v6185_v41, %v12724_v58 }
 0x514   : > { %9859 = vpow2.f32 %v8181_v29  ;;  %v8184_v1 = vmul.f32 -1.442695, %v8766_v63  ;;  %v8188_v30 = vmul.f32 -1.442695, %v8735_v57  ;;  %v8736_v37 = vadd.f32 %v5961_v59, %v12727_v36 }
 0x515   : > { %9861 = vpow2.f32 %v8183_v23  ;;  %v8768_v50 = vadd.f32 %v6187_v51, %v12730_v49  ;;  %v8190_v11 = vmul.f32 -1.442695, %v8767_v4 }
 0x516   : > { %v9844_v3 = vpop.eup %9843  ;;  %9863 = vpow2.f32 %v8182_v26  ;;  %v8189_v28 = vmul.f32 -1.442695, %v8736_v37 }
 0x517   : > { %v9846_v25 = vpop.eup %9845  ;;  %v7006_v47 = vadd.f32 1.0, %v9844_v3  ;;  %9865 = vpow2.f32 %v8184_v1  ;;  %v5965_v7 = vpop.f32.mrb[136].mxu0  ;;  %v8191_v41 = vmul.f32 -1.442695, %v8768_v50 }
 0x518   : > { %v9848_v60 = vpop.eup %9847  ;;  %v7008_v44 = vadd.f32 1.0, %v9846_v25  ;;  %9867 = vpow2.f32 %v8188_v30  ;;  %v6191_v15 = vpop.f32.mrb[136].mxu1  ;;  %v8737_v35 = vadd.f32 %v5965_v7, %v12721_v40 }
 0x519   : > { %v5967_v43 = vpop.f32.mrb[137].mxu0  ;;  %v9850_v19 = vpop.eup %9849  ;;  %9869 = vrcp.f32 %v7006_v47  ;;  %v7007_v27 = vadd.f32 1.0, %v9848_v60  ;;  %v8769_v56 = vadd.f32 %v6191_v15, %v12724_v58 }
 0x51a   : > { %v6193_v52 = vpop.f32.mrb[137].mxu1  ;;  %v5969_v31 = vpop.f32.mrb[138].mxu0  ;;  %9871 = vrcp.f32 %v7008_v44  ;;  %v7009_v22 = vadd.f32 1.0, %v9850_v19  ;;  %v8738_v29 = vadd.f32 %v5967_v43, %v12727_v36  ;;  %v8195_v26 = vmul.f32 -1.442695, %v8737_v35 }
 0x51b   : > { %v9852_v39 = vpop.eup %9851  ;;  %v6195_v48 = vpop.f32.mrb[138].mxu1  ;;  %9873 = vrcp.f32 %v7007_v27  ;;  %v8770_v59 = vadd.f32 %v6193_v52, %v12730_v49  ;;  %v8739_v51 = vadd.f32 %v5969_v31, %v12721_v40  ;;  %v8197_v30 = vmul.f32 -1.442695, %v8769_v56 }
 0x51c   : > { %v12745_v24 = vpop.f32.mrb[139].mxu0  ;;  %v9854_v38 = vpop.eup %9853  ;;  %v7013_v14 = vadd.f32 1.0, %v9852_v39  ;;  %9875 = vrcp.f32 %v7009_v22  ;;  %v8771_v3 = vadd.f32 %v6195_v48, %v12724_v58  ;;  %v8196_v47 = vmul.f32 -1.442695, %v8738_v29 }
 0x51d   : > { %v12747_v55 = vpop.f32.mrb[139].mxu1  ;;  %v9856_v62 = vpop.eup %9855  ;;  %v7015_v45 = vadd.f32 1.0, %v9854_v38  ;;  %v8740_v7 = vadd.f32 %v12745_v24, %v12727_v36  ;;  %v8198_v15 = vmul.f32 -1.442695, %v8770_v59  ;;  %v8202_v31 = vmul.f32 -1.442695, %v8739_v51 }
 0x51e   : > { %v9858_v5 = vpop.eup %9857  ;;  %9877 = vrcp.f32 %v7013_v14  ;;  %v7014_v42 = vadd.f32 1.0, %v9856_v62  ;;  %v8772_v43 = vadd.f32 %v12747_v55, %v12730_v49  ;;  %v8204_v38 = vmul.f32 -1.442695, %v8771_v3 }
 0x51f   : > { %v9860_v17 = vpop.eup %9859  ;;  %9879 = vrcp.f32 %v7015_v45  ;;  %v7016_v46 = vadd.f32 1.0, %v9858_v5  ;;  %v5975_v8 = vpop.f32.mrb[140].mxu0  ;;  %v8203_v5 = vmul.f32 -1.442695, %v8740_v7 }
 0x520   : > { %v9862_v18 = vpop.eup %9861  ;;  %9881 = vrcp.f32 %v7014_v42  ;;  %v7020_v20 = vadd.f32 1.0, %v9860_v17  ;;  %v6201_v6 = vpop.f32.mrb[140].mxu1  ;;  %v8741_v39 = vadd.f32 %v5975_v8, %v12721_v40 }
 0x521   : > { %v9864_v21 = vpop.eup %9863  ;;  %9883 = vrcp.f32 %v7016_v46  ;;  %v7022_v13 = vadd.f32 1.0, %v9862_v18  ;;  %v12752_v53 = vpop.f32.mrb[141].mxu0  ;;  %v8773_v14 = vadd.f32 %v6201_v6, %v12724_v58  ;;  %v8205_v46 = vmul.f32 -1.442695, %v8772_v43 }
 0x522   : > { %v9866_v54 = vpop.eup %9865  ;;  %9885 = vrcp.f32 %v7020_v20  ;;  %v7021_v32 = vadd.f32 1.0, %v9864_v21  ;;  %v12762_v33 = vpop.f32.mrb[141].mxu1  ;;  %v8209_v18 = vmul.f32 -1.442695, %v8741_v39 }
 0x523   : > { %v12764_v34 = vpop.f32.mrb[142].mxu0  ;;  %v9868_v9 = vpop.eup %9867  ;;  %9887 = vrcp.f32 %v7022_v13  ;;  %v7023_v10 = vadd.f32 1.0, %v9866_v54  ;;  %v8211_v8 = vmul.f32 -1.442695, %v8773_v14  ;;  %v8774_v51 = vadd.f32 %v12762_v33, %v12730_v49 }
 0x524   : > { %v12767_v12 = vpop.f32.mrb[142].mxu1  ;;  %v12769_v61 = vpop.f32.mrb[143].mxu0  ;;  %9889 = vrcp.f32 %v7021_v32  ;;  %v7027_v2 = vadd.f32 1.0, %v9868_v9 }
 0x525   : > { %v9870_v0 = vpop.eup %9869  ;;  %v12772_v63 = vpop.f32.mrb[143].mxu1  ;;  %9891 = vrcp.f32 %v7023_v10 }
 0x526   : > { %v9872_v57 = vpop.eup %9871  ;;  %7342 = vst [vmem:[%s12759_s21] sm:$0xff] %v9870_v0  ;;  %9893 = vrcp.f32 %v7027_v2 }
 0x527   : > { %v9874_v23 = vpop.eup %9873  ;;  %7344 = vst [vmem:[%s12759_s21 + $0x10] sm:$0xff] %v9872_v57  ;;  %9895 = vpow2.f32 %v8190_v11  ;;  %v12783_v60 = vpop.f32.mrb[144].mxu0 }
 0x528   : > { %v9876_v1 = vpop.eup %9875  ;;  %7343 = vst [vmem:[%s12759_s21 + $0x8] sm:$0xff] %v9874_v23  ;;  %9897 = vpow2.f32 %v8189_v28  ;;  %v12788_v19 = vpop.f32.mrb[144].mxu1 }
 0x529   : > { %v9878_v25 = vpop.eup %9877  ;;  %7345 = vst [vmem:[%s12759_s21 + $0x18] sm:$0xff] %v9876_v1  ;;  %9899 = vpow2.f32 %v8191_v41  ;;  %v12790_v27 = vpop.f32.mrb[145].mxu0 }
 0x52a   : > { %v9880_v44 = vpop.eup %9879  ;;  %7349 = vst [vmem:[%s12759_s21 + $0x38] sm:$0xff] %v9878_v25  ;;  %9901 = vpow2.f32 %v8195_v26  ;;  %v12794_v22 = vpop.f32.mrb[145].mxu1  ;;  %v8742_v26 = vadd.f32 %v12752_v53, %v12727_v36 }
 0x52b   : > { %v9882_v52 = vpop.eup %9881  ;;  %7351 = vst [vmem:[%s12759_s21 + $0x48] sm:$0xff] %v9880_v44  ;;  %v12796_v48 = vpop.f32.mrb[146].mxu0  ;;  %9903 = vpow2.f32 %v8197_v30 }
 0x52c   : > { %v9884_v24 = vpop.eup %9883  ;;  %7350 = vst [vmem:[%s12759_s21 + $0x40] sm:$0xff] %v9882_v52  ;;  %v12800_v55 = vpop.f32.mrb[146].mxu1  ;;  %9905 = vpow2.f32 %v8196_v47  ;;  %v8210_v39 = vmul.f32 -1.442695, %v8742_v26 }
 0x52d   : > { %v12802_v62 = vpop.f32.mrb[147].mxu0  ;;  %v9886_v45 = vpop.eup %9885  ;;  %7352 = vst [vmem:[%s12759_s21 + $0x50] sm:$0xff] %v9884_v24  ;;  %9907 = vpow2.f32 %v8198_v15  ;;  %v8212_v24 = vmul.f32 -1.442695, %v8774_v51 }
 0x52e   : > { %v6217_v42 = vpop.f32.mrb[147].mxu1  ;;  %v9888_v17 = vpop.eup %9887  ;;  %7356 = vst [vmem:[%s12759_s21 + $0x70] sm:$0xff] %v9886_v45  ;;  %9909 = vpow2.f32 %v8202_v31 }
 0x52f   : > { %v9890_v4 = vpop.eup %9889  ;;  %7358 = vst [vmem:[%s12759_s21 + $0x80] sm:$0xff] %v9888_v17  ;;  %v12808_v20 = vadd.f32 %v6217_v42, %v12730_v49  ;;  %9911 = vpow2.f32 %v8204_v38  ;;  %v5995_v13 = vpop.f32.mrb[148].mxu0 }
 0x530   : > { %v9892_v37 = vpop.eup %9891  ;;  %7357 = vst [vmem:[%s12759_s21 + $0x78] sm:$0xff] %v9890_v4  ;;  %9913 = vpow2.f32 %v8203_v5  ;;  %v12814_v6 = vadd.f32 %v5995_v13, %v12721_v40  ;;  %v6221_v54 = vpop.f32.mrb[148].mxu1  ;;  %v8743_v5 = vadd.f32 %v12764_v34, %v12721_v40  ;;  %v8775_v34 = vadd.f32 %v12767_v12, %v12724_v58 }
 0x531   : > { %v9894_v21 = vpop.eup %9893  ;;  %7359 = vst [vmem:[%s12759_s21 + $0x88] sm:$0xff] %v9892_v37  ;;  %9915 = vpow2.f32 %v8205_v46  ;;  %v5997_v32 = vpop.f32.mrb[149].mxu0  ;;  %v12817_v10 = vadd.f32 %v6221_v54, %v12724_v58 }
 0x532   : > { %v9896_v50 = vpop.eup %9895  ;;  %7363 = vst [vmem:[%s12759_s21 + $0xa8] sm:$0xff] %v9894_v21  ;;  %9917 = vpow2.f32 %v8209_v18  ;;  %v12820_v11 = vadd.f32 %v5997_v32, %v12727_v36  ;;  %v6223_v56 = vpop.f32.mrb[149].mxu1 }
 0x533   : > { %v9898_v35 = vpop.eup %9897  ;;  %v7029_v9 = vadd.f32 1.0, %v9896_v50  ;;  %v5999_v0 = vpop.f32.mrb[150].mxu0  ;;  %9919 = vpow2.f32 %v8211_v8  ;;  %v12823_v29 = vadd.f32 %v6223_v56, %v12730_v49 }
 0x534   : > { %v9900_v2 = vpop.eup %9899  ;;  %v7028_v28 = vadd.f32 1.0, %v9898_v35  ;;  %v6225_v57 = vpop.f32.mrb[150].mxu1  ;;  %v12830_v25 = vadd.f32 %v5999_v0, %v12721_v40 }
 0x535   : > { %v6001_v41 = vpop.f32.mrb[151].mxu0  ;;  %v9902_v59 = vpop.eup %9901  ;;  %9921 = vrcp.f32 %v7029_v9  ;;  %v7030_v23 = vadd.f32 1.0, %v9900_v2  ;;  %v12833_v44 = vadd.f32 %v6225_v57, %v12724_v58  ;;  %v8744_v2 = vadd.f32 %v12769_v61, %v12727_v36 }
 0x536   : > { %v6227_v1 = vpop.f32.mrb[151].mxu1  ;;  %v9904_v30 = vpop.eup %9903  ;;  %9923 = vrcp.f32 %v7028_v28  ;;  %v7034_v3 = vadd.f32 1.0, %v9902_v59  ;;  %v12836_v15 = vadd.f32 %v6001_v41, %v12727_v36  ;;  %v8776_v28 = vadd.f32 %v12772_v63, %v12730_v49 }
 0x537   : > { %v9906_v47 = vpop.eup %9905  ;;  %9925 = vrcp.f32 %v7030_v23  ;;  %v7036_v7 = vadd.f32 1.0, %v9904_v30  ;;  %v12839_v33 = vadd.f32 %v6227_v1, %v12730_v49  ;;  %v6005_v38 = vpop.f32.mrb[152].mxu0  ;;  %v8745_v59 = vadd.f32 %v12783_v60, %v12721_v40 }
 0x538   : > { %v9908_v53 = vpop.eup %9907  ;;  %9927 = vrcp.f32 %v7034_v3  ;;  %v7035_v43 = vadd.f32 1.0, %v9906_v47  ;;  %v12844_v42 = vadd.f32 %v6005_v38, %v12721_v40  ;;  %v6231_v17 = vpop.f32.mrb[152].mxu1  ;;  %v8216_v30 = vmul.f32 -1.442695, %v8743_v5 }
 0x539   : > { %v9910_v52 = vpop.eup %9909  ;;  %9929 = vrcp.f32 %v7036_v7  ;;  %v7037_v31 = vadd.f32 1.0, %v9908_v53  ;;  %v6007_v46 = vpop.f32.mrb[153].mxu0  ;;  %v12847_v37 = vadd.f32 %v6231_v17, %v12724_v58  ;;  %v8218_v3 = vmul.f32 -1.442695, %v8775_v34 }
 0x53a   : > { %v9912_v14 = vpop.eup %9911  ;;  %9931 = vrcp.f32 %v7035_v43  ;;  %v7041_v45 = vadd.f32 1.0, %v9910_v52  ;;  %v12850_v8 = vadd.f32 %v6007_v46, %v12727_v36  ;;  %v6233_v21 = vpop.f32.mrb[153].mxu1  ;;  %v8217_v7 = vmul.f32 -1.442695, %v8744_v2 }
 0x53b   : > { %v9914_v4 = vpop.eup %9913  ;;  %9933 = vrcp.f32 %v7037_v31  ;;  %v7043_v18 = vadd.f32 1.0, %v9912_v14  ;;  %v6009_v13 = vpop.f32.mrb[154].mxu0  ;;  %v12855_v32 = vadd.f32 %v6233_v21, %v12730_v49  ;;  %v8219_v53 = vmul.f32 -1.442695, %v8776_v28 }
 0x53c   : > { %v9916_v50 = vpop.eup %9915  ;;  %9935 = vrcp.f32 %v7041_v45  ;;  %v7042_v54 = vadd.f32 1.0, %v9914_v4  ;;  %v6235_v35 = vpop.f32.mrb[154].mxu1  ;;  %v12864_v23 = vadd.f32 %v6009_v13, %v12721_v40  ;;  %v8777_v43 = vadd.f32 %v12788_v19, %v12724_v58 }
 0x53d   : > { %v6011_v9 = vpop.f32.mrb[155].mxu0  ;;  %v9918_v56 = vpop.eup %9917  ;;  %9937 = vrcp.f32 %v7043_v18  ;;  %v7044_v0 = vadd.f32 1.0, %v9916_v50  ;;  %v12867_v1 = vadd.f32 %v6235_v35, %v12724_v58  ;;  %v8223_v38 = vmul.f32 -1.442695, %v8745_v59 }
 0x53e   : > { %v6237_v57 = vpop.f32.mrb[155].mxu1  ;;  %v9920_v41 = vpop.eup %9919  ;;  %9939 = vrcp.f32 %v7042_v54  ;;  %v7048_v12 = vadd.f32 1.0, %v9918_v56  ;;  %v12870_v61 = vadd.f32 %v6011_v9, %v12727_v36  ;;  %v8746_v14 = vadd.f32 %v12790_v27, %v12727_v36 }
 0x53f   : > { %v9922_v26 = vpop.eup %9921  ;;  %9941 = vrcp.f32 %v7044_v0  ;;  %v7050_v51 = vadd.f32 1.0, %v9920_v41  ;;  %v12874_v60 = vadd.f32 %v6237_v57, %v12730_v49  ;;  %v6015_v52 = vpop.f32.mrb[156].mxu0  ;;  %v8778_v19 = vadd.f32 %v12794_v22, %v12730_v49 }
 0x540   : > { %v9924_v63 = vpop.eup %9923  ;;  %7365 = vst [vmem:[%s12759_s21 + $0xb8] sm:$0xff] %v9922_v26  ;;  %9943 = vrcp.f32 %v7048_v12  ;;  %v12883_v45 = vadd.f32 %v6015_v52, %v12721_v40  ;;  %v6241_v5 = vpop.f32.mrb[156].mxu1  ;;  %v8747_v13 = vadd.f32 %v12796_v48, %v12721_v40  ;;  %v8225_v35 = vmul.f32 -1.442695, %v8777_v43 }
 0x541   : > { %v9926_v47 = vpop.eup %9925  ;;  %7364 = vst [vmem:[%s12759_s21 + $0xb0] sm:$0xff] %v9924_v63  ;;  %9945 = vrcp.f32 %v7050_v51  ;;  %v6017_v17 = vpop.f32.mrb[157].mxu0  ;;  %v12889_v4 = vadd.f32 %v6241_v5, %v12724_v58  ;;  %v8779_v9 = vadd.f32 %v12800_v55, %v12724_v58  ;;  %v8748_v2 = vadd.f32 %v12802_v62, %v12727_v36 }
 0x542   : > { %v9928_v31 = vpop.eup %9927  ;;  %7366 = vst [vmem:[%s12759_s21 + $0xc0] sm:$0xff] %v9926_v47  ;;  %9947 = vpow2.f32 %v8210_v39  ;;  %v12892_v39 = vadd.f32 %v6017_v17, %v12727_v36  ;;  %v6243_v18 = vpop.f32.mrb[157].mxu1  ;;  %v8226_v55 = vmul.f32 -1.442695, %v8778_v19  ;;  %v8230_v12 = vmul.f32 -1.442695, %v8747_v13 }
 0x543   : > { %v9930_v46 = vpop.eup %9929  ;;  %7370 = vst [vmem:[%s12759_s21 + $0xe0] sm:$0xff] %v9928_v31  ;;  %9949 = vpow2.f32 %v8212_v24  ;;  %v6019_v27 = vpop.f32.mrb[158].mxu0  ;;  %v12898_v24 = vadd.f32 %v6243_v18, %v12730_v49  ;;  %v8232_v62 = vmul.f32 -1.442695, %v8779_v9 }
 0x544   : > { %v9932_v21 = vpop.eup %9931  ;;  %7372 = vst [vmem:[%s12759_s21 + $0xf0] sm:$0xff] %v9930_v46  ;;  %9951 = vpow2.f32 %v8216_v30  ;;  %v12901_v22 = vadd.f32 %v6019_v27, %v12721_v40  ;;  %v6245_v50 = vpop.f32.mrb[158].mxu1  ;;  %v8224_v40 = vmul.f32 -1.442695, %v8746_v14 }
 0x545   : > { %v6021_v54 = vpop.f32.mrb[159].mxu0  ;;  %v9934_v34 = vpop.eup %9933  ;;  %7371 = vst [vmem:[%s12759_s21 + $0xe8] sm:$0xff] %v9932_v21  ;;  %9953 = vpow2.f32 %v8218_v3  ;;  %v12907_v56 = vadd.f32 %v6245_v50, %v12724_v58 }
 0x546   : > { %v6247_v48 = vpop.f32.mrb[159].mxu1  ;;  %v9936_v0 = vpop.eup %9935  ;;  %7373 = vst [vmem:[%s12759_s21 + $0xf8] sm:$0xff] %v9934_v34  ;;  %9955 = vpow2.f32 %v8217_v7  ;;  %v12913_v28 = vadd.f32 %v6021_v54, %v12727_v36  ;;  %v8231_v36 = vmul.f32 -1.442695, %v8748_v2 }
 0x547   : > { %v9938_v57 = vpop.eup %9937  ;;  %7377 = vst [vmem:[%s12759_s21 + $0x118] sm:$0xff] %v9936_v0  ;;  %9957 = vpow2.f32 %v8219_v53  ;;  %v12917_v58 = vadd.f32 %v6247_v48, %v12730_v49 }
 0x548   : > { %v9940_v41 = vpop.eup %9939  ;;  %7379 = vst [vmem:[%s12759_s21 + $0x128] sm:$0xff] %v9938_v57  ;;  %9959 = vpow2.f32 %v8223_v38  ;;  %v8553_v51 = vpop.f32.mrb[160].mxu1 }
 0x549   : > { %v9942_v59 = vpop.eup %9941  ;;  %7378 = vst [vmem:[%s12759_s21 + $0x120] sm:$0xff] %v9940_v41  ;;  %9961 = vpow2.f32 %v8225_v35  ;;  %v8554_v30 = vpop.f32.mrb[161].mxu1 }
 0x54a   : > { %v9944_v26 = vpop.eup %9943  ;;  %7380 = vst [vmem:[%s12759_s21 + $0x130] sm:$0xff] %v9942_v59  ;;  %9963 = vpow2.f32 %v8224_v40  ;;  %v12924_v3 = vadd.f32 %v8554_v30, %v8553_v51  ;;  %v8556_v47 = vpop.f32.mrb[162].mxu1  ;;  %v8233_v51 = vmul.f32 -1.442695, %v12808_v20 }
 0x54b   : > { %v9946_v63 = vpop.eup %9945  ;;  %7384 = vst [vmem:[%s12759_s21 + $0x150] sm:$0xff] %v9944_v26  ;;  %9965 = vpow2.f32 %v8226_v55  ;;  %v8557_v43 = vpop.f32.mrb[163].mxu1 }
 0x54c   : > { %v9948_v49 = vpop.eup %9947  ;;  %7386 = vst [vmem:[%s12759_s21 + $0x160] sm:$0xff] %v9946_v63  ;;  %9967 = vpow2.f32 %v8230_v12  ;;  %v12926_v38 = vadd.f32 %v8557_v43, %v8556_v47 }
 0x54d   : > { %v9950_v7 = vpop.eup %9949  ;;  %v7049_v53 = vadd.f32 1.0, %v9948_v49  ;;  %9969 = vpow2.f32 %v8232_v62  ;;  %v8237_v49 = vmul.f32 -1.442695, %v12814_v6  ;;  %v8240_v6 = vmul.f32 -1.442695, %v12823_v29 }
 0x54e   : > { %v9952_v52 = vpop.eup %9951  ;;  %v7051_v31 = vadd.f32 1.0, %v9950_v7  ;;  %9971 = vpow2.f32 %v8231_v36  ;;  %v8239_v7 = vmul.f32 -1.442695, %v12817_v10  ;;  %v8244_v10 = vmul.f32 -1.442695, %v12830_v25 }
 0x54f   : > { %v9954_v14 = vpop.eup %9953  ;;  %9973 = vrcp.f32 %v7049_v53  ;;  %v7055_v5 = vadd.f32 1.0, %v9952_v52  ;;  %v8238_v52 = vmul.f32 -1.442695, %v12820_v11  ;;  %v8246_v11 = vmul.f32 -1.442695, %v12833_v44 }
 0x550   : > { %v9956_v17 = vpop.eup %9955  ;;  %9975 = vrcp.f32 %v7051_v31  ;;  %v7057_v46 = vadd.f32 1.0, %v9954_v14  ;;  %v8559_v13 = vpop.f32.mrb[164].mxu1  ;;  %v8247_v25 = vmul.f32 -1.442695, %v12839_v33 }
 0x551   : > { %v9958_v19 = vpop.eup %9957  ;;  %9977 = vrcp.f32 %v7055_v5  ;;  %v7056_v18 = vadd.f32 1.0, %v9956_v17  ;;  %v8560_v34 = vpop.f32.mrb[165].mxu1 }
 0x552   : > { %v9960_v27 = vpop.eup %9959  ;;  %9979 = vrcp.f32 %v7057_v46  ;;  %v7058_v21 = vadd.f32 1.0, %v9958_v19  ;;  %v12928_v48 = vadd.f32 %v8560_v34, %v8559_v13  ;;  %v8562_v0 = vpop.f32.mrb[166].mxu1 }
 0x553   : > { %v9962_v50 = vpop.eup %9961  ;;  %9981 = vrcp.f32 %v7056_v18  ;;  %v7062_v54 = vadd.f32 1.0, %v9960_v27  ;;  %v8563_v57 = vpop.f32.mrb[167].mxu1  ;;  %v8245_v27 = vmul.f32 -1.442695, %v12836_v15  ;;  %v8252_v15 = vmul.f32 -1.442695, %v12850_v8 }
 0x554   : > { %v9964_v35 = vpop.eup %9963  ;;  %9983 = vrcp.f32 %v7058_v21  ;;  %v7064_v9 = vadd.f32 1.0, %v9962_v50  ;;  %v12930_v12 = vadd.f32 %v8563_v57, %v8562_v0  ;;  %v8251_v50 = vmul.f32 -1.442695, %v12844_v42 }
 0x555   : > { %v9966_v40 = vpop.eup %9965  ;;  %9985 = vrcp.f32 %v7062_v54  ;;  %v7063_v2 = vadd.f32 1.0, %v9964_v35  ;;  %v8253_v54 = vmul.f32 -1.442695, %v12847_v37  ;;  %v8254_v0 = vmul.f32 -1.442695, %v12855_v32 }
 0x556   : > { %v9968_v55 = vpop.eup %9967  ;;  %9987 = vrcp.f32 %v7064_v9  ;;  %v7065_v41 = vadd.f32 1.0, %v9966_v40 }
 0x557   : > { %v9970_v59 = vpop.eup %9969  ;;  %9989 = vrcp.f32 %v7063_v2  ;;  %v7069_v62 = vadd.f32 1.0, %v9968_v55 }
 0x558   : > { %v9972_v26 = vpop.eup %9971  ;;  %9991 = vrcp.f32 %v7065_v41  ;;  %v7071_v36 = vadd.f32 1.0, %v9970_v59  ;;  %v8565_v53 = vpop.f32.mrb[168].mxu1 }
 0x559   : > { %v9974_v63 = vpop.eup %9973  ;;  %9993 = vrcp.f32 %v7069_v62  ;;  %v7070_v30 = vadd.f32 1.0, %v9972_v26  ;;  %v8566_v20 = vpop.f32.mrb[169].mxu1 }
 0x55a   : > { %v9976_v47 = vpop.eup %9975  ;;  %7385 = vst [vmem:[%s12759_s21 + $0x158] sm:$0xff] %v9974_v63  ;;  %9995 = vrcp.f32 %v7071_v36  ;;  %v12940_v14 = vadd.f32 %v8566_v20, %v8565_v53  ;;  %v8568_v5 = vpop.f32.mrb[170].mxu1 }
 0x55b   : > { %v9978_v43 = vpop.eup %9977  ;;  %7387 = vst [vmem:[%s12759_s21 + $0x168] sm:$0xff] %v9976_v47  ;;  %9997 = vrcp.f32 %v7070_v30  ;;  %v8569_v46 = vpop.f32.mrb[171].mxu1 }
 0x55c   : > { %v9980_v31 = vpop.eup %9979  ;;  %7391 = vst [vmem:[%s12759_s21 + $0x188] sm:$0xff] %v9978_v43  ;;  %9999 = vpow2.f32 %v8233_v51  ;;  %v12946_v18 = vadd.f32 %v8569_v46, %v8568_v5 }
 0x55d   : > { %v9982_v17 = vpop.eup %9981  ;;  %7393 = vst [vmem:[%s12759_s21 + $0x198] sm:$0xff] %v9980_v31  ;;  %10001 = vpow2.f32 %v8237_v49 }
 0x55e   : > { %v9984_v19 = vpop.eup %9983  ;;  %7392 = vst [vmem:[%s12759_s21 + $0x190] sm:$0xff] %v9982_v17  ;;  %10003 = vpow2.f32 %v8239_v7 }
 0x55f   : > { %v9986_v29 = vpop.eup %9985  ;;  %7394 = vst [vmem:[%s12759_s21 + $0x1a0] sm:$0xff] %v9984_v19  ;;  %10005 = vpow2.f32 %v8238_v52 }
 0x560   : > { %v9988_v21 = vpop.eup %9987  ;;  %7398 = vst [vmem:[%s12759_s21 + $0x1c0] sm:$0xff] %v9986_v29  ;;  %10007 = vpow2.f32 %v8240_v6  ;;  %v8571_v34 = vpop.f32.mrb[172].mxu1 }
 0x561   : > { %v9990_v13 = vpop.eup %9989  ;;  %7400 = vst [vmem:[%s12759_s21 + $0x1d0] sm:$0xff] %v9988_v21  ;;  %10009 = vpow2.f32 %v8244_v10  ;;  %v8572_v33 = vpop.f32.mrb[173].mxu1 }
 0x562   : > { %v9992_v44 = vpop.eup %9991  ;;  %7399 = vst [vmem:[%s12759_s21 + $0x1c8] sm:$0xff] %v9990_v13  ;;  %10011 = vpow2.f32 %v8246_v11  ;;  %v12960_v42 = vadd.f32 %v8572_v33, %v8571_v34  ;;  %v8574_v40 = vpop.f32.mrb[174].mxu1 }
 0x563   : > { %v9994_v35 = vpop.eup %9993  ;;  %7401 = vst [vmem:[%s12759_s21 + $0x1d8] sm:$0xff] %v9992_v44  ;;  %10013 = vpow2.f32 %v8245_v27  ;;  %v8575_v37 = vpop.f32.mrb[175].mxu1 }
 0x564   : > { %v9996_v9 = vpop.eup %9995  ;;  %7405 = vst [vmem:[%s12759_s21 + $0x1f8] sm:$0xff] %v9994_v35  ;;  %10015 = vpow2.f32 %v8247_v25  ;;  %v12964_v55 = vadd.f32 %v8575_v37, %v8574_v40  ;;  %v8260_v35 = vmul.f32 -1.442695, %v12867_v1  ;;  %v8265_v1 = vmul.f32 -1.442695, %v12883_v45 }
 0x565   : > { %v9998_v2 = vpop.eup %9997  ;;  %7407 = vst [vmem:[%s12759_s21 + $0x208] sm:$0xff] %v9996_v9  ;;  %10017 = vpow2.f32 %v8251_v50  ;;  %v8258_v50 = vmul.f32 -1.442695, %v12864_v23  ;;  %v8259_v9 = vmul.f32 -1.442695, %v12870_v61 }
 0x566   : > { %v10000_v57 = vpop.eup %9999  ;;  %7406 = vst [vmem:[%s12759_s21 + $0x200] sm:$0xff] %v9998_v2  ;;  %10019 = vpow2.f32 %v8253_v54  ;;  %v8261_v23 = vmul.f32 -1.442695, %v12874_v60  ;;  %v8266_v60 = vmul.f32 -1.442695, %v12892_v39 }
 0x567   : > { %v10002_v41 = vpop.eup %10001  ;;  %v7072_v8 = vadd.f32 1.0, %v10000_v57  ;;  %10021 = vpow2.f32 %v8252_v15  ;;  %v8268_v45 = vmul.f32 -1.442695, %v12898_v24  ;;  %v8274_v39 = vmul.f32 -1.442695, %v12907_v56 }
 0x568   : > { %v10004_v59 = vpop.eup %10003  ;;  %v7076_v62 = vadd.f32 1.0, %v10002_v41  ;;  %10023 = vpow2.f32 %v8254_v0  ;;  %v8577_v63 = vpop.f32.mrb[176].mxu1  ;;  %v10291_v24 = vld [vmem:[%s13239_s11] sm:$0x7f]  ;;  %v8275_v56 = vmul.f32 -1.442695, %v12917_v58 }
 0x569   : > { %v10006_v26 = vpop.eup %10005  ;;  %10025 = vrcp.f32 %v7072_v8  ;;  %v7078_v32 = vadd.f32 1.0, %v10004_v59  ;;  %v8578_v47 = vpop.f32.mrb[177].mxu1  ;;  %v8267_v8 = vmul.f32 -1.442695, %v12889_v4 }
 0x56a   : > { %v10008_v36 = vpop.eup %10007  ;;  %10027 = vrcp.f32 %v7076_v62  ;;  %v7077_v51 = vadd.f32 1.0, %v10006_v26  ;;  %v12966_v43 = vadd.f32 %v8578_v47, %v8577_v63  ;;  %v8580_v52 = vpop.f32.mrb[178].mxu1  ;;  %v4637_v62 = vsub.s32 6, %v11230_v16 }
 0x56b   : > { %v10010_v30 = vpop.eup %10009  ;;  %10029 = vrcp.f32 %v7078_v32  ;;  %v7079_v49 = vadd.f32 1.0, %v10008_v36  ;;  %v8581_v6 = vpop.f32.mrb[179].mxu1  ;;  %v8272_v36 = vmul.f32 -1.442695, %v12901_v22 }
 0x56c   : > { %v10012_v7 = vpop.eup %10011  ;;  %10031 = vrcp.f32 %v7077_v51  ;;  %v7083_v53 = vadd.f32 1.0, %v10010_v30  ;;  %v12968_v10 = vadd.f32 %v8581_v6, %v8580_v52  ;;  %v12998_v22 = vrot.slane %v10291_v24, %v4637_v62 }
 0x56d   : > { %v10014_v20 = vpop.eup %10013  ;;  %10033 = vrcp.f32 %v7079_v49  ;;  %v7085_v31 = vadd.f32 1.0, %v10012_v7  ;;  %v8273_v49 = vmul.f32 -1.442695, %v12913_v28 }
 0x56e   : > { %v10016_v5 = vpop.eup %10015  ;;  %10035 = vrcp.f32 %v7083_v53  ;;  %v7084_v17 = vadd.f32 1.0, %v10014_v20 }
 0x56f   : > { %v10018_v46 = vpop.eup %10017  ;;  %10037 = vrcp.f32 %v7085_v31  ;;  %v7086_v19 = vadd.f32 1.0, %v10016_v5 }
 0x570   : > { %v10020_v11 = vpop.eup %10019  ;;  %10039 = vrcp.f32 %v7084_v17  ;;  %v7090_v29 = vadd.f32 1.0, %v10018_v46  ;;  %v8583_v44 = vpop.f32.mrb[180].mxu1 }
 0x571   : > { %v10022_v27 = vpop.eup %10021  ;;  %10041 = vrcp.f32 %v7086_v19  ;;  %v7092_v21 = vadd.f32 1.0, %v10020_v11  ;;  %v8584_v15 = vpop.f32.mrb[181].mxu1 }
 0x572   : > { %v10024_v25 = vpop.eup %10023  ;;  %10043 = vrcp.f32 %v7090_v29  ;;  %v7091_v13 = vadd.f32 1.0, %v10022_v27  ;;  %v12974_v0 = vadd.f32 %v8584_v15, %v8583_v44  ;;  %v8586_v40 = vpop.f32.mrb[182].mxu1 }
 0x573   : > { %v10026_v54 = vpop.eup %10025  ;;  %10045 = vrcp.f32 %v7092_v21  ;;  %v7093_v34 = vadd.f32 1.0, %v10024_v25  ;;  %v8587_v37 = vpop.f32.mrb[183].mxu1 }
 0x574   : > { %v10028_v33 = vpop.eup %10027  ;;  %7408 = vst [vmem:[%s12759_s21 + $0x210] sm:$0xff] %v10026_v54  ;;  %10047 = vrcp.f32 %v7091_v13  ;;  %v12980_v41 = vadd.f32 %v8587_v37, %v8586_v40  ;;  %v4629_v13 = vsub.s32 4, %v11230_v16 }
 0x575   : > { %v10030_v2 = vpop.eup %10029  ;;  %7412 = vst [vmem:[%s12759_s21 + $0x230] sm:$0xff] %v10028_v33  ;;  %10049 = vrcp.f32 %v7093_v34 }
 0x576   : > { %v10032_v57 = vpop.eup %10031  ;;  %7414 = vst [vmem:[%s12759_s21 + $0x240] sm:$0xff] %v10030_v2  ;;  %10051 = vpow2.f32 %v8258_v50 }
 0x577   : > { %v10034_v61 = vpop.eup %10033  ;;  %7413 = vst [vmem:[%s12759_s21 + $0x238] sm:$0xff] %v10032_v57  ;;  %10053 = vpow2.f32 %v8260_v35  ;;  %v4633_v35 = vsub.s32 5, %v11230_v16 }
 0x578   : > { %v10036_v59 = vpop.eup %10035  ;;  %7415 = vst [vmem:[%s12759_s21 + $0x248] sm:$0xff] %v10034_v61  ;;  %10055 = vpow2.f32 %v8259_v9  ;;  %v8589_v4 = vpop.f32.mrb[184].mxu1  ;;  %v13016_v61 = vrot.slane %v10291_v24, %v4629_v13 }
 0x579   : > { %v10038_v26 = vpop.eup %10037  ;;  %7419 = vst [vmem:[%s12759_s21 + $0x268] sm:$0xff] %v10036_v59  ;;  %10057 = vpow2.f32 %v8261_v23  ;;  %v8590_v63 = vpop.f32.mrb[185].mxu1 }
 0x57a   : > { %v10040_v32 = vpop.eup %10039  ;;  %7421 = vst [vmem:[%s12759_s21 + $0x278] sm:$0xff] %v10038_v26  ;;  %10059 = vpow2.f32 %v8265_v1  ;;  %v8591_v47 = vadd.f32 %v8590_v63, %v8589_v4  ;;  %v8592_v7 = vpop.f32.mrb[186].mxu1  ;;  %v6511_v63 = vadd.f32 %v12924_v3, %v12998_v22 }
 0x57b   : > { %v10042_v51 = vpop.eup %10041  ;;  %7420 = vst [vmem:[%s12759_s21 + $0x270] sm:$0xff] %v10040_v32  ;;  %10061 = vpow2.f32 %v8267_v8  ;;  %v8593_v52 = vpop.f32.mrb[187].mxu1 }
 0x57c   : > { %v10044_v30 = vpop.eup %10043  ;;  %7422 = vst [vmem:[%s12759_s21 + $0x280] sm:$0xff] %v10042_v51  ;;  %10063 = vpow2.f32 %v8266_v60  ;;  %v13004_v28 = vadd.f32 %v8591_v47, %v12998_v22  ;;  %v8594_v31 = vadd.f32 %v8593_v52, %v8592_v7  ;;  %v13021_v60 = vrot.slane %v10291_v24, %v4633_v35 }
 0x57d   : > { %v10046_v53 = vpop.eup %10045  ;;  %7426 = vst [vmem:[%s12759_s21 + $0x2a0] sm:$0xff] %v10044_v30  ;;  %10065 = vpow2.f32 %v8268_v45 }
 0x57e   : > { %v10048_v20 = vpop.eup %10047  ;;  %7428 = vst [vmem:[%s12759_s21 + $0x2b0] sm:$0xff] %v10046_v53  ;;  %10067 = vpow2.f32 %v8272_v36  ;;  %v13009_v17 = vadd.f32 %v8594_v31, %v12998_v22 }
 0x57f   : > { %v10050_v6 = vpop.eup %10049  ;;  %7427 = vst [vmem:[%s12759_s21 + $0x2a8] sm:$0xff] %v10048_v20  ;;  %10069 = vpow2.f32 %v8274_v39 }
 0x580   : > { %v10052_v5 = vpop.eup %10051  ;;  %7429 = vst [vmem:[%s12759_s21 + $0x2b8] sm:$0xff] %v10050_v6  ;;  %10071 = vpow2.f32 %v8273_v49  ;;  %v8595_v29 = vpop.f32.mrb[188].mxu1 }
 0x581   : > { %v10054_v46 = vpop.eup %10053  ;;  %v7097_v19 = vadd.f32 1.0, %v10052_v5  ;;  %10073 = vpow2.f32 %v8275_v56  ;;  %v8596_v25 = vpop.f32.mrb[189].mxu1 }
 0x582   : > { %v10056_v58 = vpop.eup %10055  ;;  %v7099_v11 = vadd.f32 1.0, %v10054_v46  ;;  %v8597_v54 = vadd.f32 %v8596_v25, %v8595_v29  ;;  %v8598_v34 = vpop.f32.mrb[190].mxu1 }
 0x583   : > { %v10058_v27 = vpop.eup %10057  ;;  %10075 = vrcp.f32 %v7097_v19  ;;  %v7098_v21 = vadd.f32 1.0, %v10056_v58  ;;  %v8599_v9 = vpop.f32.mrb[191].mxu1 }
 0x584   : > { %v10060_v50 = vpop.eup %10059  ;;  %10077 = vrcp.f32 %v7099_v11  ;;  %v7100_v44 = vadd.f32 1.0, %v10058_v27  ;;  %v13014_v23 = vadd.f32 %v8597_v54, %v12998_v22  ;;  %v8600_v37 = vadd.f32 %v8599_v9, %v8598_v34 }
 0x585   : > { %v10062_v15 = vpop.eup %10061  ;;  %10079 = vrcp.f32 %v7098_v21  ;;  %v7104_v33 = vadd.f32 1.0, %v10060_v50  ;;  %v6514_v27 = vadd.f32 %v12926_v38, %v12998_v22 }
 0x586   : > { %v10064_v40 = vpop.eup %10063  ;;  %10081 = vrcp.f32 %v7100_v44  ;;  %v7106_v2 = vadd.f32 1.0, %v10062_v15  ;;  %v13019_v16 = vadd.f32 %v8600_v37, %v12998_v22 }
 0x587   : > { %v10066_v57 = vpop.eup %10065  ;;  %10083 = vrcp.f32 %v7104_v33  ;;  %v7105_v1 = vadd.f32 1.0, %v10064_v40 }
 0x588   : > { %v10068_v8 = vpop.eup %10067  ;;  %10085 = vrcp.f32 %v7106_v2  ;;  %v7107_v59 = vadd.f32 1.0, %v10066_v57  ;;  %v6397_v36 = vpop.f32.mrb[160].mxu0 }
 0x589   : > { %v10070_v62 = vpop.eup %10069  ;;  %10087 = vrcp.f32 %v7105_v1  ;;  %v7111_v26 = vadd.f32 1.0, %v10068_v8  ;;  %v8617_v4 = vpop.f32.mrb[192].mxu1  ;;  %v8793_v30 = vadd.f32 %v6397_v36, %v13016_v61  ;;  %v6519_v1 = vadd.f32 %v12928_v48, %v12998_v22 }
 0x58a   : > { %v10072_v45 = vpop.eup %10071  ;;  %10089 = vrcp.f32 %v7107_v59  ;;  %v7113_v32 = vadd.f32 1.0, %v10070_v62  ;;  %v6399_v49 = vpop.f32.mrb[161].mxu0 }
 0x58b   : > { %v10074_v51 = vpop.eup %10073  ;;  %10091 = vrcp.f32 %v7111_v26  ;;  %v7112_v39 = vadd.f32 1.0, %v10072_v45  ;;  %v8618_v24 = vpop.f32.mrb[193].mxu1  ;;  %v8794_v7 = vadd.f32 %v6399_v49, %v13021_v60  ;;  %v8171_v31 = vmul.f32 -1.442695, %v8793_v30 }
 0x58c   : > { %10093 = vrcp.f32 %v7113_v32  ;;  %v7114_v47 = vadd.f32 1.0, %v10074_v51  ;;  %v8619_v53 = vadd.f32 %v8618_v24, %v8617_v4  ;;  %v6401_v56 = vpop.f32.mrb[162].mxu0  ;;  %v8620_v52 = vpop.f32.mrb[194].mxu1  ;;  %v6522_v32 = vadd.f32 %v12930_v12, %v12998_v22 }
 0x58d   : > { %v10076_v20 = vpop.eup %10075  ;;  %10095 = vrcp.f32 %v7112_v39  ;;  %v8795_v6 = vadd.f32 %v6401_v56, %v13016_v61  ;;  %v6403_v3 = vpop.f32.mrb[163].mxu0  ;;  %v8172_v19 = vmul.f32 -1.442695, %v8794_v7 }
 0x58e   : > { %v8621_v5 = vpop.f32.mrb[195].mxu1  ;;  %v10078_v46 = vpop.eup %10077  ;;  %7433 = vst [vmem:[%s12759_s21 + $0x2d8] sm:$0xff] %v10076_v20  ;;  %10097 = vrcp.f32 %v7114_v47  ;;  %v6608_v58 = vadd.f32 %v8619_v53, %v6511_v63  ;;  %v8796_v11 = vadd.f32 %v6403_v3, %v13021_v60 }
 0x58f   : > { %v10080_v29 = vpop.eup %10079  ;;  %7435 = vst [vmem:[%s12759_s21 + $0x2e8] sm:$0xff] %v10078_v46  ;;  %10099 = vpow2.f32 %v8171_v31  ;;  %v8178_v21 = vmul.f32 -1.442695, %v8795_v6  ;;  %v8622_v25 = vadd.f32 %v8621_v5, %v8620_v52 }
 0x590   : > { %v10082_v13 = vpop.eup %10081  ;;  %7434 = vst [vmem:[%s12759_s21 + $0x2e0] sm:$0xff] %v10080_v29  ;;  %10101 = vpow2.f32 %v8172_v19  ;;  %v8173_v50 = vmul.f32 -1.442695, %v6608_v58  ;;  %v8179_v44 = vmul.f32 -1.442695, %v8796_v11  ;;  %v6407_v15 = vpop.f32.mrb[164].mxu0 }
 0x591   : > { %v10084_v54 = vpop.eup %10083  ;;  %7436 = vst [vmem:[%s12759_s21 + $0x2f0] sm:$0xff] %v10082_v13  ;;  %10103 = vpow2.f32 %v8178_v21  ;;  %v6611_v34 = vadd.f32 %v8622_v25, %v6514_v27  ;;  %v8623_v33 = vpop.f32.mrb[196].mxu1  ;;  %v8797_v40 = vadd.f32 %v6407_v15, %v13016_v61  ;;  %v6527_v21 = vadd.f32 %v12940_v14, %v12998_v22 }
 0x592   : > { %v10086_v35 = vpop.eup %10085  ;;  %7440 = vst [vmem:[%s12759_s21 + $0x310] sm:$0xff] %v10084_v54  ;;  %10105 = vpow2.f32 %v8173_v50  ;;  %v6409_v2 = vpop.f32.mrb[165].mxu0 }
 0x593   : > { %v10088_v38 = vpop.eup %10087  ;;  %7442 = vst [vmem:[%s12759_s21 + $0x320] sm:$0xff] %v10086_v35  ;;  %10107 = vpow2.f32 %v8179_v44  ;;  %v8180_v9 = vmul.f32 -1.442695, %v6611_v34  ;;  %v8624_v37 = vpop.f32.mrb[197].mxu1  ;;  %v8798_v8 = vadd.f32 %v6409_v2, %v13021_v60  ;;  %v8185_v36 = vmul.f32 -1.442695, %v8797_v40 }
 0x594   : > { %v10090_v57 = vpop.eup %10089  ;;  %7441 = vst [vmem:[%s12759_s21 + $0x318] sm:$0xff] %v10088_v38  ;;  %v8625_v59 = vadd.f32 %v8624_v37, %v8623_v33  ;;  %v6411_v62 = vpop.f32.mrb[166].mxu0  ;;  %v6530_v2 = vadd.f32 %v12946_v18, %v12998_v22 }
 0x595   : > { %v8626_v26 = vpop.f32.mrb[198].mxu1  ;;  %v10092_v45 = vpop.eup %10091  ;;  %7443 = vst [vmem:[%s12759_s21 + $0x328] sm:$0xff] %v10090_v57  ;;  %10109 = vpow2.f32 %v8180_v9  ;;  %v8799_v4 = vadd.f32 %v6411_v62, %v13016_v61  ;;  %v8186_v48 = vmul.f32 -1.442695, %v8798_v8 }
 0x596   : > { %v6413_v51 = vpop.f32.mrb[167].mxu0  ;;  %v8627_v39 = vpop.f32.mrb[199].mxu1  ;;  %7447 = vst [vmem:[%s12759_s21 + $0x348] sm:$0xff] %v10092_v45  ;;  %v6616_v30 = vadd.f32 %v8625_v59, %v6519_v1  ;;  %10111 = vpow2.f32 %v8185_v36 }
 0x597   : > { %v10094_v63 = vpop.eup %10093  ;;  %v8800_v49 = vadd.f32 %v6413_v51, %v13021_v60  ;;  %v8628_v24 = vadd.f32 %v8627_v39, %v8626_v26  ;;  %v8192_v7 = vmul.f32 -1.442695, %v8799_v4  ;;  %10113 = vpow2.f32 %v8186_v48 }
 0x598   : > { %v10096_v47 = vpop.eup %10095  ;;  %7449 = vst [vmem:[%s12759_s21 + $0x358] sm:$0xff] %v10094_v63  ;;  %v8187_v53 = vmul.f32 -1.442695, %v6616_v30  ;;  %v6417_v3 = vpop.f32.mrb[168].mxu0  ;;  %v6535_v4 = vadd.f32 %v12960_v42, %v12998_v22 }
 0x599   : > { %v10098_v12 = vpop.eup %10097  ;;  %7448 = vst [vmem:[%s12759_s21 + $0x350] sm:$0xff] %v10096_v47  ;;  %v8193_v56 = vmul.f32 -1.442695, %v8800_v49  ;;  %v6619_v52 = vadd.f32 %v8628_v24, %v6522_v32  ;;  %10115 = vpow2.f32 %v8192_v7  ;;  %v8629_v5 = vpop.f32.mrb[200].mxu1  ;;  %v8801_v58 = vadd.f32 %v6417_v3, %v13016_v61 }
 0x59a   : > { %v10100_v20 = vpop.eup %10099  ;;  %7450 = vst [vmem:[%s12759_s21 + $0x360] sm:$0xff] %v10098_v12  ;;  %10117 = vpow2.f32 %v8187_v53  ;;  %v6419_v11 = vpop.f32.mrb[169].mxu0  ;;  %v6538_v53 = vadd.f32 %v12964_v55, %v12998_v22 }
 0x59b   : > { %v10102_v31 = vpop.eup %10101  ;;  %v7010_v6 = vadd.f32 1.0, %v10100_v20  ;;  %10119 = vpow2.f32 %v8193_v56  ;;  %v8630_v29 = vpop.f32.mrb[201].mxu1  ;;  %v8194_v35 = vmul.f32 -1.442695, %v6619_v52  ;;  %v8199_v14 = vmul.f32 -1.442695, %v8801_v58 }
 0x59c   : > { %v10104_v46 = vpop.eup %10103  ;;  %v7011_v19 = vadd.f32 1.0, %v10102_v31  ;;  %v8631_v13 = vadd.f32 %v8630_v29, %v8629_v5  ;;  %v6421_v50 = vpop.f32.mrb[170].mxu0  ;;  %v8802_v8 = vadd.f32 %v6419_v11, %v13021_v60 }
 0x59d   : > { %v10106_v27 = vpop.eup %10105  ;;  %10121 = vrcp.f32 %v7010_v6  ;;  %v7017_v25 = vadd.f32 1.0, %v10104_v46  ;;  %v8632_v44 = vpop.f32.mrb[202].mxu1  ;;  %v8803_v51 = vadd.f32 %v6421_v50, %v13016_v61 }
 0x59e   : > { %v10108_v54 = vpop.eup %10107  ;;  %10123 = vrcp.f32 %v7011_v19  ;;  %v7012_v34 = vadd.f32 1.0, %v10106_v27  ;;  %v6423_v15 = vpop.f32.mrb[171].mxu0  ;;  %v6624_v9 = vadd.f32 %v8631_v13, %v6527_v21  ;;  %v8200_v56 = vmul.f32 -1.442695, %v8802_v8 }
 0x59f   : > { %v8633_v33 = vpop.f32.mrb[203].mxu1  ;;  %10125 = vrcp.f32 %v7017_v25  ;;  %v7018_v38 = vadd.f32 1.0, %v10108_v54  ;;  %v10110_v40 = vpop.eup %10109  ;;  %v8804_v49 = vadd.f32 %v6423_v15, %v13021_v60  ;;  %v8206_v19 = vmul.f32 -1.442695, %v8803_v51 }
 0x5a0   : > { %10127 = vrcp.f32 %v7012_v34  ;;  %v8634_v37 = vadd.f32 %v8633_v33, %v8632_v44  ;;  %v7019_v57 = vadd.f32 1.0, %v10110_v40  ;;  %v10112_v1 = vpop.eup %10111  ;;  %v6427_v45 = vpop.f32.mrb[172].mxu0  ;;  %v8201_v3 = vmul.f32 -1.442695, %v6624_v9 }
 0x5a1   : > { %10129 = vrcp.f32 %v7018_v38  ;;  %v10114_v62 = vpop.eup %10113  ;;  %v7024_v26 = vadd.f32 1.0, %v10112_v1  ;;  %v8635_v32 = vpop.f32.mrb[204].mxu1  ;;  %v8805_v58 = vadd.f32 %v6427_v45, %v13016_v61  ;;  %v8207_v29 = vmul.f32 -1.442695, %v8804_v49 }
 0x5a2   : > { %10131 = vpow2.f32 %v8194_v35  ;;  %v6627_v59 = vadd.f32 %v8634_v37, %v6530_v2  ;;  %v7025_v18 = vadd.f32 1.0, %v10114_v62  ;;  %v6429_v39 = vpop.f32.mrb[173].mxu0  ;;  %v8636_v63 = vpop.f32.mrb[205].mxu1  ;;  %v6543_v35 = vadd.f32 %v12966_v43, %v12998_v22 }
 0x5a3   : > { %10133 = vrcp.f32 %v7019_v57  ;;  %v10116_v36 = vpop.eup %10115  ;;  %v8637_v24 = vadd.f32 %v8636_v63, %v8635_v32  ;;  %v6431_v47 = vpop.f32.mrb[174].mxu0  ;;  %v8806_v25 = vadd.f32 %v6429_v39, %v13021_v60  ;;  %v8213_v15 = vmul.f32 -1.442695, %v8805_v58 }
 0x5a4   : > { %10135 = vpow2.f32 %v8199_v14  ;;  %v10118_v48 = vpop.eup %10117  ;;  %v7031_v30 = vadd.f32 1.0, %v10116_v36  ;;  %v8638_v7 = vpop.f32.mrb[206].mxu1  ;;  %v8208_v21 = vmul.f32 -1.442695, %v6627_v59  ;;  %v8807_v33 = vadd.f32 %v6431_v47, %v13016_v61 }
 0x5a5   : > { %10137 = vrcp.f32 %v7024_v26  ;;  %v10120_v12 = vpop.eup %10119  ;;  %v7026_v42 = vadd.f32 1.0, %v10118_v48  ;;  %v6433_v52 = vpop.f32.mrb[175].mxu0  ;;  %v6632_v5 = vadd.f32 %v8637_v24, %v6535_v4  ;;  %v8214_v43 = vmul.f32 -1.442695, %v8806_v25 }
 0x5a6   : > { %10139 = vrcp.f32 %v7025_v18  ;;  %v8639_v20 = vpop.f32.mrb[207].mxu1  ;;  %v7032_v6 = vadd.f32 1.0, %v10120_v12  ;;  %v8808_v14 = vadd.f32 %v6433_v52, %v13021_v60  ;;  %v6546_v18 = vadd.f32 %v12968_v10, %v12998_v22 }
 0x5a7   : > { %v10122_v31 = vpop.eup %10121  ;;  %10141 = vrcp.f32 %v7031_v30  ;;  %v8640_v55 = vadd.f32 %v8639_v20, %v8638_v7  ;;  %v8215_v32 = vmul.f32 -1.442695, %v6632_v5  ;;  %v8220_v51 = vmul.f32 -1.442695, %v8807_v33 }
 0x5a8   : > { %v10124_v46 = vpop.eup %10123  ;;  %7346 = vst [vmem:[%s12759_s21 + $0x20] sm:$0xff] %v10122_v31  ;;  %10143 = vrcp.f32 %v7026_v42  ;;  %v6437_v44 = vpop.f32.mrb[176].mxu0  ;;  %v8221_v48 = vmul.f32 -1.442695, %v8808_v14  ;;  %v6551_v20 = vadd.f32 %v12974_v0, %v12998_v22 }
 0x5a9   : > { %v10126_v11 = vpop.eup %10125  ;;  %7347 = vst [vmem:[%s12759_s21 + $0x28] sm:$0xff] %v10124_v46  ;;  %10145 = vrcp.f32 %v7032_v6  ;;  %v6635_v13 = vadd.f32 %v8640_v55, %v6538_v53  ;;  %v8641_v54 = vpop.f32.mrb[208].mxu1  ;;  %v8809_v53 = vadd.f32 %v6437_v44, %v13016_v61  ;;  %v6554_v44 = vadd.f32 %v12980_v41, %v12998_v22 }
 0x5aa   : > { %v10128_v27 = vpop.eup %10127  ;;  %7353 = vst [vmem:[%s12759_s21 + $0x58] sm:$0xff] %v10126_v11  ;;  %10147 = vpow2.f32 %v8200_v56  ;;  %v6439_v38 = vpop.f32.mrb[177].mxu0 }
 0x5ab   : > { %v10130_v50 = vpop.eup %10129  ;;  %7348 = vst.msk [vmem:[%s12759_s21 + $0x30] sm:$0xff] %vm1892_vm0, %v10128_v27  ;;  %10149 = vpow2.f32 %v8201_v3  ;;  %v8642_v9 = vpop.f32.mrb[209].mxu1  ;;  %v8222_v49 = vmul.f32 -1.442695, %v6635_v13  ;;  %v8810_v58 = vadd.f32 %v6439_v38, %v13021_v60  ;;  %v8227_v13 = vmul.f32 -1.442695, %v8809_v53 }
 0x5ac   : > { %v10132_v34 = vpop.eup %10131  ;;  %7354 = vst [vmem:[%s12759_s21 + $0x60] sm:$0xff] %v10130_v50  ;;  %10151 = vpow2.f32 %v8206_v19  ;;  %v8643_v37 = vadd.f32 %v8642_v9, %v8641_v54  ;;  %v13075_v57 = vpop.f32.mrb[178].mxu0 }
 0x5ad   : > { %v10134_v40 = vpop.eup %10133  ;;  %v7033_v2 = vadd.f32 1.0, %v10132_v34  ;;  %10153 = vpow2.f32 %v8207_v29  ;;  %v8644_v1 = vpop.f32.mrb[210].mxu1  ;;  %v8811_v41 = vadd.f32 %v13075_v57, %v13016_v61 }
 0x5ae   : > { %v10136_v8 = vpop.eup %10135  ;;  %7355 = vst.msk [vmem:[%s12759_s21 + $0x68] sm:$0xff] %vm1892_vm0, %v10134_v40  ;;  %10155 = vpow2.f32 %v8208_v21  ;;  %v13079_v59 = vpop.f32.mrb[179].mxu0  ;;  %v13081_v36 = vadd.f32 %v8643_v37, %v6543_v35 }
 0x5af   : > { %v8645_v62 = vpop.f32.mrb[211].mxu1  ;;  %v10138_v26 = vpop.eup %10137  ;;  %10157 = vrcp.f32 %v7033_v2  ;;  %v7038_v45 = vadd.f32 1.0, %v10136_v8 }
 0x5b0   : > { %v10140_v4 = vpop.eup %10139  ;;  %7360 = vst [vmem:[%s12759_s21 + $0x90] sm:$0xff] %v10138_v26  ;;  %10159 = vpow2.f32 %v8213_v15  ;;  %v8646_v39 = vadd.f32 %v8645_v62, %v8644_v1  ;;  %v13092_v10 = vpop.f32.mrb[180].mxu0  ;;  %v8228_v15 = vmul.f32 -1.442695, %v8810_v58  ;;  %v8812_v62 = vadd.f32 %v13079_v59, %v13021_v60 }
 0x5b1   : > { %v10142_v63 = vpop.eup %10141  ;;  %7361 = vst [vmem:[%s12759_s21 + $0x98] sm:$0xff] %v10140_v4  ;;  %10161 = vrcp.f32 %v7038_v45  ;;  %v8647_v7 = vpop.f32.mrb[212].mxu1  ;;  %v8229_v57 = vmul.f32 -1.442695, %v13081_v36  ;;  %v8813_v59 = vadd.f32 %v13092_v10, %v13016_v61 }
 0x5b2   : > { %v10144_v30 = vpop.eup %10143  ;;  %7367 = vst [vmem:[%s12759_s21 + $0xc8] sm:$0xff] %v10142_v63  ;;  %10163 = vpow2.f32 %v8214_v43  ;;  %v13088_v24 = vadd.f32 %v8646_v39, %v6546_v18  ;;  %v13096_v42 = vpop.f32.mrb[181].mxu0 }
 0x5b3   : > { %v10146_v47 = vpop.eup %10145  ;;  %7362 = vst.msk [vmem:[%s12759_s21 + $0xa0] sm:$0xff] %vm1892_vm0, %v10144_v30  ;;  %10165 = vpow2.f32 %v8215_v32  ;;  %v8648_v56 = vpop.f32.mrb[213].mxu1 }
 0x5b4   : > { %v10148_v12 = vpop.eup %10147  ;;  %7368 = vst [vmem:[%s12759_s21 + $0xd0] sm:$0xff] %v10146_v47  ;;  %10167 = vpow2.f32 %v8220_v51  ;;  %v8649_v6 = vadd.f32 %v8648_v56, %v8647_v7  ;;  %v13100_v3 = vpop.f32.mrb[182].mxu0 }
 0x5b5   : > { %v10150_v52 = vpop.eup %10149  ;;  %v7039_v31 = vadd.f32 1.0, %v10148_v12  ;;  %10169 = vpow2.f32 %v8221_v48  ;;  %v8650_v5 = vpop.f32.mrb[214].mxu1 }
 0x5b6   : > { %v10152_v46 = vpop.eup %10151  ;;  %v7040_v19 = vadd.f32 1.0, %v10150_v52  ;;  %10171 = vpow2.f32 %v8222_v49  ;;  %v13103_v55 = vpop.f32.mrb[183].mxu0  ;;  %v13105_v21 = vadd.f32 %v8649_v6, %v6551_v20  ;;  %v8234_v52 = vmul.f32 -1.442695, %v8811_v41 }
 0x5b7   : > { %v8651_v11 = vpop.f32.mrb[215].mxu1  ;;  %v10154_v29 = vpop.eup %10153  ;;  %10173 = vrcp.f32 %v7039_v31  ;;  %v7045_v27 = vadd.f32 1.0, %v10152_v46  ;;  %v8235_v31 = vmul.f32 -1.442695, %v8812_v62  ;;  %v8814_v6 = vadd.f32 %v13096_v42, %v13021_v60 }
 0x5b8   : > { %v10156_v0 = vpop.eup %10155  ;;  %10175 = vrcp.f32 %v7040_v19  ;;  %v7046_v25 = vadd.f32 1.0, %v10154_v29  ;;  %v8652_v34 = vadd.f32 %v8651_v11, %v8650_v5  ;;  %v6457_v40 = vpop.f32.mrb[184].mxu0  ;;  %v8241_v29 = vmul.f32 -1.442695, %v8813_v59 }
 0x5b9   : > { %v10158_v50 = vpop.eup %10157  ;;  %10177 = vrcp.f32 %v7045_v27  ;;  %v7047_v54 = vadd.f32 1.0, %v10156_v0  ;;  %v8653_v2 = vpop.f32.mrb[216].mxu1  ;;  %v13117_v22 = vadd.f32 %v6457_v40, %v13016_v61  ;;  %v8243_v41 = vmul.f32 -1.442695, %v13105_v21 }
 0x5ba   : > { %v10160_v35 = vpop.eup %10159  ;;  %7369 = vst.msk [vmem:[%s12759_s21 + $0xd8] sm:$0xff] %vm1892_vm0, %v10158_v50  ;;  %10179 = vrcp.f32 %v7046_v25  ;;  %v13111_v9 = vadd.f32 %v8652_v34, %v6554_v44  ;;  %v6459_v37 = vpop.f32.mrb[185].mxu0  ;;  %v8242_v34 = vmul.f32 -1.442695, %v8814_v6 }
 0x5bb   : > { %v10162_v33 = vpop.eup %10161  ;;  %10181 = vrcp.f32 %v7047_v54  ;;  %v7052_v38 = vadd.f32 1.0, %v10160_v35  ;;  %v8654_v1 = vpop.f32.mrb[217].mxu1  ;;  %v13122_v26 = vadd.f32 %v6459_v37, %v13021_v60  ;;  %v8816_v35 = vadd.f32 %v13103_v55, %v13021_v60 }
 0x5bc   : > { %v10164_v14 = vpop.eup %10163  ;;  %7374 = vst [vmem:[%s12759_s21 + $0x100] sm:$0xff] %v10162_v33  ;;  %10183 = vpow2.f32 %v8227_v13  ;;  %v6461_v45 = vpop.f32.mrb[186].mxu0  ;;  %v8655_v51 = vadd.f32 %v8654_v1, %v8653_v2 }
 0x5bd   : > { %v10166_v8 = vpop.eup %10165  ;;  %10185 = vrcp.f32 %v7052_v38  ;;  %v7053_v43 = vadd.f32 1.0, %v10164_v14  ;;  %v8656_v32 = vpop.f32.mrb[218].mxu1  ;;  %v13128_v49 = vadd.f32 %v6461_v45, %v13016_v61 }
 0x5be   : > { %v10168_v4 = vpop.eup %10167  ;;  %v7054_v18 = vadd.f32 1.0, %v10166_v8  ;;  %10187 = vpow2.f32 %v8228_v15  ;;  %v6463_v39 = vpop.f32.mrb[187].mxu0  ;;  %v13131_v12 = vadd.f32 %v8655_v51, %v13004_v28  ;;  %v8236_v28 = vmul.f32 -1.442695, %v13088_v24 }
 0x5bf   : > { %v8657_v63 = vpop.f32.mrb[219].mxu1  ;;  %v10170_v48 = vpop.eup %10169  ;;  %10189 = vrcp.f32 %v7053_v43  ;;  %v7059_v30 = vadd.f32 1.0, %v10168_v4  ;;  %v13134_v36 = vadd.f32 %v6463_v39, %v13021_v60  ;;  %v8815_v24 = vadd.f32 %v13100_v3, %v13016_v61 }
 0x5c0   : > { %v10172_v47 = vpop.eup %10171  ;;  %10191 = vrcp.f32 %v7054_v18  ;;  %v7060_v7 = vadd.f32 1.0, %v10170_v48  ;;  %v8658_v20 = vadd.f32 %v8657_v63, %v8656_v32  ;;  %v6467_v19 = vpop.f32.mrb[188].mxu0  ;;  %v8255_v32 = vmul.f32 -1.442695, %v13117_v22 }
 0x5c1   : > { %v10174_v53 = vpop.eup %10173  ;;  %10193 = vrcp.f32 %v7059_v30  ;;  %v7061_v56 = vadd.f32 1.0, %v10172_v47  ;;  %v8659_v58 = vpop.f32.mrb[220].mxu1  ;;  %v13147_v27 = vadd.f32 %v6467_v19, %v13016_v61  ;;  %v8248_v8 = vmul.f32 -1.442695, %v8815_v24 }
 0x5c2   : > { %v10176_v10 = vpop.eup %10175  ;;  %7375 = vst [vmem:[%s12759_s21 + $0x108] sm:$0xff] %v10174_v53  ;;  %10195 = vrcp.f32 %v7060_v7  ;;  %v13143_v46 = vadd.f32 %v8658_v20, %v13009_v17  ;;  %v6469_v42 = vpop.f32.mrb[189].mxu0  ;;  %v8256_v30 = vmul.f32 -1.442695, %v13122_v26  ;;  %v8257_v53 = vmul.f32 -1.442695, %v13131_v12 }
 0x5c3   : > { %v10178_v5 = vpop.eup %10177  ;;  %7376 = vst.msk [vmem:[%s12759_s21 + $0x110] sm:$0xff] %vm1892_vm0, %v10176_v10  ;;  %10197 = vrcp.f32 %v7061_v56  ;;  %v8660_v0 = vpop.f32.mrb[221].mxu1  ;;  %v13153_v17 = vadd.f32 %v6469_v42, %v13021_v60  ;;  %v8263_v42 = vmul.f32 -1.442695, %v13134_v36 }
 0x5c4   : > { %v10180_v11 = vpop.eup %10179  ;;  %7381 = vst [vmem:[%s12759_s21 + $0x138] sm:$0xff] %v10178_v5  ;;  %10199 = vpow2.f32 %v8229_v57  ;;  %v8661_v13 = vadd.f32 %v8660_v0, %v8659_v58  ;;  %v6471_v50 = vpop.f32.mrb[190].mxu0  ;;  %v8262_v58 = vmul.f32 -1.442695, %v13128_v49 }
 0x5c5   : > { %v10182_v25 = vpop.eup %10181  ;;  %7382 = vst [vmem:[%s12759_s21 + $0x140] sm:$0xff] %v10180_v11  ;;  %10201 = vpow2.f32 %v8234_v52  ;;  %v8662_v44 = vpop.f32.mrb[222].mxu1  ;;  %v13160_v15 = vadd.f32 %v6471_v50, %v13016_v61  ;;  %v8270_v50 = vmul.f32 -1.442695, %v13153_v17 }
 0x5c6   : > { %v10184_v54 = vpop.eup %10183  ;;  %7383 = vst.msk [vmem:[%s12759_s21 + $0x148] sm:$0xff] %vm1892_vm0, %v10182_v25  ;;  %10203 = vpow2.f32 %v8235_v31  ;;  %v6473_v33 = vpop.f32.mrb[191].mxu0  ;;  %v13163_v2 = vadd.f32 %v8661_v13, %v13014_v23  ;;  %v8249_v23 = vmul.f32 -1.442695, %v8816_v35  ;;  %v8264_v25 = vmul.f32 -1.442695, %v13143_v46 }
 0x5c7   : > { %v8663_v3 = vpop.f32.mrb[223].mxu1  ;;  %v10186_v38 = vpop.eup %10185  ;;  %v7066_v40 = vadd.f32 1.0, %v10184_v54  ;;  %10205 = vpow2.f32 %v8236_v28  ;;  %v13168_v55 = vadd.f32 %v6473_v33, %v13021_v60  ;;  %v8250_v60 = vmul.f32 -1.442695, %v13111_v9 }
 0x5c8   : > { %v10188_v14 = vpop.eup %10187  ;;  %7388 = vst [vmem:[%s12759_s21 + $0x170] sm:$0xff] %v10186_v38  ;;  %10207 = vpow2.f32 %v8241_v29  ;;  %v8664_v61 = vadd.f32 %v8663_v3, %v8662_v44  ;;  %v8269_v13 = vmul.f32 -1.442695, %v13147_v27  ;;  %v8271_v46 = vmul.f32 -1.442695, %v13163_v2 }
 0x5c9   : > { %v10190_v37 = vpop.eup %10189  ;;  %10209 = vrcp.f32 %v7066_v40  ;;  %v7067_v1 = vadd.f32 1.0, %v10188_v14  ;;  %v8276_v17 = vmul.f32 -1.442695, %v13160_v15  ;;  %v8277_v3 = vmul.f32 -1.442695, %v13168_v55 }
 0x5ca   : > { %v10192_v43 = vpop.eup %10191  ;;  %7389 = vst [vmem:[%s12759_s21 + $0x178] sm:$0xff] %v10190_v37  ;;  %10211 = vpow2.f32 %v8242_v34  ;;  %v13172_v62 = vadd.f32 %v8664_v61, %v13019_v16 }
 0x5cb   : > { %v10194_v45 = vpop.eup %10193  ;;  %7390 = vst.msk [vmem:[%s12759_s21 + $0x180] sm:$0xff] %vm1892_vm0, %v10192_v43  ;;  %10213 = vrcp.f32 %v7067_v1 }
 0x5cc   : > { %v10196_v21 = vpop.eup %10195  ;;  %7395 = vst [vmem:[%s12759_s21 + $0x1a8] sm:$0xff] %v10194_v45  ;;  %10215 = vpow2.f32 %v8243_v41  ;;  %v8278_v40 = vmul.f32 -1.442695, %v13172_v62 }
 0x5cd   : > { %v10198_v4 = vpop.eup %10197  ;;  %7396 = vst [vmem:[%s12759_s21 + $0x1b0] sm:$0xff] %v10196_v21  ;;  %10217 = vpow2.f32 %v8248_v8 }
 0x5ce   : > { %v10200_v18 = vpop.eup %10199  ;;  %7397 = vst.msk [vmem:[%s12759_s21 + $0x1b8] sm:$0xff] %vm1892_vm0, %v10198_v4  ;;  %10219 = vpow2.f32 %v8249_v23 }
 0x5cf   : > { %v10202_v16 = vpop.eup %10201  ;;  %v7068_v57 = vadd.f32 1.0, %v10200_v18  ;;  %10221 = vpow2.f32 %v8250_v60 }
 0x5d0   : > { %v10204_v51 = vpop.eup %10203  ;;  %v7073_v39 = vadd.f32 1.0, %v10202_v16  ;;  %10223 = vpow2.f32 %v8255_v32 }
 0x5d1   : > { %v10206_v9 = vpop.eup %10205  ;;  %10225 = vrcp.f32 %v7068_v57  ;;  %v7074_v63 = vadd.f32 1.0, %v10204_v51 }
 0x5d2   : > { %v10208_v48 = vpop.eup %10207  ;;  %10227 = vrcp.f32 %v7073_v39  ;;  %v7075_v22 = vadd.f32 1.0, %v10206_v9 }
 0x5d3   : > { %v10210_v59 = vpop.eup %10209  ;;  %10229 = vrcp.f32 %v7074_v63  ;;  %v7080_v47 = vadd.f32 1.0, %v10208_v48 }
 0x5d4   : > { %v10212_v7 = vpop.eup %10211  ;;  %7402 = vst [vmem:[%s12759_s21 + $0x1e0] sm:$0xff] %v10210_v59  ;;  %10231 = vrcp.f32 %v7075_v22 }
 0x5d5   : > { %v10214_v56 = vpop.eup %10213  ;;  %10233 = vrcp.f32 %v7080_v47  ;;  %v7081_v52 = vadd.f32 1.0, %v10212_v7 }
 0x5d6   : > { %v10216_v20 = vpop.eup %10215  ;;  %7403 = vst [vmem:[%s12759_s21 + $0x1e8] sm:$0xff] %v10214_v56  ;;  %10235 = vpow2.f32 %v8256_v30 }
 0x5d7   : > { %v10218_v10 = vpop.eup %10217  ;;  %10237 = vrcp.f32 %v7081_v52  ;;  %v7082_v31 = vadd.f32 1.0, %v10216_v20 }
 0x5d8   : > { %v10220_v6 = vpop.eup %10219  ;;  %v7087_v26 = vadd.f32 1.0, %v10218_v10  ;;  %10239 = vpow2.f32 %v8257_v53 }
 0x5d9   : > { %v10222_v5 = vpop.eup %10221  ;;  %10241 = vrcp.f32 %v7082_v31  ;;  %v7088_v28 = vadd.f32 1.0, %v10220_v6 }
 0x5da   : > { %v10224_v19 = vpop.eup %10223  ;;  %10243 = vrcp.f32 %v7087_v26  ;;  %v7089_v12 = vadd.f32 1.0, %v10222_v5 }
 0x5db   : > { %v10226_v11 = vpop.eup %10225  ;;  %10245 = vrcp.f32 %v7088_v28  ;;  %v7094_v29 = vadd.f32 1.0, %v10224_v19 }
 0x5dc   : > { %v10228_v0 = vpop.eup %10227  ;;  %7404 = vst.msk [vmem:[%s12759_s21 + $0x1f0] sm:$0xff] %vm1892_vm0, %v10226_v11  ;;  %10247 = vrcp.f32 %v7089_v12 }
 0x5dd   : > { %v10230_v24 = vpop.eup %10229  ;;  %7409 = vst [vmem:[%s12759_s21 + $0x218] sm:$0xff] %v10228_v0  ;;  %10249 = vrcp.f32 %v7094_v29 }
 0x5de   : > { %v10232_v49 = vpop.eup %10231  ;;  %7410 = vst [vmem:[%s12759_s21 + $0x220] sm:$0xff] %v10230_v24  ;;  %10251 = vpow2.f32 %v8262_v58 }
 0x5df   : > { %v10234_v44 = vpop.eup %10233  ;;  %7411 = vst.msk [vmem:[%s12759_s21 + $0x228] sm:$0xff] %vm1892_vm0, %v10232_v49  ;;  %10253 = vpow2.f32 %v8263_v42 }
 0x5e0   : > { %v10236_v36 = vpop.eup %10235  ;;  %7416 = vst [vmem:[%s12759_s21 + $0x250] sm:$0xff] %v10234_v44  ;;  %10255 = vpow2.f32 %v8264_v25 }
 0x5e1   : > { %v10238_v54 = vpop.eup %10237  ;;  %v7095_v34 = vadd.f32 1.0, %v10236_v36  ;;  %10257 = vpow2.f32 %v8269_v13 }
 0x5e2   : > { %v10240_v27 = vpop.eup %10239  ;;  %7417 = vst [vmem:[%s12759_s21 + $0x258] sm:$0xff] %v10238_v54  ;;  %10259 = vpow2.f32 %v8270_v50 }
 0x5e3   : > { %v10242_v35 = vpop.eup %10241  ;;  %10261 = vrcp.f32 %v7095_v34  ;;  %v7096_v33 = vadd.f32 1.0, %v10240_v27 }
 0x5e4   : > { %v10244_v38 = vpop.eup %10243  ;;  %7418 = vst.msk [vmem:[%s12759_s21 + $0x260] sm:$0xff] %vm1892_vm0, %v10242_v35  ;;  %10263 = vpow2.f32 %v8271_v46 }
 0x5e5   : > { %v10246_v2 = vpop.eup %10245  ;;  %7423 = vst [vmem:[%s12759_s21 + $0x288] sm:$0xff] %v10244_v38  ;;  %10265 = vrcp.f32 %v7096_v33 }
 0x5e6   : > { %v10248_v14 = vpop.eup %10247  ;;  %7424 = vst [vmem:[%s12759_s21 + $0x290] sm:$0xff] %v10246_v2  ;;  %10267 = vpow2.f32 %v8276_v17 }
 0x5e7   : > { %v10250_v15 = vpop.eup %10249  ;;  %7425 = vst.msk [vmem:[%s12759_s21 + $0x298] sm:$0xff] %vm1892_vm0, %v10248_v14  ;;  %10269 = vpow2.f32 %v8277_v3 }
 0x5e8   : > { %v10252_v41 = vpop.eup %10251  ;;  %7430 = vst [vmem:[%s12759_s21 + $0x2c0] sm:$0xff] %v10250_v15  ;;  %10271 = vpow2.f32 %v8278_v40 }
 0x5e9   : > { %v10254_v55 = vpop.eup %10253  ;;  %v7101_v61 = vadd.f32 1.0, %v10252_v41 }
 0x5ea   : > { %v10256_v37 = vpop.eup %10255  ;;  %v7102_v1 = vadd.f32 1.0, %v10254_v55 }
 0x5eb   : > { %v10258_v8 = vpop.eup %10257  ;;  %10273 = vrcp.f32 %v7101_v61  ;;  %v7103_v43 = vadd.f32 1.0, %v10256_v37 }
 0x5ec   : > { %v10260_v23 = vpop.eup %10259  ;;  %10275 = vrcp.f32 %v7102_v1  ;;  %v7108_v62 = vadd.f32 1.0, %v10258_v8 }
 0x5ed   : > { %v10262_v45 = vpop.eup %10261  ;;  %10277 = vrcp.f32 %v7103_v43  ;;  %v7109_v60 = vadd.f32 1.0, %v10260_v23 }
 0x5ee   : > { %v10264_v21 = vpop.eup %10263  ;;  %7431 = vst [vmem:[%s12759_s21 + $0x2c8] sm:$0xff] %v10262_v45  ;;  %10279 = vrcp.f32 %v7108_v62 }
 0x5ef   : > { %v10266_v32 = vpop.eup %10265  ;;  %10281 = vrcp.f32 %v7109_v60  ;;  %v7110_v4 = vadd.f32 1.0, %v10264_v21 }
 0x5f0   : > { %v10268_v18 = vpop.eup %10267  ;;  %7432 = vst.msk [vmem:[%s12759_s21 + $0x2d0] sm:$0xff] %vm1892_vm0, %v10266_v32 }
 0x5f1   : > { %v10270_v16 = vpop.eup %10269  ;;  %10283 = vrcp.f32 %v7110_v4  ;;  %v7115_v57 = vadd.f32 1.0, %v10268_v18 }
 0x5f2   : > { %v10272_v51 = vpop.eup %10271  ;;  %v7116_v39 = vadd.f32 1.0, %v10270_v16 }
 0x5f3   : > { %10285 = vrcp.f32 %v7115_v57  ;;  %v7117_v9 = vadd.f32 1.0, %v10272_v51 }
 0x5f4   : > { %10287 = vrcp.f32 %v7116_v39 }
 0x5f5   : > { %v10274_v63 = vpop.eup %10273  ;;  %10289 = vrcp.f32 %v7117_v9 }
 0x5f6   : > { %v10276_v48 = vpop.eup %10275  ;;  %7437 = vst [vmem:[%s12759_s21 + $0x2f8] sm:$0xff] %v10274_v63 }
 0x5f7   : > { %v10278_v22 = vpop.eup %10277  ;;  %7438 = vst [vmem:[%s12759_s21 + $0x300] sm:$0xff] %v10276_v48 }
 0x5f8   : > { %v10280_v30 = vpop.eup %10279  ;;  %7439 = vst.msk [vmem:[%s12759_s21 + $0x308] sm:$0xff] %vm1892_vm0, %v10278_v22 }
 0x5f9   : > { %v10282_v59 = vpop.eup %10281  ;;  %7444 = vst [vmem:[%s12759_s21 + $0x330] sm:$0xff] %v10280_v30 }
 0x5fa   : > { %7445 = vst [vmem:[%s12759_s21 + $0x338] sm:$0xff] %v10282_v59 }
 0x5fb   : > { %v10284_v47 = vpop.eup %10283 }
 0x5fc   : > { %7446 = vst.msk [vmem:[%s12759_s21 + $0x340] sm:$0xff] %vm1892_vm0, %v10284_v47 }
 0x5fd   : > { %v10286_v7 = vpop.eup %10285 }
 0x5fe   : > { %v10288_v53 = vpop.eup %10287  ;;  %7451 = vst [vmem:[%s12759_s21 + $0x368] sm:$0xff] %v10286_v7 }
 0x5ff   : > { %v10290_v56 = vpop.eup %10289  ;;  %7452 = vst [vmem:[%s12759_s21 + $0x370] sm:$0xff] %v10288_v53 }
 0x600   : > { %7453 = vst.msk [vmem:[%s12759_s21 + $0x378] sm:$0xff] %vm1892_vm0, %v10290_v56 }
 0x601 PF: > { %s25_s29 = sadd.s32 1, %s10298_s29  }
 0x602   : > { %p22_p4 = scmp.ge.s32.totalorder %s25_s29, 4  }
 0x604   :  { %24 = sbr.rel (!%p22_p4) target bundleno = 1 (0x1), region = 125 }

</bundles_post_ra>
